<compile_context>
chip_gen: v7x
topology: tpu7x:2x2x1
jax: 0.10.0
libtpu: 0.0.40
codegen_flags: <defaults>
</compile_context>

<pallas_src>
import functools

import numpy as np

import jax
import jax.numpy as jnp
from jax.experimental import pallas as pl
from jax.experimental.pallas import tpu as pltpu

LANE = 128
LOG_STD_MIN = -20.0
LOG_STD_MAX = 2.0


def _vmem_spec():
    return pl.BlockSpec(memory_space=pltpu.MemorySpace.VMEM)


# ---------------------------------------------------------------------------
# Host-side helpers (shape-only constants + raw-input glue).
# ---------------------------------------------------------------------------
def _conv_out(size, k, s):
    return (size - k) // s + 1


def _im2col_nhwc(x, k, s):
    """x: (B,H,W,C) -> (B*OH*OW, k*k*C); patch column order (kh, kw, c)."""
    B, H, W, C = x.shape
    OH, OW = _conv_out(H, k, s), _conv_out(W, k, s)
    cols = []
    for kh in range(k):
        for kw in range(k):
            cols.append(x[:, kh:kh + s * (OH - 1) + 1:s,
                          kw:kw + s * (OW - 1) + 1:s, :])
    patches = jnp.concatenate(cols, axis=-1)            # (B, OH, OW, k*k*C)
    return patches.reshape(B * OH * OW, k * k * C), (OH, OW)


@functools.lru_cache(maxsize=None)
def _conv_selection(B, IH, IW, OH, OW, k, s):
    """0/1 matrices S[kh*k+kw]: (S[t] @ rows_in)[(b*OH+oh)*OW+ow, :] =
    rows_in[(b*IH + s*oh + kh)*IW + s*ow + kw, :]  (in-kernel im2col on MXU)."""
    S = np.zeros((k * k, B * OH * OW, B * IH * IW), dtype=np.float32)
    for kh in range(k):
        for kw in range(k):
            t = kh * k + kw
            for b in range(B):
                for oh in range(OH):
                    for ow in range(OW):
                        S[t, (b * OH + oh) * OW + ow,
                          (b * IH + s * oh + kh) * IW + (s * ow + kw)] = 1.0
    return S


@functools.lru_cache(maxsize=None)
def _flatten_selection(B, P):
    """S[p] @ rows (B*P, C) selects spatial position p for every batch item."""
    S = np.zeros((P, B, B * P), dtype=np.float32)
    for p in range(P):
        for b in range(B):
            S[p, b, b * P + p] = 1.0
    return S


# ---------------------------------------------------------------------------
# Fused forward: one pallas_call for the whole network.
# ---------------------------------------------------------------------------
def tsac_policy_forward(params, x_nchw, action_dim):
    B = x_nchw.shape[0]
    hidden = params["mean_fc2_w"].shape[0]

    # Host glue: NCHW->NHWC + im2col of the raw input (read from HBM once).
    x = jnp.transpose(x_nchw, (0, 2, 3, 1))
    p1, (oh1, ow1) = _im2col_nhwc(x, k=8, s=4)
    oh2, ow2 = _conv_out(oh1, 4, 2), _conv_out(ow1, 4, 2)
    oh3, ow3 = _conv_out(oh2, 3, 1), _conv_out(ow2, 3, 1)
    # 0/1 gather matrices: ship as bf16 (exact for 0/1) -> half the DMA bytes.
    s2 = jnp.asarray(_conv_selection(B, oh1, ow1, oh2, ow2, 4, 2),
                     dtype=jnp.bfloat16)
    s3 = jnp.asarray(_conv_selection(B, oh2, ow2, oh3, ow3, 3, 1),
                     dtype=jnp.bfloat16)
    s4 = jnp.asarray(_flatten_selection(B, oh3 * ow3), dtype=jnp.bfloat16)

    def kernel(p1_ref, s2_ref, s3_ref, s4_ref, w1_ref, w2_ref, w3_ref,
               mfc1_ref, mfc2_ref, mout_ref, vfcf_ref, vfcm_ref, vfc2_ref,
               lout_ref, vec_ref, out_ref):
        def vec(i, w):                          # packed (1, w) bias/gamma/beta
            return vec_ref[i:i + 1, :w]

        def mm(a, b):
            return jnp.dot(a, b, preferred_element_type=jnp.float32)

        def layer_norm(t, g, b):
            mu = jnp.mean(t, axis=-1, keepdims=True)
            d = t - mu
            var = jnp.mean(d * d, axis=-1, keepdims=True)
            return d * jax.lax.rsqrt(var + 1e-5) * g + b       # rsqrt -> EUP

        def leaky_relu(t):
            return jnp.where(t > 0, t, 0.01 * t)

        def conv_from_rows(rows, s_ref, w_ref, bias):
            """relu(im2col(rows) @ W + b): patch gather as 0/1 selection
            matmuls; lane-concat folded into per-tap weight blocks w_ref[t]."""
            taps = s_ref.shape[0]
            acc = mm(mm(s_ref[0].astype(jnp.float32), rows), w_ref[0])
            for t in range(1, taps):
                acc = acc + mm(mm(s_ref[t].astype(jnp.float32), rows),
                               w_ref[t])
            return jnp.maximum(acc + bias, 0.0)

        # ---- conv stack (all activations stay on-chip) ----
        a1 = jnp.maximum(mm(p1_ref[...], w1_ref[...]) +
                         vec(0, w1_ref.shape[1]), 0.0)      # (B*OH1*OW1, 32)
        a2 = conv_from_rows(a1, s2_ref, w2_ref, vec(1, w2_ref.shape[2]))
        a3 = conv_from_rows(a2, s3_ref, w3_ref, vec(2, w3_ref.shape[2]))

        # ---- flatten (b, oh3, ow3) rows -> (B, oh3*ow3*64) features ----
        if s4_ref.shape[0] == 1:                # final spatial map is 1x1
            feat = a3
        else:
            feat = jnp.concatenate(
                [mm(s4_ref[p].astype(jnp.float32), a3)
                 for p in range(s4_ref.shape[0])], axis=1)

        h = hidden
        # ---- mean head ----
        m = leaky_relu(layer_norm(mm(feat, mfc1_ref[...]) + vec(3, h),
                                  vec(4, h), vec(5, h)))
        m = leaky_relu(layer_norm(mm(m, mfc2_ref[...]) + vec(6, h),
                                  vec(7, h), vec(8, h)))
        mean_pad = mm(m, mout_ref[...]) + vec(9, LANE)       # (B,128), cols>=A are 0

        # ---- log_std head; cat([features, mean]) via weight split ----
        v = mm(feat, vfcf_ref[...]) + mm(mean_pad, vfcm_ref[...]) + vec(10, h)
        v = leaky_relu(layer_norm(v, vec(11, h), vec(12, h)))
        v = leaky_relu(layer_norm(mm(v, vfc2_ref[...]) + vec(13, h),
                                  vec(14, h), vec(15, h)))
        logstd_pad = jnp.clip(mm(v, lout_ref[...]) + vec(16, LANE),
                              LOG_STD_MIN, LOG_STD_MAX)

        # Lane-dense (128-wide) stores; sliced to action_dim outside.
        out_ref[0, :, :] = mean_pad
        out_ref[1, :, :] = logstd_pad

    args = (p1, s2, s3, s4,
            params["conv1_w"], params["conv2_w"], params["conv3_w"],
            params["mean_fc1_w"], params["mean_fc2_w"], params["mean_out_w"],
            params["var_fc1_wf"], params["var_fc1_wm"], params["var_fc2_w"],
            params["log_std_out_w"], params["vecs"])
    out = pl.pallas_call(
        kernel,
        out_shape=jax.ShapeDtypeStruct((2, B, LANE), jnp.float32),
        in_specs=[_vmem_spec()] * len(args),
        out_specs=_vmem_spec(),
    )(*args)
    return out[0, :, :action_dim], out[1, :, :action_dim]


# ---------------------------------------------------------------------------
# Deterministic synthetic parameters in "kernel layout".
#   PyTorch mapping: conv*.weight (OC,IC,KH,KW) -> per-tap (kh,kw) block
#   weight[:,:,kh,kw].T stacked into (k*k, IC, OC); linear.weight -> weight.T;
#   mean_out / log_std_out padded to 128 columns; var_fc1.weight split into a
#   feature block + an action block (padded to 128 rows); all 1-D biases / LN
#   params packed row-wise into `vecs`.
# ---------------------------------------------------------------------------
def init_params(key, input_shape, action_dim, hidden_dim):
    C, Hin, Win = input_shape
    assert hidden_dim <= LANE and action_dim <= LANE
    oh1, ow1 = _conv_out(Hin, 8, 4), _conv_out(Win, 8, 4)
    oh2, ow2 = _conv_out(oh1, 4, 2), _conv_out(ow1, 4, 2)
    oh3, ow3 = _conv_out(oh2, 3, 1), _conv_out(ow2, 3, 1)
    assert min(oh3, ow3) >= 1, "input spatial size too small for the conv stack"
    feature_size = oh3 * ow3 * 64

    keys = iter(jax.random.split(key, 16))

    def W(shape, scale=0.05):
        return scale * jax.random.normal(next(keys), shape, dtype=jnp.float32)

    H, A = hidden_dim, action_dim
    # xavier_uniform_(gain=0.01) emulated with a tiny scale; zero-padded lanes.
    mean_out_w = jnp.zeros((H, LANE), jnp.float32).at[:, :A].set(W((H, A), 0.001))
    log_std_out_w = jnp.zeros((H, LANE), jnp.float32).at[:, :A].set(W((H, A)))
    var_fc1_wm = jnp.zeros((LANE, H), jnp.float32).at[:A, :].set(W((A, H)))

    def vrow(v):
        return jnp.pad(v, (0, LANE - v.shape[0]))

    z = lambda n: jnp.zeros((n,), jnp.float32)
    o = lambda n: jnp.ones((n,), jnp.float32)
    vecs = jnp.stack([
        vrow(z(32)),  # 0  conv1 bias
        vrow(z(64)),  # 1  conv2 bias
        vrow(z(64)),  # 2  conv3 bias
        vrow(z(H)),   # 3  mean_fc1 bias
        vrow(o(H)),   # 4  mean_ln1 gamma
        vrow(z(H)),   # 5  mean_ln1 beta
        vrow(z(H)),   # 6  mean_fc2 bias
        vrow(o(H)),   # 7  mean_ln2 gamma
        vrow(z(H)),   # 8  mean_ln2 beta
        vrow(z(A)),   # 9  mean_out bias (padded to 128)
        vrow(z(H)),   # 10 var_fc1 bias
        vrow(o(H)),   # 11 var_ln1 gamma
        vrow(z(H)),   # 12 var_ln1 beta
        vrow(z(H)),   # 13 var_fc2 bias
        vrow(o(H)),   # 14 var_ln2 gamma
        vrow(z(H)),   # 15 var_ln2 beta
        vrow(z(A)),   # 16 log_std_out bias (padded to 128)
    ])

    params = {
        "conv1_w": W((8 * 8 * C, 32)),
        "conv2_w": W((4 * 4, 32, 64)),      # per-tap (taps, cin, cout)
        "conv3_w": W((3 * 3, 64, 64)),      # per-tap (taps, cin, cout)
        "mean_fc1_w": W((feature_size, H)),
        "mean_fc2_w": W((H, H)),
        "mean_out_w": mean_out_w,
        "var_fc1_wf": W((feature_size, H)),
        "var_fc1_wm": var_fc1_wm,
        "var_fc2_w": W((H, H)),
        "log_std_out_w": log_std_out_w,
        "vecs": vecs,
    }
    return params, feature_size


if __name__ == "__main__":
    B = 2
    input_shape = (4, 36, 36)   # smallest spatial size the 8/4,4/2,3/1 stack admits
    action_dim = 4
    hidden_dim = 32

    key = jax.random.PRNGKey(0)
    pkey, xkey = jax.random.split(key)
    params, feature_size = init_params(pkey, input_shape, action_dim, hidden_dim)
    x = jax.random.normal(xkey, (B,) + input_shape, dtype=jnp.float32)

    fwd = jax.jit(functools.partial(tsac_policy_forward, action_dim=action_dim))
    mean, log_std = fwd(params, x)
    jax.block_until_ready((mean, log_std))

    assert mean.shape == (B, action_dim), mean.shape
    assert log_std.shape == (B, action_dim), log_std.shape
    assert bool(jnp.all(jnp.isfinite(mean))) and bool(jnp.all(jnp.isfinite(log_std)))
    assert bool(jnp.all(log_std >= LOG_STD_MIN)) and bool(jnp.all(log_std <= LOG_STD_MAX))

    print("KERNEL_OK")
</pallas_src>

<mosaic_0001>
module attributes {stable_mosaic.version = 11 : i64} {
  func.func @kernel(%arg0: memref<128x256xf32, #tpu.memory_space<vmem>>, %arg1: memref<16x18x128xbf16, #tpu.memory_space<vmem>>, %arg2: memref<9x2x18xbf16, #tpu.memory_space<vmem>>, %arg3: memref<1x2x2xbf16, #tpu.memory_space<vmem>>, %arg4: memref<256x32xf32, #tpu.memory_space<vmem>>, %arg5: memref<16x32x64xf32, #tpu.memory_space<vmem>>, %arg6: memref<9x64x64xf32, #tpu.memory_space<vmem>>, %arg7: memref<64x32xf32, #tpu.memory_space<vmem>>, %arg8: memref<32x32xf32, #tpu.memory_space<vmem>>, %arg9: memref<32x128xf32, #tpu.memory_space<vmem>>, %arg10: memref<64x32xf32, #tpu.memory_space<vmem>>, %arg11: memref<128x32xf32, #tpu.memory_space<vmem>>, %arg12: memref<32x32xf32, #tpu.memory_space<vmem>>, %arg13: memref<32x128xf32, #tpu.memory_space<vmem>>, %arg14: memref<17x128xf32, #tpu.memory_space<vmem>>, %arg15: memref<2x2x128xf32, #tpu.memory_space<vmem>>) attributes {dimension_semantics = [], scalar_prefetch = 0 : i64, scratch_operands = 0 : i64, tpu.core_type = #tpu.core_type<tc>} {
    %c0 = arith.constant 0 : index
    %c0_0 = arith.constant 0 : index
    %0 = vector.load %arg0[%c0, %c0_0] : memref<128x256xf32, #tpu.memory_space<vmem>>, vector<128x256xf32>
    %c0_1 = arith.constant 0 : index
    %c0_2 = arith.constant 0 : index
    %1 = vector.load %arg4[%c0_1, %c0_2] : memref<256x32xf32, #tpu.memory_space<vmem>>, vector<256x32xf32>
    %cst = arith.constant dense<0.000000e+00> : vector<128x32xf32>
    %2 = tpu.matmul %0, %1, %cst {dimension_numbers = #tpu.dot_dimension_numbers<[1], [0], [0], [1], [0, 0, 1, 1], [], []>} : vector<128x256xf32>, vector<256x32xf32>, vector<128x32xf32> -> vector<128x32xf32>
    %c0_3 = arith.constant 0 : index
    %c0_4 = arith.constant 0 : index
    %3 = vector.load %arg14[%c0_3, %c0_4] : memref<17x128xf32, #tpu.memory_space<vmem>>, vector<1x32xf32>
    %4 = vector.broadcast %3 : vector<1x32xf32> to vector<128x32xf32>
    %5 = arith.addf %2, %4 : vector<128x32xf32>
    %cst_5 = arith.constant 0.000000e+00 : f32
    %6 = vector.broadcast %cst_5 : f32 to vector<128x32xf32>
    %7 = arith.maximumf %5, %6 : vector<128x32xf32>
    %c1 = arith.constant 1 : index
    %c0_6 = arith.constant 0 : index
    %8 = vector.load %arg14[%c1, %c0_6] : memref<17x128xf32, #tpu.memory_space<vmem>>, vector<1x64xf32>
    %c0_7 = arith.constant 0 : index
    %c0_8 = arith.constant 0 : index
    %c0_9 = arith.constant 0 : index
    %9 = vector.load %arg1[%c0_7, %c0_8, %c0_9] : memref<16x18x128xbf16, #tpu.memory_space<vmem>>, vector<1x18x128xbf16>
    %10 = vector.shape_cast %9 : vector<1x18x128xbf16> to vector<18x128xbf16>
    %11 = arith.extf %10 : vector<18x128xbf16> to vector<18x128xf32>
    %cst_10 = arith.constant dense<0.000000e+00> : vector<18x32xf32>
    %12 = tpu.matmul %11, %7, %cst_10 {dimension_numbers = #tpu.dot_dimension_numbers<[1], [0], [0], [1], [0, 0, 1, 1], [], []>} : vector<18x128xf32>, vector<128x32xf32>, vector<18x32xf32> -> vector<18x32xf32>
    %c0_11 = arith.constant 0 : index
    %c0_12 = arith.constant 0 : index
    %c0_13 = arith.constant 0 : index
    %13 = vector.load %arg5[%c0_11, %c0_12, %c0_13] : memref<16x32x64xf32, #tpu.memory_space<vmem>>, vector<1x32x64xf32>
    %14 = vector.shape_cast %13 : vector<1x32x64xf32> to vector<32x64xf32>
    %cst_14 = arith.constant dense<0.000000e+00> : vector<18x64xf32>
    %15 = tpu.matmul %12, %14, %cst_14 {dimension_numbers = #tpu.dot_dimension_numbers<[1], [0], [0], [1], [0, 0, 1, 1], [], []>} : vector<18x32xf32>, vector<32x64xf32>, vector<18x64xf32> -> vector<18x64xf32>
    %c1_15 = arith.constant 1 : index
    %c0_16 = arith.constant 0 : index
    %c0_17 = arith.constant 0 : index
    %16 = vector.load %arg1[%c1_15, %c0_16, %c0_17] : memref<16x18x128xbf16, #tpu.memory_space<vmem>>, vector<1x18x128xbf16>
    %17 = vector.shape_cast %16 : vector<1x18x128xbf16> to vector<18x128xbf16>
    %18 = arith.extf %17 : vector<18x128xbf16> to vector<18x128xf32>
    %cst_18 = arith.constant dense<0.000000e+00> : vector<18x32xf32>
    %19 = tpu.matmul %18, %7, %cst_18 {dimension_numbers = #tpu.dot_dimension_numbers<[1], [0], [0], [1], [0, 0, 1, 1], [], []>} : vector<18x128xf32>, vector<128x32xf32>, vector<18x32xf32> -> vector<18x32xf32>
    %c1_19 = arith.constant 1 : index
    %c0_20 = arith.constant 0 : index
    %c0_21 = arith.constant 0 : index
    %20 = vector.load %arg5[%c1_19, %c0_20, %c0_21] : memref<16x32x64xf32, #tpu.memory_space<vmem>>, vector<1x32x64xf32>
    %21 = vector.shape_cast %20 : vector<1x32x64xf32> to vector<32x64xf32>
    %cst_22 = arith.constant dense<0.000000e+00> : vector<18x64xf32>
    %22 = tpu.matmul %19, %21, %cst_22 {dimension_numbers = #tpu.dot_dimension_numbers<[1], [0], [0], [1], [0, 0, 1, 1], [], []>} : vector<18x32xf32>, vector<32x64xf32>, vector<18x64xf32> -> vector<18x64xf32>
    %23 = arith.addf %15, %22 : vector<18x64xf32>
    %c2 = arith.constant 2 : index
    %c0_23 = arith.constant 0 : index
    %c0_24 = arith.constant 0 : index
    %24 = vector.load %arg1[%c2, %c0_23, %c0_24] : memref<16x18x128xbf16, #tpu.memory_space<vmem>>, vector<1x18x128xbf16>
    %25 = vector.shape_cast %24 : vector<1x18x128xbf16> to vector<18x128xbf16>
    %26 = arith.extf %25 : vector<18x128xbf16> to vector<18x128xf32>
    %cst_25 = arith.constant dense<0.000000e+00> : vector<18x32xf32>
    %27 = tpu.matmul %26, %7, %cst_25 {dimension_numbers = #tpu.dot_dimension_numbers<[1], [0], [0], [1], [0, 0, 1, 1], [], []>} : vector<18x128xf32>, vector<128x32xf32>, vector<18x32xf32> -> vector<18x32xf32>
    %c2_26 = arith.constant 2 : index
    %c0_27 = arith.constant 0 : index
    %c0_28 = arith.constant 0 : index
    %28 = vector.load %arg5[%c2_26, %c0_27, %c0_28] : memref<16x32x64xf32, #tpu.memory_space<vmem>>, vector<1x32x64xf32>
    %29 = vector.shape_cast %28 : vector<1x32x64xf32> to vector<32x64xf32>
    %cst_29 = arith.constant dense<0.000000e+00> : vector<18x64xf32>
    %30 = tpu.matmul %27, %29, %cst_29 {dimension_numbers = #tpu.dot_dimension_numbers<[1], [0], [0], [1], [0, 0, 1, 1], [], []>} : vector<18x32xf32>, vector<32x64xf32>, vector<18x64xf32> -> vector<18x64xf32>
    %31 = arith.addf %23, %30 : vector<18x64xf32>
    %c3 = arith.constant 3 : index
    %c0_30 = arith.constant 0 : index
    %c0_31 = arith.constant 0 : index
    %32 = vector.load %arg1[%c3, %c0_30, %c0_31] : memref<16x18x128xbf16, #tpu.memory_space<vmem>>, vector<1x18x128xbf16>
    %33 = vector.shape_cast %32 : vector<1x18x128xbf16> to vector<18x128xbf16>
    %34 = arith.extf %33 : vector<18x128xbf16> to vector<18x128xf32>
    %cst_32 = arith.constant dense<0.000000e+00> : vector<18x32xf32>
    %35 = tpu.matmul %34, %7, %cst_32 {dimension_numbers = #tpu.dot_dimension_numbers<[1], [0], [0], [1], [0, 0, 1, 1], [], []>} : vector<18x128xf32>, vector<128x32xf32>, vector<18x32xf32> -> vector<18x32xf32>
    %c3_33 = arith.constant 3 : index
    %c0_34 = arith.constant 0 : index
    %c0_35 = arith.constant 0 : index
    %36 = vector.load %arg5[%c3_33, %c0_34, %c0_35] : memref<16x32x64xf32, #tpu.memory_space<vmem>>, vector<1x32x64xf32>
    %37 = vector.shape_cast %36 : vector<1x32x64xf32> to vector<32x64xf32>
    %cst_36 = arith.constant dense<0.000000e+00> : vector<18x64xf32>
    %38 = tpu.matmul %35, %37, %cst_36 {dimension_numbers = #tpu.dot_dimension_numbers<[1], [0], [0], [1], [0, 0, 1, 1], [], []>} : vector<18x32xf32>, vector<32x64xf32>, vector<18x64xf32> -> vector<18x64xf32>
    %39 = arith.addf %31, %38 : vector<18x64xf32>
    %c4 = arith.constant 4 : index
    %c0_37 = arith.constant 0 : index
    %c0_38 = arith.constant 0 : index
    %40 = vector.load %arg1[%c4, %c0_37, %c0_38] : memref<16x18x128xbf16, #tpu.memory_space<vmem>>, vector<1x18x128xbf16>
    %41 = vector.shape_cast %40 : vector<1x18x128xbf16> to vector<18x128xbf16>
    %42 = arith.extf %41 : vector<18x128xbf16> to vector<18x128xf32>
    %cst_39 = arith.constant dense<0.000000e+00> : vector<18x32xf32>
    %43 = tpu.matmul %42, %7, %cst_39 {dimension_numbers = #tpu.dot_dimension_numbers<[1], [0], [0], [1], [0, 0, 1, 1], [], []>} : vector<18x128xf32>, vector<128x32xf32>, vector<18x32xf32> -> vector<18x32xf32>
    %c4_40 = arith.constant 4 : index
    %c0_41 = arith.constant 0 : index
    %c0_42 = arith.constant 0 : index
    %44 = vector.load %arg5[%c4_40, %c0_41, %c0_42] : memref<16x32x64xf32, #tpu.memory_space<vmem>>, vector<1x32x64xf32>
    %45 = vector.shape_cast %44 : vector<1x32x64xf32> to vector<32x64xf32>
    %cst_43 = arith.constant dense<0.000000e+00> : vector<18x64xf32>
    %46 = tpu.matmul %43, %45, %cst_43 {dimension_numbers = #tpu.dot_dimension_numbers<[1], [0], [0], [1], [0, 0, 1, 1], [], []>} : vector<18x32xf32>, vector<32x64xf32>, vector<18x64xf32> -> vector<18x64xf32>
    %47 = arith.addf %39, %46 : vector<18x64xf32>
    %c5 = arith.constant 5 : index
    %c0_44 = arith.constant 0 : index
    %c0_45 = arith.constant 0 : index
    %48 = vector.load %arg1[%c5, %c0_44, %c0_45] : memref<16x18x128xbf16, #tpu.memory_space<vmem>>, vector<1x18x128xbf16>
    %49 = vector.shape_cast %48 : vector<1x18x128xbf16> to vector<18x128xbf16>
    %50 = arith.extf %49 : vector<18x128xbf16> to vector<18x128xf32>
    %cst_46 = arith.constant dense<0.000000e+00> : vector<18x32xf32>
    %51 = tpu.matmul %50, %7, %cst_46 {dimension_numbers = #tpu.dot_dimension_numbers<[1], [0], [0], [1], [0, 0, 1, 1], [], []>} : vector<18x128xf32>, vector<128x32xf32>, vector<18x32xf32> -> vector<18x32xf32>
    %c5_47 = arith.constant 5 : index
    %c0_48 = arith.constant 0 : index
    %c0_49 = arith.constant 0 : index
    %52 = vector.load %arg5[%c5_47, %c0_48, %c0_49] : memref<16x32x64xf32, #tpu.memory_space<vmem>>, vector<1x32x64xf32>
    %53 = vector.shape_cast %52 : vector<1x32x64xf32> to vector<32x64xf32>
    %cst_50 = arith.constant dense<0.000000e+00> : vector<18x64xf32>
    %54 = tpu.matmul %51, %53, %cst_50 {dimension_numbers = #tpu.dot_dimension_numbers<[1], [0], [0], [1], [0, 0, 1, 1], [], []>} : vector<18x32xf32>, vector<32x64xf32>, vector<18x64xf32> -> vector<18x64xf32>
    %55 = arith.addf %47, %54 : vector<18x64xf32>
    %c6 = arith.constant 6 : index
    %c0_51 = arith.constant 0 : index
    %c0_52 = arith.constant 0 : index
    %56 = vector.load %arg1[%c6, %c0_51, %c0_52] : memref<16x18x128xbf16, #tpu.memory_space<vmem>>, vector<1x18x128xbf16>
    %57 = vector.shape_cast %56 : vector<1x18x128xbf16> to vector<18x128xbf16>
    %58 = arith.extf %57 : vector<18x128xbf16> to vector<18x128xf32>
    %cst_53 = arith.constant dense<0.000000e+00> : vector<18x32xf32>
    %59 = tpu.matmul %58, %7, %cst_53 {dimension_numbers = #tpu.dot_dimension_numbers<[1], [0], [0], [1], [0, 0, 1, 1], [], []>} : vector<18x128xf32>, vector<128x32xf32>, vector<18x32xf32> -> vector<18x32xf32>
    %c6_54 = arith.constant 6 : index
    %c0_55 = arith.constant 0 : index
    %c0_56 = arith.constant 0 : index
    %60 = vector.load %arg5[%c6_54, %c0_55, %c0_56] : memref<16x32x64xf32, #tpu.memory_space<vmem>>, vector<1x32x64xf32>
    %61 = vector.shape_cast %60 : vector<1x32x64xf32> to vector<32x64xf32>
    %cst_57 = arith.constant dense<0.000000e+00> : vector<18x64xf32>
    %62 = tpu.matmul %59, %61, %cst_57 {dimension_numbers = #tpu.dot_dimension_numbers<[1], [0], [0], [1], [0, 0, 1, 1], [], []>} : vector<18x32xf32>, vector<32x64xf32>, vector<18x64xf32> -> vector<18x64xf32>
    %63 = arith.addf %55, %62 : vector<18x64xf32>
    %c7 = arith.constant 7 : index
    %c0_58 = arith.constant 0 : index
    %c0_59 = arith.constant 0 : index
    %64 = vector.load %arg1[%c7, %c0_58, %c0_59] : memref<16x18x128xbf16, #tpu.memory_space<vmem>>, vector<1x18x128xbf16>
    %65 = vector.shape_cast %64 : vector<1x18x128xbf16> to vector<18x128xbf16>
    %66 = arith.extf %65 : vector<18x128xbf16> to vector<18x128xf32>
    %cst_60 = arith.constant dense<0.000000e+00> : vector<18x32xf32>
    %67 = tpu.matmul %66, %7, %cst_60 {dimension_numbers = #tpu.dot_dimension_numbers<[1], [0], [0], [1], [0, 0, 1, 1], [], []>} : vector<18x128xf32>, vector<128x32xf32>, vector<18x32xf32> -> vector<18x32xf32>
    %c7_61 = arith.constant 7 : index
    %c0_62 = arith.constant 0 : index
    %c0_63 = arith.constant 0 : index
    %68 = vector.load %arg5[%c7_61, %c0_62, %c0_63] : memref<16x32x64xf32, #tpu.memory_space<vmem>>, vector<1x32x64xf32>
    %69 = vector.shape_cast %68 : vector<1x32x64xf32> to vector<32x64xf32>
    %cst_64 = arith.constant dense<0.000000e+00> : vector<18x64xf32>
    %70 = tpu.matmul %67, %69, %cst_64 {dimension_numbers = #tpu.dot_dimension_numbers<[1], [0], [0], [1], [0, 0, 1, 1], [], []>} : vector<18x32xf32>, vector<32x64xf32>, vector<18x64xf32> -> vector<18x64xf32>
    %71 = arith.addf %63, %70 : vector<18x64xf32>
    %c8 = arith.constant 8 : index
    %c0_65 = arith.constant 0 : index
    %c0_66 = arith.constant 0 : index
    %72 = vector.load %arg1[%c8, %c0_65, %c0_66] : memref<16x18x128xbf16, #tpu.memory_space<vmem>>, vector<1x18x128xbf16>
    %73 = vector.shape_cast %72 : vector<1x18x128xbf16> to vector<18x128xbf16>
    %74 = arith.extf %73 : vector<18x128xbf16> to vector<18x128xf32>
    %cst_67 = arith.constant dense<0.000000e+00> : vector<18x32xf32>
    %75 = tpu.matmul %74, %7, %cst_67 {dimension_numbers = #tpu.dot_dimension_numbers<[1], [0], [0], [1], [0, 0, 1, 1], [], []>} : vector<18x128xf32>, vector<128x32xf32>, vector<18x32xf32> -> vector<18x32xf32>
    %c8_68 = arith.constant 8 : index
    %c0_69 = arith.constant 0 : index
    %c0_70 = arith.constant 0 : index
    %76 = vector.load %arg5[%c8_68, %c0_69, %c0_70] : memref<16x32x64xf32, #tpu.memory_space<vmem>>, vector<1x32x64xf32>
    %77 = vector.shape_cast %76 : vector<1x32x64xf32> to vector<32x64xf32>
    %cst_71 = arith.constant dense<0.000000e+00> : vector<18x64xf32>
    %78 = tpu.matmul %75, %77, %cst_71 {dimension_numbers = #tpu.dot_dimension_numbers<[1], [0], [0], [1], [0, 0, 1, 1], [], []>} : vector<18x32xf32>, vector<32x64xf32>, vector<18x64xf32> -> vector<18x64xf32>
    %79 = arith.addf %71, %78 : vector<18x64xf32>
    %c9 = arith.constant 9 : index
    %c0_72 = arith.constant 0 : index
    %c0_73 = arith.constant 0 : index
    %80 = vector.load %arg1[%c9, %c0_72, %c0_73] : memref<16x18x128xbf16, #tpu.memory_space<vmem>>, vector<1x18x128xbf16>
    %81 = vector.shape_cast %80 : vector<1x18x128xbf16> to vector<18x128xbf16>
    %82 = arith.extf %81 : vector<18x128xbf16> to vector<18x128xf32>
    %cst_74 = arith.constant dense<0.000000e+00> : vector<18x32xf32>
    %83 = tpu.matmul %82, %7, %cst_74 {dimension_numbers = #tpu.dot_dimension_numbers<[1], [0], [0], [1], [0, 0, 1, 1], [], []>} : vector<18x128xf32>, vector<128x32xf32>, vector<18x32xf32> -> vector<18x32xf32>
    %c9_75 = arith.constant 9 : index
    %c0_76 = arith.constant 0 : index
    %c0_77 = arith.constant 0 : index
    %84 = vector.load %arg5[%c9_75, %c0_76, %c0_77] : memref<16x32x64xf32, #tpu.memory_space<vmem>>, vector<1x32x64xf32>
    %85 = vector.shape_cast %84 : vector<1x32x64xf32> to vector<32x64xf32>
    %cst_78 = arith.constant dense<0.000000e+00> : vector<18x64xf32>
    %86 = tpu.matmul %83, %85, %cst_78 {dimension_numbers = #tpu.dot_dimension_numbers<[1], [0], [0], [1], [0, 0, 1, 1], [], []>} : vector<18x32xf32>, vector<32x64xf32>, vector<18x64xf32> -> vector<18x64xf32>
    %87 = arith.addf %79, %86 : vector<18x64xf32>
    %c10 = arith.constant 10 : index
    %c0_79 = arith.constant 0 : index
    %c0_80 = arith.constant 0 : index
    %88 = vector.load %arg1[%c10, %c0_79, %c0_80] : memref<16x18x128xbf16, #tpu.memory_space<vmem>>, vector<1x18x128xbf16>
    %89 = vector.shape_cast %88 : vector<1x18x128xbf16> to vector<18x128xbf16>
    %90 = arith.extf %89 : vector<18x128xbf16> to vector<18x128xf32>
    %cst_81 = arith.constant dense<0.000000e+00> : vector<18x32xf32>
    %91 = tpu.matmul %90, %7, %cst_81 {dimension_numbers = #tpu.dot_dimension_numbers<[1], [0], [0], [1], [0, 0, 1, 1], [], []>} : vector<18x128xf32>, vector<128x32xf32>, vector<18x32xf32> -> vector<18x32xf32>
    %c10_82 = arith.constant 10 : index
    %c0_83 = arith.constant 0 : index
    %c0_84 = arith.constant 0 : index
    %92 = vector.load %arg5[%c10_82, %c0_83, %c0_84] : memref<16x32x64xf32, #tpu.memory_space<vmem>>, vector<1x32x64xf32>
    %93 = vector.shape_cast %92 : vector<1x32x64xf32> to vector<32x64xf32>
    %cst_85 = arith.constant dense<0.000000e+00> : vector<18x64xf32>
    %94 = tpu.matmul %91, %93, %cst_85 {dimension_numbers = #tpu.dot_dimension_numbers<[1], [0], [0], [1], [0, 0, 1, 1], [], []>} : vector<18x32xf32>, vector<32x64xf32>, vector<18x64xf32> -> vector<18x64xf32>
    %95 = arith.addf %87, %94 : vector<18x64xf32>
    %c11 = arith.constant 11 : index
    %c0_86 = arith.constant 0 : index
    %c0_87 = arith.constant 0 : index
    %96 = vector.load %arg1[%c11, %c0_86, %c0_87] : memref<16x18x128xbf16, #tpu.memory_space<vmem>>, vector<1x18x128xbf16>
    %97 = vector.shape_cast %96 : vector<1x18x128xbf16> to vector<18x128xbf16>
    %98 = arith.extf %97 : vector<18x128xbf16> to vector<18x128xf32>
    %cst_88 = arith.constant dense<0.000000e+00> : vector<18x32xf32>
    %99 = tpu.matmul %98, %7, %cst_88 {dimension_numbers = #tpu.dot_dimension_numbers<[1], [0], [0], [1], [0, 0, 1, 1], [], []>} : vector<18x128xf32>, vector<128x32xf32>, vector<18x32xf32> -> vector<18x32xf32>
    %c11_89 = arith.constant 11 : index
    %c0_90 = arith.constant 0 : index
    %c0_91 = arith.constant 0 : index
    %100 = vector.load %arg5[%c11_89, %c0_90, %c0_91] : memref<16x32x64xf32, #tpu.memory_space<vmem>>, vector<1x32x64xf32>
    %101 = vector.shape_cast %100 : vector<1x32x64xf32> to vector<32x64xf32>
    %cst_92 = arith.constant dense<0.000000e+00> : vector<18x64xf32>
    %102 = tpu.matmul %99, %101, %cst_92 {dimension_numbers = #tpu.dot_dimension_numbers<[1], [0], [0], [1], [0, 0, 1, 1], [], []>} : vector<18x32xf32>, vector<32x64xf32>, vector<18x64xf32> -> vector<18x64xf32>
    %103 = arith.addf %95, %102 : vector<18x64xf32>
    %c12 = arith.constant 12 : index
    %c0_93 = arith.constant 0 : index
    %c0_94 = arith.constant 0 : index
    %104 = vector.load %arg1[%c12, %c0_93, %c0_94] : memref<16x18x128xbf16, #tpu.memory_space<vmem>>, vector<1x18x128xbf16>
    %105 = vector.shape_cast %104 : vector<1x18x128xbf16> to vector<18x128xbf16>
    %106 = arith.extf %105 : vector<18x128xbf16> to vector<18x128xf32>
    %cst_95 = arith.constant dense<0.000000e+00> : vector<18x32xf32>
    %107 = tpu.matmul %106, %7, %cst_95 {dimension_numbers = #tpu.dot_dimension_numbers<[1], [0], [0], [1], [0, 0, 1, 1], [], []>} : vector<18x128xf32>, vector<128x32xf32>, vector<18x32xf32> -> vector<18x32xf32>
    %c12_96 = arith.constant 12 : index
    %c0_97 = arith.constant 0 : index
    %c0_98 = arith.constant 0 : index
    %108 = vector.load %arg5[%c12_96, %c0_97, %c0_98] : memref<16x32x64xf32, #tpu.memory_space<vmem>>, vector<1x32x64xf32>
    %109 = vector.shape_cast %108 : vector<1x32x64xf32> to vector<32x64xf32>
    %cst_99 = arith.constant dense<0.000000e+00> : vector<18x64xf32>
    %110 = tpu.matmul %107, %109, %cst_99 {dimension_numbers = #tpu.dot_dimension_numbers<[1], [0], [0], [1], [0, 0, 1, 1], [], []>} : vector<18x32xf32>, vector<32x64xf32>, vector<18x64xf32> -> vector<18x64xf32>
    %111 = arith.addf %103, %110 : vector<18x64xf32>
    %c13 = arith.constant 13 : index
    %c0_100 = arith.constant 0 : index
    %c0_101 = arith.constant 0 : index
    %112 = vector.load %arg1[%c13, %c0_100, %c0_101] : memref<16x18x128xbf16, #tpu.memory_space<vmem>>, vector<1x18x128xbf16>
    %113 = vector.shape_cast %112 : vector<1x18x128xbf16> to vector<18x128xbf16>
    %114 = arith.extf %113 : vector<18x128xbf16> to vector<18x128xf32>
    %cst_102 = arith.constant dense<0.000000e+00> : vector<18x32xf32>
    %115 = tpu.matmul %114, %7, %cst_102 {dimension_numbers = #tpu.dot_dimension_numbers<[1], [0], [0], [1], [0, 0, 1, 1], [], []>} : vector<18x128xf32>, vector<128x32xf32>, vector<18x32xf32> -> vector<18x32xf32>
    %c13_103 = arith.constant 13 : index
    %c0_104 = arith.constant 0 : index
    %c0_105 = arith.constant 0 : index
    %116 = vector.load %arg5[%c13_103, %c0_104, %c0_105] : memref<16x32x64xf32, #tpu.memory_space<vmem>>, vector<1x32x64xf32>
    %117 = vector.shape_cast %116 : vector<1x32x64xf32> to vector<32x64xf32>
    %cst_106 = arith.constant dense<0.000000e+00> : vector<18x64xf32>
    %118 = tpu.matmul %115, %117, %cst_106 {dimension_numbers = #tpu.dot_dimension_numbers<[1], [0], [0], [1], [0, 0, 1, 1], [], []>} : vector<18x32xf32>, vector<32x64xf32>, vector<18x64xf32> -> vector<18x64xf32>
    %119 = arith.addf %111, %118 : vector<18x64xf32>
    %c14 = arith.constant 14 : index
    %c0_107 = arith.constant 0 : index
    %c0_108 = arith.constant 0 : index
    %120 = vector.load %arg1[%c14, %c0_107, %c0_108] : memref<16x18x128xbf16, #tpu.memory_space<vmem>>, vector<1x18x128xbf16>
    %121 = vector.shape_cast %120 : vector<1x18x128xbf16> to vector<18x128xbf16>
    %122 = arith.extf %121 : vector<18x128xbf16> to vector<18x128xf32>
    %cst_109 = arith.constant dense<0.000000e+00> : vector<18x32xf32>
    %123 = tpu.matmul %122, %7, %cst_109 {dimension_numbers = #tpu.dot_dimension_numbers<[1], [0], [0], [1], [0, 0, 1, 1], [], []>} : vector<18x128xf32>, vector<128x32xf32>, vector<18x32xf32> -> vector<18x32xf32>
    %c14_110 = arith.constant 14 : index
    %c0_111 = arith.constant 0 : index
    %c0_112 = arith.constant 0 : index
    %124 = vector.load %arg5[%c14_110, %c0_111, %c0_112] : memref<16x32x64xf32, #tpu.memory_space<vmem>>, vector<1x32x64xf32>
    %125 = vector.shape_cast %124 : vector<1x32x64xf32> to vector<32x64xf32>
    %cst_113 = arith.constant dense<0.000000e+00> : vector<18x64xf32>
    %126 = tpu.matmul %123, %125, %cst_113 {dimension_numbers = #tpu.dot_dimension_numbers<[1], [0], [0], [1], [0, 0, 1, 1], [], []>} : vector<18x32xf32>, vector<32x64xf32>, vector<18x64xf32> -> vector<18x64xf32>
    %127 = arith.addf %119, %126 : vector<18x64xf32>
    %c15 = arith.constant 15 : index
    %c0_114 = arith.constant 0 : index
    %c0_115 = arith.constant 0 : index
    %128 = vector.load %arg1[%c15, %c0_114, %c0_115] : memref<16x18x128xbf16, #tpu.memory_space<vmem>>, vector<1x18x128xbf16>
    %129 = vector.shape_cast %128 : vector<1x18x128xbf16> to vector<18x128xbf16>
    %130 = arith.extf %129 : vector<18x128xbf16> to vector<18x128xf32>
    %cst_116 = arith.constant dense<0.000000e+00> : vector<18x32xf32>
    %131 = tpu.matmul %130, %7, %cst_116 {dimension_numbers = #tpu.dot_dimension_numbers<[1], [0], [0], [1], [0, 0, 1, 1], [], []>} : vector<18x128xf32>, vector<128x32xf32>, vector<18x32xf32> -> vector<18x32xf32>
    %c15_117 = arith.constant 15 : index
    %c0_118 = arith.constant 0 : index
    %c0_119 = arith.constant 0 : index
    %132 = vector.load %arg5[%c15_117, %c0_118, %c0_119] : memref<16x32x64xf32, #tpu.memory_space<vmem>>, vector<1x32x64xf32>
    %133 = vector.shape_cast %132 : vector<1x32x64xf32> to vector<32x64xf32>
    %cst_120 = arith.constant dense<0.000000e+00> : vector<18x64xf32>
    %134 = tpu.matmul %131, %133, %cst_120 {dimension_numbers = #tpu.dot_dimension_numbers<[1], [0], [0], [1], [0, 0, 1, 1], [], []>} : vector<18x32xf32>, vector<32x64xf32>, vector<18x64xf32> -> vector<18x64xf32>
    %135 = arith.addf %127, %134 : vector<18x64xf32>
    %136 = vector.broadcast %8 : vector<1x64xf32> to vector<18x64xf32>
    %137 = arith.addf %135, %136 : vector<18x64xf32>
    %cst_121 = arith.constant 0.000000e+00 : f32
    %138 = vector.broadcast %cst_121 : f32 to vector<18x64xf32>
    %139 = arith.maximumf %137, %138 : vector<18x64xf32>
    %c2_122 = arith.constant 2 : index
    %c0_123 = arith.constant 0 : index
    %140 = vector.load %arg14[%c2_122, %c0_123] : memref<17x128xf32, #tpu.memory_space<vmem>>, vector<1x64xf32>
    %c0_124 = arith.constant 0 : index
    %c0_125 = arith.constant 0 : index
    %c0_126 = arith.constant 0 : index
    %141 = vector.load %arg2[%c0_124, %c0_125, %c0_126] : memref<9x2x18xbf16, #tpu.memory_space<vmem>>, vector<1x2x18xbf16>
    %142 = vector.shape_cast %141 : vector<1x2x18xbf16> to vector<2x18xbf16>
    %143 = arith.extf %142 : vector<2x18xbf16> to vector<2x18xf32>
    %cst_127 = arith.constant dense<0.000000e+00> : vector<2x64xf32>
    %144 = tpu.matmul %143, %139, %cst_127 {dimension_numbers = #tpu.dot_dimension_numbers<[1], [0], [0], [1], [0, 0, 1, 1], [], []>} : vector<2x18xf32>, vector<18x64xf32>, vector<2x64xf32> -> vector<2x64xf32>
    %c0_128 = arith.constant 0 : index
    %c0_129 = arith.constant 0 : index
    %c0_130 = arith.constant 0 : index
    %145 = vector.load %arg6[%c0_128, %c0_129, %c0_130] : memref<9x64x64xf32, #tpu.memory_space<vmem>>, vector<1x64x64xf32>
    %146 = vector.shape_cast %145 : vector<1x64x64xf32> to vector<64x64xf32>
    %cst_131 = arith.constant dense<0.000000e+00> : vector<2x64xf32>
    %147 = tpu.matmul %144, %146, %cst_131 {dimension_numbers = #tpu.dot_dimension_numbers<[1], [0], [0], [1], [0, 0, 1, 1], [], []>} : vector<2x64xf32>, vector<64x64xf32>, vector<2x64xf32> -> vector<2x64xf32>
    %c1_132 = arith.constant 1 : index
    %c0_133 = arith.constant 0 : index
    %c0_134 = arith.constant 0 : index
    %148 = vector.load %arg2[%c1_132, %c0_133, %c0_134] : memref<9x2x18xbf16, #tpu.memory_space<vmem>>, vector<1x2x18xbf16>
    %149 = vector.shape_cast %148 : vector<1x2x18xbf16> to vector<2x18xbf16>
    %150 = arith.extf %149 : vector<2x18xbf16> to vector<2x18xf32>
    %cst_135 = arith.constant dense<0.000000e+00> : vector<2x64xf32>
    %151 = tpu.matmul %150, %139, %cst_135 {dimension_numbers = #tpu.dot_dimension_numbers<[1], [0], [0], [1], [0, 0, 1, 1], [], []>} : vector<2x18xf32>, vector<18x64xf32>, vector<2x64xf32> -> vector<2x64xf32>
    %c1_136 = arith.constant 1 : index
    %c0_137 = arith.constant 0 : index
    %c0_138 = arith.constant 0 : index
    %152 = vector.load %arg6[%c1_136, %c0_137, %c0_138] : memref<9x64x64xf32, #tpu.memory_space<vmem>>, vector<1x64x64xf32>
    %153 = vector.shape_cast %152 : vector<1x64x64xf32> to vector<64x64xf32>
    %cst_139 = arith.constant dense<0.000000e+00> : vector<2x64xf32>
    %154 = tpu.matmul %151, %153, %cst_139 {dimension_numbers = #tpu.dot_dimension_numbers<[1], [0], [0], [1], [0, 0, 1, 1], [], []>} : vector<2x64xf32>, vector<64x64xf32>, vector<2x64xf32> -> vector<2x64xf32>
    %155 = arith.addf %147, %154 : vector<2x64xf32>
    %c2_140 = arith.constant 2 : index
    %c0_141 = arith.constant 0 : index
    %c0_142 = arith.constant 0 : index
    %156 = vector.load %arg2[%c2_140, %c0_141, %c0_142] : memref<9x2x18xbf16, #tpu.memory_space<vmem>>, vector<1x2x18xbf16>
    %157 = vector.shape_cast %156 : vector<1x2x18xbf16> to vector<2x18xbf16>
    %158 = arith.extf %157 : vector<2x18xbf16> to vector<2x18xf32>
    %cst_143 = arith.constant dense<0.000000e+00> : vector<2x64xf32>
    %159 = tpu.matmul %158, %139, %cst_143 {dimension_numbers = #tpu.dot_dimension_numbers<[1], [0], [0], [1], [0, 0, 1, 1], [], []>} : vector<2x18xf32>, vector<18x64xf32>, vector<2x64xf32> -> vector<2x64xf32>
    %c2_144 = arith.constant 2 : index
    %c0_145 = arith.constant 0 : index
    %c0_146 = arith.constant 0 : index
    %160 = vector.load %arg6[%c2_144, %c0_145, %c0_146] : memref<9x64x64xf32, #tpu.memory_space<vmem>>, vector<1x64x64xf32>
    %161 = vector.shape_cast %160 : vector<1x64x64xf32> to vector<64x64xf32>
    %cst_147 = arith.constant dense<0.000000e+00> : vector<2x64xf32>
    %162 = tpu.matmul %159, %161, %cst_147 {dimension_numbers = #tpu.dot_dimension_numbers<[1], [0], [0], [1], [0, 0, 1, 1], [], []>} : vector<2x64xf32>, vector<64x64xf32>, vector<2x64xf32> -> vector<2x64xf32>
    %163 = arith.addf %155, %162 : vector<2x64xf32>
    %c3_148 = arith.constant 3 : index
    %c0_149 = arith.constant 0 : index
    %c0_150 = arith.constant 0 : index
    %164 = vector.load %arg2[%c3_148, %c0_149, %c0_150] : memref<9x2x18xbf16, #tpu.memory_space<vmem>>, vector<1x2x18xbf16>
    %165 = vector.shape_cast %164 : vector<1x2x18xbf16> to vector<2x18xbf16>
    %166 = arith.extf %165 : vector<2x18xbf16> to vector<2x18xf32>
    %cst_151 = arith.constant dense<0.000000e+00> : vector<2x64xf32>
    %167 = tpu.matmul %166, %139, %cst_151 {dimension_numbers = #tpu.dot_dimension_numbers<[1], [0], [0], [1], [0, 0, 1, 1], [], []>} : vector<2x18xf32>, vector<18x64xf32>, vector<2x64xf32> -> vector<2x64xf32>
    %c3_152 = arith.constant 3 : index
    %c0_153 = arith.constant 0 : index
    %c0_154 = arith.constant 0 : index
    %168 = vector.load %arg6[%c3_152, %c0_153, %c0_154] : memref<9x64x64xf32, #tpu.memory_space<vmem>>, vector<1x64x64xf32>
    %169 = vector.shape_cast %168 : vector<1x64x64xf32> to vector<64x64xf32>
    %cst_155 = arith.constant dense<0.000000e+00> : vector<2x64xf32>
    %170 = tpu.matmul %167, %169, %cst_155 {dimension_numbers = #tpu.dot_dimension_numbers<[1], [0], [0], [1], [0, 0, 1, 1], [], []>} : vector<2x64xf32>, vector<64x64xf32>, vector<2x64xf32> -> vector<2x64xf32>
    %171 = arith.addf %163, %170 : vector<2x64xf32>
    %c4_156 = arith.constant 4 : index
    %c0_157 = arith.constant 0 : index
    %c0_158 = arith.constant 0 : index
    %172 = vector.load %arg2[%c4_156, %c0_157, %c0_158] : memref<9x2x18xbf16, #tpu.memory_space<vmem>>, vector<1x2x18xbf16>
    %173 = vector.shape_cast %172 : vector<1x2x18xbf16> to vector<2x18xbf16>
    %174 = arith.extf %173 : vector<2x18xbf16> to vector<2x18xf32>
    %cst_159 = arith.constant dense<0.000000e+00> : vector<2x64xf32>
    %175 = tpu.matmul %174, %139, %cst_159 {dimension_numbers = #tpu.dot_dimension_numbers<[1], [0], [0], [1], [0, 0, 1, 1], [], []>} : vector<2x18xf32>, vector<18x64xf32>, vector<2x64xf32> -> vector<2x64xf32>
    %c4_160 = arith.constant 4 : index
    %c0_161 = arith.constant 0 : index
    %c0_162 = arith.constant 0 : index
    %176 = vector.load %arg6[%c4_160, %c0_161, %c0_162] : memref<9x64x64xf32, #tpu.memory_space<vmem>>, vector<1x64x64xf32>
    %177 = vector.shape_cast %176 : vector<1x64x64xf32> to vector<64x64xf32>
    %cst_163 = arith.constant dense<0.000000e+00> : vector<2x64xf32>
    %178 = tpu.matmul %175, %177, %cst_163 {dimension_numbers = #tpu.dot_dimension_numbers<[1], [0], [0], [1], [0, 0, 1, 1], [], []>} : vector<2x64xf32>, vector<64x64xf32>, vector<2x64xf32> -> vector<2x64xf32>
    %179 = arith.addf %171, %178 : vector<2x64xf32>
    %c5_164 = arith.constant 5 : index
    %c0_165 = arith.constant 0 : index
    %c0_166 = arith.constant 0 : index
    %180 = vector.load %arg2[%c5_164, %c0_165, %c0_166] : memref<9x2x18xbf16, #tpu.memory_space<vmem>>, vector<1x2x18xbf16>
    %181 = vector.shape_cast %180 : vector<1x2x18xbf16> to vector<2x18xbf16>
    %182 = arith.extf %181 : vector<2x18xbf16> to vector<2x18xf32>
    %cst_167 = arith.constant dense<0.000000e+00> : vector<2x64xf32>
    %183 = tpu.matmul %182, %139, %cst_167 {dimension_numbers = #tpu.dot_dimension_numbers<[1], [0], [0], [1], [0, 0, 1, 1], [], []>} : vector<2x18xf32>, vector<18x64xf32>, vector<2x64xf32> -> vector<2x64xf32>
    %c5_168 = arith.constant 5 : index
    %c0_169 = arith.constant 0 : index
    %c0_170 = arith.constant 0 : index
    %184 = vector.load %arg6[%c5_168, %c0_169, %c0_170] : memref<9x64x64xf32, #tpu.memory_space<vmem>>, vector<1x64x64xf32>
    %185 = vector.shape_cast %184 : vector<1x64x64xf32> to vector<64x64xf32>
    %cst_171 = arith.constant dense<0.000000e+00> : vector<2x64xf32>
    %186 = tpu.matmul %183, %185, %cst_171 {dimension_numbers = #tpu.dot_dimension_numbers<[1], [0], [0], [1], [0, 0, 1, 1], [], []>} : vector<2x64xf32>, vector<64x64xf32>, vector<2x64xf32> -> vector<2x64xf32>
    %187 = arith.addf %179, %186 : vector<2x64xf32>
    %c6_172 = arith.constant 6 : index
    %c0_173 = arith.constant 0 : index
    %c0_174 = arith.constant 0 : index
    %188 = vector.load %arg2[%c6_172, %c0_173, %c0_174] : memref<9x2x18xbf16, #tpu.memory_space<vmem>>, vector<1x2x18xbf16>
    %189 = vector.shape_cast %188 : vector<1x2x18xbf16> to vector<2x18xbf16>
    %190 = arith.extf %189 : vector<2x18xbf16> to vector<2x18xf32>
    %cst_175 = arith.constant dense<0.000000e+00> : vector<2x64xf32>
    %191 = tpu.matmul %190, %139, %cst_175 {dimension_numbers = #tpu.dot_dimension_numbers<[1], [0], [0], [1], [0, 0, 1, 1], [], []>} : vector<2x18xf32>, vector<18x64xf32>, vector<2x64xf32> -> vector<2x64xf32>
    %c6_176 = arith.constant 6 : index
    %c0_177 = arith.constant 0 : index
    %c0_178 = arith.constant 0 : index
    %192 = vector.load %arg6[%c6_176, %c0_177, %c0_178] : memref<9x64x64xf32, #tpu.memory_space<vmem>>, vector<1x64x64xf32>
    %193 = vector.shape_cast %192 : vector<1x64x64xf32> to vector<64x64xf32>
    %cst_179 = arith.constant dense<0.000000e+00> : vector<2x64xf32>
    %194 = tpu.matmul %191, %193, %cst_179 {dimension_numbers = #tpu.dot_dimension_numbers<[1], [0], [0], [1], [0, 0, 1, 1], [], []>} : vector<2x64xf32>, vector<64x64xf32>, vector<2x64xf32> -> vector<2x64xf32>
    %195 = arith.addf %187, %194 : vector<2x64xf32>
    %c7_180 = arith.constant 7 : index
    %c0_181 = arith.constant 0 : index
    %c0_182 = arith.constant 0 : index
    %196 = vector.load %arg2[%c7_180, %c0_181, %c0_182] : memref<9x2x18xbf16, #tpu.memory_space<vmem>>, vector<1x2x18xbf16>
    %197 = vector.shape_cast %196 : vector<1x2x18xbf16> to vector<2x18xbf16>
    %198 = arith.extf %197 : vector<2x18xbf16> to vector<2x18xf32>
    %cst_183 = arith.constant dense<0.000000e+00> : vector<2x64xf32>
    %199 = tpu.matmul %198, %139, %cst_183 {dimension_numbers = #tpu.dot_dimension_numbers<[1], [0], [0], [1], [0, 0, 1, 1], [], []>} : vector<2x18xf32>, vector<18x64xf32>, vector<2x64xf32> -> vector<2x64xf32>
    %c7_184 = arith.constant 7 : index
    %c0_185 = arith.constant 0 : index
    %c0_186 = arith.constant 0 : index
    %200 = vector.load %arg6[%c7_184, %c0_185, %c0_186] : memref<9x64x64xf32, #tpu.memory_space<vmem>>, vector<1x64x64xf32>
    %201 = vector.shape_cast %200 : vector<1x64x64xf32> to vector<64x64xf32>
    %cst_187 = arith.constant dense<0.000000e+00> : vector<2x64xf32>
    %202 = tpu.matmul %199, %201, %cst_187 {dimension_numbers = #tpu.dot_dimension_numbers<[1], [0], [0], [1], [0, 0, 1, 1], [], []>} : vector<2x64xf32>, vector<64x64xf32>, vector<2x64xf32> -> vector<2x64xf32>
    %203 = arith.addf %195, %202 : vector<2x64xf32>
    %c8_188 = arith.constant 8 : index
    %c0_189 = arith.constant 0 : index
    %c0_190 = arith.constant 0 : index
    %204 = vector.load %arg2[%c8_188, %c0_189, %c0_190] : memref<9x2x18xbf16, #tpu.memory_space<vmem>>, vector<1x2x18xbf16>
    %205 = vector.shape_cast %204 : vector<1x2x18xbf16> to vector<2x18xbf16>
    %206 = arith.extf %205 : vector<2x18xbf16> to vector<2x18xf32>
    %cst_191 = arith.constant dense<0.000000e+00> : vector<2x64xf32>
    %207 = tpu.matmul %206, %139, %cst_191 {dimension_numbers = #tpu.dot_dimension_numbers<[1], [0], [0], [1], [0, 0, 1, 1], [], []>} : vector<2x18xf32>, vector<18x64xf32>, vector<2x64xf32> -> vector<2x64xf32>
    %c8_192 = arith.constant 8 : index
    %c0_193 = arith.constant 0 : index
    %c0_194 = arith.constant 0 : index
    %208 = vector.load %arg6[%c8_192, %c0_193, %c0_194] : memref<9x64x64xf32, #tpu.memory_space<vmem>>, vector<1x64x64xf32>
    %209 = vector.shape_cast %208 : vector<1x64x64xf32> to vector<64x64xf32>
    %cst_195 = arith.constant dense<0.000000e+00> : vector<2x64xf32>
    %210 = tpu.matmul %207, %209, %cst_195 {dimension_numbers = #tpu.dot_dimension_numbers<[1], [0], [0], [1], [0, 0, 1, 1], [], []>} : vector<2x64xf32>, vector<64x64xf32>, vector<2x64xf32> -> vector<2x64xf32>
    %211 = arith.addf %203, %210 : vector<2x64xf32>
    %212 = vector.broadcast %140 : vector<1x64xf32> to vector<2x64xf32>
    %213 = arith.addf %211, %212 : vector<2x64xf32>
    %cst_196 = arith.constant 0.000000e+00 : f32
    %214 = vector.broadcast %cst_196 : f32 to vector<2x64xf32>
    %215 = arith.maximumf %213, %214 : vector<2x64xf32>
    %c0_197 = arith.constant 0 : index
    %c0_198 = arith.constant 0 : index
    %216 = vector.load %arg7[%c0_197, %c0_198] : memref<64x32xf32, #tpu.memory_space<vmem>>, vector<64x32xf32>
    %cst_199 = arith.constant dense<0.000000e+00> : vector<2x32xf32>
    %217 = tpu.matmul %215, %216, %cst_199 {dimension_numbers = #tpu.dot_dimension_numbers<[1], [0], [0], [1], [0, 0, 1, 1], [], []>} : vector<2x64xf32>, vector<64x32xf32>, vector<2x32xf32> -> vector<2x32xf32>
    %c3_200 = arith.constant 3 : index
    %c0_201 = arith.constant 0 : index
    %218 = vector.load %arg14[%c3_200, %c0_201] : memref<17x128xf32, #tpu.memory_space<vmem>>, vector<1x32xf32>
    %219 = vector.broadcast %218 : vector<1x32xf32> to vector<2x32xf32>
    %220 = arith.addf %217, %219 : vector<2x32xf32>
    %c4_202 = arith.constant 4 : index
    %c0_203 = arith.constant 0 : index
    %221 = vector.load %arg14[%c4_202, %c0_203] : memref<17x128xf32, #tpu.memory_space<vmem>>, vector<1x32xf32>
    %c5_204 = arith.constant 5 : index
    %c0_205 = arith.constant 0 : index
    %222 = vector.load %arg14[%c5_204, %c0_205] : memref<17x128xf32, #tpu.memory_space<vmem>>, vector<1x32xf32>
    %cst_206 = arith.constant dense<0.000000e+00> : vector<2xf32>
    %223 = vector.multi_reduction <add>, %220, %cst_206 [1] : vector<2x32xf32> to vector<2xf32>
    %224 = vector.shape_cast %223 : vector<2xf32> to vector<2x1xf32>
    %cst_207 = arith.constant 3.200000e+01 : f32
    %225 = vector.broadcast %cst_207 : f32 to vector<2x1xf32>
    %226 = arith.divf %224, %225 : vector<2x1xf32>
    %227 = vector.broadcast %226 : vector<2x1xf32> to vector<2x32xf32>
    %228 = arith.subf %220, %227 : vector<2x32xf32>
    %229 = arith.mulf %228, %228 : vector<2x32xf32>
    %cst_208 = arith.constant dense<0.000000e+00> : vector<2xf32>
    %230 = vector.multi_reduction <add>, %229, %cst_208 [1] : vector<2x32xf32> to vector<2xf32>
    %231 = vector.shape_cast %230 : vector<2xf32> to vector<2x1xf32>
    %cst_209 = arith.constant 3.200000e+01 : f32
    %232 = vector.broadcast %cst_209 : f32 to vector<2x1xf32>
    %233 = arith.divf %231, %232 : vector<2x1xf32>
    %cst_210 = arith.constant 9.99999974E-6 : f32
    %234 = vector.broadcast %cst_210 : f32 to vector<2x1xf32>
    %235 = arith.addf %233, %234 : vector<2x1xf32>
    %236 = math.rsqrt %235 : vector<2x1xf32>
    %237 = vector.broadcast %236 : vector<2x1xf32> to vector<2x32xf32>
    %238 = arith.mulf %228, %237 : vector<2x32xf32>
    %239 = vector.broadcast %221 : vector<1x32xf32> to vector<2x32xf32>
    %240 = arith.mulf %238, %239 : vector<2x32xf32>
    %241 = vector.broadcast %222 : vector<1x32xf32> to vector<2x32xf32>
    %242 = arith.addf %240, %241 : vector<2x32xf32>
    %cst_211 = arith.constant 0.000000e+00 : f32
    %243 = vector.broadcast %cst_211 : f32 to vector<2x32xf32>
    %244 = arith.cmpf ogt, %242, %243 : vector<2x32xf32>
    %cst_212 = arith.constant 0.00999999977 : f32
    %245 = vector.broadcast %cst_212 : f32 to vector<2x32xf32>
    %246 = arith.mulf %245, %242 : vector<2x32xf32>
    %247 = arith.select %244, %242, %246 : vector<2x32xi1>, vector<2x32xf32>
    %c0_213 = arith.constant 0 : index
    %c0_214 = arith.constant 0 : index
    %248 = vector.load %arg8[%c0_213, %c0_214] : memref<32x32xf32, #tpu.memory_space<vmem>>, vector<32x32xf32>
    %cst_215 = arith.constant dense<0.000000e+00> : vector<2x32xf32>
    %249 = tpu.matmul %247, %248, %cst_215 {dimension_numbers = #tpu.dot_dimension_numbers<[1], [0], [0], [1], [0, 0, 1, 1], [], []>} : vector<2x32xf32>, vector<32x32xf32>, vector<2x32xf32> -> vector<2x32xf32>
    %c6_216 = arith.constant 6 : index
    %c0_217 = arith.constant 0 : index
    %250 = vector.load %arg14[%c6_216, %c0_217] : memref<17x128xf32, #tpu.memory_space<vmem>>, vector<1x32xf32>
    %251 = vector.broadcast %250 : vector<1x32xf32> to vector<2x32xf32>
    %252 = arith.addf %249, %251 : vector<2x32xf32>
    %c7_218 = arith.constant 7 : index
    %c0_219 = arith.constant 0 : index
    %253 = vector.load %arg14[%c7_218, %c0_219] : memref<17x128xf32, #tpu.memory_space<vmem>>, vector<1x32xf32>
    %c8_220 = arith.constant 8 : index
    %c0_221 = arith.constant 0 : index
    %254 = vector.load %arg14[%c8_220, %c0_221] : memref<17x128xf32, #tpu.memory_space<vmem>>, vector<1x32xf32>
    %cst_222 = arith.constant dense<0.000000e+00> : vector<2xf32>
    %255 = vector.multi_reduction <add>, %252, %cst_222 [1] : vector<2x32xf32> to vector<2xf32>
    %256 = vector.shape_cast %255 : vector<2xf32> to vector<2x1xf32>
    %cst_223 = arith.constant 3.200000e+01 : f32
    %257 = vector.broadcast %cst_223 : f32 to vector<2x1xf32>
    %258 = arith.divf %256, %257 : vector<2x1xf32>
    %259 = vector.broadcast %258 : vector<2x1xf32> to vector<2x32xf32>
    %260 = arith.subf %252, %259 : vector<2x32xf32>
    %261 = arith.mulf %260, %260 : vector<2x32xf32>
    %cst_224 = arith.constant dense<0.000000e+00> : vector<2xf32>
    %262 = vector.multi_reduction <add>, %261, %cst_224 [1] : vector<2x32xf32> to vector<2xf32>
    %263 = vector.shape_cast %262 : vector<2xf32> to vector<2x1xf32>
    %cst_225 = arith.constant 3.200000e+01 : f32
    %264 = vector.broadcast %cst_225 : f32 to vector<2x1xf32>
    %265 = arith.divf %263, %264 : vector<2x1xf32>
    %cst_226 = arith.constant 9.99999974E-6 : f32
    %266 = vector.broadcast %cst_226 : f32 to vector<2x1xf32>
    %267 = arith.addf %265, %266 : vector<2x1xf32>
    %268 = math.rsqrt %267 : vector<2x1xf32>
    %269 = vector.broadcast %268 : vector<2x1xf32> to vector<2x32xf32>
    %270 = arith.mulf %260, %269 : vector<2x32xf32>
    %271 = vector.broadcast %253 : vector<1x32xf32> to vector<2x32xf32>
    %272 = arith.mulf %270, %271 : vector<2x32xf32>
    %273 = vector.broadcast %254 : vector<1x32xf32> to vector<2x32xf32>
    %274 = arith.addf %272, %273 : vector<2x32xf32>
    %cst_227 = arith.constant 0.000000e+00 : f32
    %275 = vector.broadcast %cst_227 : f32 to vector<2x32xf32>
    %276 = arith.cmpf ogt, %274, %275 : vector<2x32xf32>
    %cst_228 = arith.constant 0.00999999977 : f32
    %277 = vector.broadcast %cst_228 : f32 to vector<2x32xf32>
    %278 = arith.mulf %277, %274 : vector<2x32xf32>
    %279 = arith.select %276, %274, %278 : vector<2x32xi1>, vector<2x32xf32>
    %c0_229 = arith.constant 0 : index
    %c0_230 = arith.constant 0 : index
    %280 = vector.load %arg9[%c0_229, %c0_230] : memref<32x128xf32, #tpu.memory_space<vmem>>, vector<32x128xf32>
    %cst_231 = arith.constant dense<0.000000e+00> : vector<2x128xf32>
    %281 = tpu.matmul %279, %280, %cst_231 {dimension_numbers = #tpu.dot_dimension_numbers<[1], [0], [0], [1], [0, 0, 1, 1], [], []>} : vector<2x32xf32>, vector<32x128xf32>, vector<2x128xf32> -> vector<2x128xf32>
    %c9_232 = arith.constant 9 : index
    %c0_233 = arith.constant 0 : index
    %282 = vector.load %arg14[%c9_232, %c0_233] : memref<17x128xf32, #tpu.memory_space<vmem>>, vector<1x128xf32>
    %283 = vector.broadcast %282 : vector<1x128xf32> to vector<2x128xf32>
    %284 = arith.addf %281, %283 : vector<2x128xf32>
    %c0_234 = arith.constant 0 : index
    %c0_235 = arith.constant 0 : index
    %285 = vector.load %arg10[%c0_234, %c0_235] : memref<64x32xf32, #tpu.memory_space<vmem>>, vector<64x32xf32>
    %cst_236 = arith.constant dense<0.000000e+00> : vector<2x32xf32>
    %286 = tpu.matmul %215, %285, %cst_236 {dimension_numbers = #tpu.dot_dimension_numbers<[1], [0], [0], [1], [0, 0, 1, 1], [], []>} : vector<2x64xf32>, vector<64x32xf32>, vector<2x32xf32> -> vector<2x32xf32>
    %c0_237 = arith.constant 0 : index
    %c0_238 = arith.constant 0 : index
    %287 = vector.load %arg11[%c0_237, %c0_238] : memref<128x32xf32, #tpu.memory_space<vmem>>, vector<128x32xf32>
    %cst_239 = arith.constant dense<0.000000e+00> : vector<2x32xf32>
    %288 = tpu.matmul %284, %287, %cst_239 {dimension_numbers = #tpu.dot_dimension_numbers<[1], [0], [0], [1], [0, 0, 1, 1], [], []>} : vector<2x128xf32>, vector<128x32xf32>, vector<2x32xf32> -> vector<2x32xf32>
    %289 = arith.addf %286, %288 : vector<2x32xf32>
    %c10_240 = arith.constant 10 : index
    %c0_241 = arith.constant 0 : index
    %290 = vector.load %arg14[%c10_240, %c0_241] : memref<17x128xf32, #tpu.memory_space<vmem>>, vector<1x32xf32>
    %291 = vector.broadcast %290 : vector<1x32xf32> to vector<2x32xf32>
    %292 = arith.addf %289, %291 : vector<2x32xf32>
    %c11_242 = arith.constant 11 : index
    %c0_243 = arith.constant 0 : index
    %293 = vector.load %arg14[%c11_242, %c0_243] : memref<17x128xf32, #tpu.memory_space<vmem>>, vector<1x32xf32>
    %c12_244 = arith.constant 12 : index
    %c0_245 = arith.constant 0 : index
    %294 = vector.load %arg14[%c12_244, %c0_245] : memref<17x128xf32, #tpu.memory_space<vmem>>, vector<1x32xf32>
    %cst_246 = arith.constant dense<0.000000e+00> : vector<2xf32>
    %295 = vector.multi_reduction <add>, %292, %cst_246 [1] : vector<2x32xf32> to vector<2xf32>
    %296 = vector.shape_cast %295 : vector<2xf32> to vector<2x1xf32>
    %cst_247 = arith.constant 3.200000e+01 : f32
    %297 = vector.broadcast %cst_247 : f32 to vector<2x1xf32>
    %298 = arith.divf %296, %297 : vector<2x1xf32>
    %299 = vector.broadcast %298 : vector<2x1xf32> to vector<2x32xf32>
    %300 = arith.subf %292, %299 : vector<2x32xf32>
    %301 = arith.mulf %300, %300 : vector<2x32xf32>
    %cst_248 = arith.constant dense<0.000000e+00> : vector<2xf32>
    %302 = vector.multi_reduction <add>, %301, %cst_248 [1] : vector<2x32xf32> to vector<2xf32>
    %303 = vector.shape_cast %302 : vector<2xf32> to vector<2x1xf32>
    %cst_249 = arith.constant 3.200000e+01 : f32
    %304 = vector.broadcast %cst_249 : f32 to vector<2x1xf32>
    %305 = arith.divf %303, %304 : vector<2x1xf32>
    %cst_250 = arith.constant 9.99999974E-6 : f32
    %306 = vector.broadcast %cst_250 : f32 to vector<2x1xf32>
    %307 = arith.addf %305, %306 : vector<2x1xf32>
    %308 = math.rsqrt %307 : vector<2x1xf32>
    %309 = vector.broadcast %308 : vector<2x1xf32> to vector<2x32xf32>
    %310 = arith.mulf %300, %309 : vector<2x32xf32>
    %311 = vector.broadcast %293 : vector<1x32xf32> to vector<2x32xf32>
    %312 = arith.mulf %310, %311 : vector<2x32xf32>
    %313 = vector.broadcast %294 : vector<1x32xf32> to vector<2x32xf32>
    %314 = arith.addf %312, %313 : vector<2x32xf32>
    %cst_251 = arith.constant 0.000000e+00 : f32
    %315 = vector.broadcast %cst_251 : f32 to vector<2x32xf32>
    %316 = arith.cmpf ogt, %314, %315 : vector<2x32xf32>
    %cst_252 = arith.constant 0.00999999977 : f32
    %317 = vector.broadcast %cst_252 : f32 to vector<2x32xf32>
    %318 = arith.mulf %317, %314 : vector<2x32xf32>
    %319 = arith.select %316, %314, %318 : vector<2x32xi1>, vector<2x32xf32>
    %c0_253 = arith.constant 0 : index
    %c0_254 = arith.constant 0 : index
    %320 = vector.load %arg12[%c0_253, %c0_254] : memref<32x32xf32, #tpu.memory_space<vmem>>, vector<32x32xf32>
    %cst_255 = arith.constant dense<0.000000e+00> : vector<2x32xf32>
    %321 = tpu.matmul %319, %320, %cst_255 {dimension_numbers = #tpu.dot_dimension_numbers<[1], [0], [0], [1], [0, 0, 1, 1], [], []>} : vector<2x32xf32>, vector<32x32xf32>, vector<2x32xf32> -> vector<2x32xf32>
    %c13_256 = arith.constant 13 : index
    %c0_257 = arith.constant 0 : index
    %322 = vector.load %arg14[%c13_256, %c0_257] : memref<17x128xf32, #tpu.memory_space<vmem>>, vector<1x32xf32>
    %323 = vector.broadcast %322 : vector<1x32xf32> to vector<2x32xf32>
    %324 = arith.addf %321, %323 : vector<2x32xf32>
    %c14_258 = arith.constant 14 : index
    %c0_259 = arith.constant 0 : index
    %325 = vector.load %arg14[%c14_258, %c0_259] : memref<17x128xf32, #tpu.memory_space<vmem>>, vector<1x32xf32>
    %c15_260 = arith.constant 15 : index
    %c0_261 = arith.constant 0 : index
    %326 = vector.load %arg14[%c15_260, %c0_261] : memref<17x128xf32, #tpu.memory_space<vmem>>, vector<1x32xf32>
    %cst_262 = arith.constant dense<0.000000e+00> : vector<2xf32>
    %327 = vector.multi_reduction <add>, %324, %cst_262 [1] : vector<2x32xf32> to vector<2xf32>
    %328 = vector.shape_cast %327 : vector<2xf32> to vector<2x1xf32>
    %cst_263 = arith.constant 3.200000e+01 : f32
    %329 = vector.broadcast %cst_263 : f32 to vector<2x1xf32>
    %330 = arith.divf %328, %329 : vector<2x1xf32>
    %331 = vector.broadcast %330 : vector<2x1xf32> to vector<2x32xf32>
    %332 = arith.subf %324, %331 : vector<2x32xf32>
    %333 = arith.mulf %332, %332 : vector<2x32xf32>
    %cst_264 = arith.constant dense<0.000000e+00> : vector<2xf32>
    %334 = vector.multi_reduction <add>, %333, %cst_264 [1] : vector<2x32xf32> to vector<2xf32>
    %335 = vector.shape_cast %334 : vector<2xf32> to vector<2x1xf32>
    %cst_265 = arith.constant 3.200000e+01 : f32
    %336 = vector.broadcast %cst_265 : f32 to vector<2x1xf32>
    %337 = arith.divf %335, %336 : vector<2x1xf32>
    %cst_266 = arith.constant 9.99999974E-6 : f32
    %338 = vector.broadcast %cst_266 : f32 to vector<2x1xf32>
    %339 = arith.addf %337, %338 : vector<2x1xf32>
    %340 = math.rsqrt %339 : vector<2x1xf32>
    %341 = vector.broadcast %340 : vector<2x1xf32> to vector<2x32xf32>
    %342 = arith.mulf %332, %341 : vector<2x32xf32>
    %343 = vector.broadcast %325 : vector<1x32xf32> to vector<2x32xf32>
    %344 = arith.mulf %342, %343 : vector<2x32xf32>
    %345 = vector.broadcast %326 : vector<1x32xf32> to vector<2x32xf32>
    %346 = arith.addf %344, %345 : vector<2x32xf32>
    %cst_267 = arith.constant 0.000000e+00 : f32
    %347 = vector.broadcast %cst_267 : f32 to vector<2x32xf32>
    %348 = arith.cmpf ogt, %346, %347 : vector<2x32xf32>
    %cst_268 = arith.constant 0.00999999977 : f32
    %349 = vector.broadcast %cst_268 : f32 to vector<2x32xf32>
    %350 = arith.mulf %349, %346 : vector<2x32xf32>
    %351 = arith.select %348, %346, %350 : vector<2x32xi1>, vector<2x32xf32>
    %c0_269 = arith.constant 0 : index
    %c0_270 = arith.constant 0 : index
    %352 = vector.load %arg13[%c0_269, %c0_270] : memref<32x128xf32, #tpu.memory_space<vmem>>, vector<32x128xf32>
    %cst_271 = arith.constant dense<0.000000e+00> : vector<2x128xf32>
    %353 = tpu.matmul %351, %352, %cst_271 {dimension_numbers = #tpu.dot_dimension_numbers<[1], [0], [0], [1], [0, 0, 1, 1], [], []>} : vector<2x32xf32>, vector<32x128xf32>, vector<2x128xf32> -> vector<2x128xf32>
    %c16 = arith.constant 16 : index
    %c0_272 = arith.constant 0 : index
    %354 = vector.load %arg14[%c16, %c0_272] : memref<17x128xf32, #tpu.memory_space<vmem>>, vector<1x128xf32>
    %355 = vector.broadcast %354 : vector<1x128xf32> to vector<2x128xf32>
    %356 = arith.addf %353, %355 : vector<2x128xf32>
    %cst_273 = arith.constant -2.000000e+01 : f32
    %cst_274 = arith.constant 2.000000e+00 : f32
    %357 = vector.broadcast %cst_273 : f32 to vector<2x128xf32>
    %358 = arith.maximumf %357, %356 : vector<2x128xf32>
    %359 = vector.broadcast %cst_274 : f32 to vector<2x128xf32>
    %360 = arith.minimumf %359, %358 : vector<2x128xf32>
    %c0_275 = arith.constant 0 : index
    %c0_276 = arith.constant 0 : index
    %c0_277 = arith.constant 0 : index
    %361 = vector.load %arg15[%c0_275, %c0_276, %c0_277] : memref<2x2x128xf32, #tpu.memory_space<vmem>>, vector<1x2x128xf32>
    %362 = vector.shape_cast %361 : vector<1x2x128xf32> to vector<2x128xf32>
    %363 = vector.shape_cast %284 : vector<2x128xf32> to vector<1x2x128xf32>
    tpu.vector_store %arg15[%c0_275, %c0_276, %c0_277], %363 {strides = array<i32>} : memref<2x2x128xf32, #tpu.memory_space<vmem>>, vector<1x2x128xf32>,
    %c1_278 = arith.constant 1 : index
    %c0_279 = arith.constant 0 : index
    %c0_280 = arith.constant 0 : index
    %364 = vector.load %arg15[%c1_278, %c0_279, %c0_280] : memref<2x2x128xf32, #tpu.memory_space<vmem>>, vector<1x2x128xf32>
    %365 = vector.shape_cast %364 : vector<1x2x128xf32> to vector<2x128xf32>
    %366 = vector.shape_cast %360 : vector<2x128xf32> to vector<1x2x128xf32>
    tpu.vector_store %arg15[%c1_278, %c0_279, %c0_280], %366 {strides = array<i32>} : memref<2x2x128xf32, #tpu.memory_space<vmem>>, vector<1x2x128xf32>,
    return
  }
}

</mosaic_0001>

<bundles_post_ra>
// kernel: tsac_policy_forward.1
= control target key start
LH: loop header
LB: loop body
LE: loop exit
PB: predicated region body
PF: predicated region fallthrough
CT: control target
= control target key end

     0   :  { %vm8386_vm0 = vmmov 0   ;;  %vm463_vm1 = vcmask 261120   ;;  %vm3235_vm2 = vcmask 1041408   ;;  %vm3231_vm3 = vcmask 146432   ;;  %s10158_s3 = inlined_call_operand.vmem [shape: bf16[1,2,2], index: 3, kind: input, shape index: {}]   ;;  %s10159_s4 = inlined_call_operand.vmem [shape: f32[256,32], index: 4, kind: input, shape index: {}]   ;;  %s10160_s0 = inlined_call_operand.vmem [shape: f32[128,256], index: 0, kind: input, shape index: {}]   ;;  %s10161_s14 = inlined_call_operand.vmem [shape: f32[17,128], index: 14, kind: input, shape index: {}]   ;;  %s10162_s1 = inlined_call_operand.vmem [shape: bf16[16,18,128], index: 1, kind: input, shape index: {}]   ;;  %s10163_s5 = inlined_call_operand.vmem [shape: f32[16,32,64], index: 5, kind: input, shape index: {}]   ;;  %s10164_s6 = inlined_call_operand.vmem [shape: f32[9,64,64], index: 6, kind: input, shape index: {}]   ;;  %s10165_s2 = inlined_call_operand.vmem [shape: bf16[9,2,18], index: 2, kind: input, shape index: {}]   ;;  %s10166_s7 = inlined_call_operand.vmem [shape: f32[64,32], index: 7, kind: input, shape index: {}]   ;;  %s10167_s8 = inlined_call_operand.vmem [shape: f32[32,32], index: 8, kind: input, shape index: {}]   ;;  %s10168_s9 = inlined_call_operand.vmem [shape: f32[32,128], index: 9, kind: input, shape index: {}]   ;;  %s10169_s11 = inlined_call_operand.vmem [shape: f32[128,32], index: 11, kind: input, shape index: {}]   ;;  %s10170_s10 = inlined_call_operand.vmem [shape: f32[64,32], index: 10, kind: input, shape index: {}]   ;;  %s10171_s15 = inlined_call_operand.vmem [shape: f32[2,2,128], index: 15, kind: output, shape index: {}]   ;;  %s10172_s12 = inlined_call_operand.vmem [shape: f32[32,32], index: 12, kind: input, shape index: {}]   ;;  %s10173_s13 = inlined_call_operand.vmem [shape: f32[32,128], index: 13, kind: input, shape index: {}]  }
   0x1   :  { %v98_v0 = vld [vmem:[%s10159_s4 + $0x80] sm:$0xff]  ;;  %v99_v1 = vld [vmem:[%s10159_s4 + $0x88] sm:$0xff]  ;;  %v100_v5 = vld [vmem:[%s10159_s4 + $0x90] sm:$0xff]  ;;  %vm3402_vm4 = vcmask 523264   ;;  %vm4756_vm5 = vcmask 254976  }
   0x2   :  { %v82_v2 = vld [vmem:[%s10159_s4] sm:$0xff]  ;;  %v7655_v3 = vpack.c.bf16 %v99_v1, %v98_v0  ;;  %v83_v4 = vld [vmem:[%s10159_s4 + $0x8] sm:$0xff]  ;;  %v101_v6 = vld [vmem:[%s10159_s4 + $0x98] sm:$0xff] }
   0x3   :  { %v7657_v7 = vpack.c.bf16 %v83_v4, %v82_v2  ;;  %v7659_v8 = vpack.c.bf16 %v101_v6, %v100_v5  ;;  %v84_v9 = vld [vmem:[%s10159_s4 + $0x10] sm:$0xff]  ;;  %v85_v10 = vld [vmem:[%s10159_s4 + $0x18] sm:$0xff]  ;;  %v102_v11 = vld [vmem:[%s10159_s4 + $0xa0] sm:$0xff] }
   0x4   :  { %7656 = vmatprep.subr.bf16.mxu0 %v7655_v3  ;;  %v103_v12 = vld [vmem:[%s10159_s4 + $0xa8] sm:$0xff]  ;;  %v7661_v13 = vpack.c.bf16 %v85_v10, %v84_v9  ;;  %v86_v15 = vld [vmem:[%s10159_s4 + $0x20] sm:$0xff]  ;;  %v104_v17 = vld [vmem:[%s10159_s4 + $0xb0] sm:$0xff] }
   0x5   :  { %7658 = vmatpush3.bf16.msra.mxu0 %v7657_v7  ;;  %v7663_v14 = vpack.c.bf16 %v103_v12, %v102_v11  ;;  %v87_v16 = vld [vmem:[%s10159_s4 + $0x28] sm:$0xff]  ;;  %v105_v18 = vld [vmem:[%s10159_s4 + $0xb8] sm:$0xff]  ;;  %v88_v21 = vld [vmem:[%s10159_s4 + $0x30] sm:$0xff] }
   0x6   :  { %7660 = vmatprep.subr.bf16.mxu0 %v7659_v8  ;;  %v7665_v19 = vpack.c.bf16 %v87_v16, %v86_v15  ;;  %v7667_v20 = vpack.c.bf16 %v105_v18, %v104_v17  ;;  %v89_v22 = vld [vmem:[%s10159_s4 + $0x38] sm:$0xff]  ;;  %v106_v23 = vld [vmem:[%s10159_s4 + $0xc0] sm:$0xff]  ;;  %v107_v24 = vld [vmem:[%s10159_s4 + $0xc8] sm:$0xff]  ;;  %v8385_v16 = vmov 0.0|0.0   ;;  %v8387_v17 = vmov 0.0  }
   0x7   :  { %v51_v25 = vld [vmem:[%s10160_s0 + $0x8] sm:$0xff]  ;;  %v7669_v26 = vpack.c.bf16 %v89_v22, %v88_v21  ;;  %v7671_v27 = vpack.c.bf16 %v107_v24, %v106_v23  ;;  %v90_v28 = vld [vmem:[%s10159_s4 + $0x40] sm:$0xff]  ;;  %v108_v30 = vld [vmem:[%s10159_s4 + $0xd0] sm:$0xff]  ;;  %7687 = vmatprep.subr.bf16.mxu1 %v8385_v16  ;;  %6390 = vmatprep.mubr.msk.f32.mxu1 %vm8386_vm0, %v8387_v17 }
   0x8   :  { %183 = vmatprep.mubr.f32.mxu0 %v51_v25  ;;  %v91_v29 = vld [vmem:[%s10159_s4 + $0x48] sm:$0xff]  ;;  %v109_v31 = vld [vmem:[%s10159_s4 + $0xd8] sm:$0xff]  ;;  %v92_v34 = vld [vmem:[%s10159_s4 + $0x50] sm:$0xff] }
   0x9   :  { %7662 = vmatpush3.bf16.msra.mxu0 %v7661_v13  ;;  %v7673_v32 = vpack.c.bf16 %v91_v29, %v90_v28  ;;  %v7675_v33 = vpack.c.bf16 %v109_v31, %v108_v30  ;;  %v93_v35 = vld [vmem:[%s10159_s4 + $0x58] sm:$0xff]  ;;  %v110_v36 = vld [vmem:[%s10159_s4 + $0xe0] sm:$0xff]  ;;  %v111_v37 = vld [vmem:[%s10159_s4 + $0xe8] sm:$0xff] }
   0xa   :  { %7664 = vmatprep.subr.bf16.mxu0 %v7663_v14  ;;  %v7677_v38 = vpack.c.bf16 %v93_v35, %v92_v34  ;;  %v7679_v39 = vpack.c.bf16 %v111_v37, %v110_v36  ;;  %v94_v40 = vld [vmem:[%s10159_s4 + $0x60] sm:$0xff]  ;;  %v95_v41 = vld [vmem:[%s10159_s4 + $0x68] sm:$0xff]  ;;  %v112_v42 = vld [vmem:[%s10159_s4 + $0xf0] sm:$0xff] }
   0xb   :  { %v113_v43 = vld [vmem:[%s10159_s4 + $0xf8] sm:$0xff]  ;;  %v7681_v44 = vpack.c.bf16 %v95_v41, %v94_v40  ;;  %v96_v46 = vld [vmem:[%s10159_s4 + $0x70] sm:$0xff]  ;;  %v50_v49 = vld [vmem:[%s10160_s0] sm:$0xff] }
   0xc   :  { %v7683_v45 = vpack.c.bf16 %v113_v43, %v112_v42  ;;  %v97_v47 = vld [vmem:[%s10159_s4 + $0x78] sm:$0xff]  ;;  %v52_v51 = vld [vmem:[%s10160_s0 + $0x10] sm:$0xff]  ;;  %v55_v52 = vld [vmem:[%s10160_s0 + $0x28] sm:$0xff] }
   0xd   :  { %7666 = vmatpush3.bf16.msra.mxu0 %v7665_v19  ;;  %v7685_v48 = vpack.c.bf16 %v97_v47, %v96_v46  ;;  %v53_v50 = vld [vmem:[%s10160_s0 + $0x18] sm:$0xff]  ;;  %v54_v53 = vld [vmem:[%s10160_s0 + $0x20] sm:$0xff]  ;;  %v56_v55 = vld [vmem:[%s10160_s0 + $0x30] sm:$0xff] }
   0xe   :  { %7668 = vmatprep.subr.bf16.mxu0 %v7667_v20  ;;  %v57_v54 = vld [vmem:[%s10160_s0 + $0x38] sm:$0xff]  ;;  %v59_v56 = vld [vmem:[%s10160_s0 + $0x48] sm:$0xff]  ;;  %v58_v57 = vld [vmem:[%s10160_s0 + $0x40] sm:$0xff] }
   0xf   :  { %v61_v58 = vld [vmem:[%s10160_s0 + $0x58] sm:$0xff]  ;;  %v60_v59 = vld [vmem:[%s10160_s0 + $0x50] sm:$0xff]  ;;  %v63_v60 = vld [vmem:[%s10160_s0 + $0x68] sm:$0xff] }
  0x10   :  { %v62_v61 = vld [vmem:[%s10160_s0 + $0x60] sm:$0xff]  ;;  %v65_v62 = vld [vmem:[%s10160_s0 + $0x78] sm:$0xff]  ;;  %v64_v63 = vld [vmem:[%s10160_s0 + $0x70] sm:$0xff] }
  0x11   :  { %7670 = vmatpush3.bf16.msra.mxu0 %v7669_v26  ;;  %v67_v0 = vld [vmem:[%s10160_s0 + $0x88] sm:$0xff]  ;;  %v66_v1 = vld [vmem:[%s10160_s0 + $0x80] sm:$0xff]  ;;  %v69_v2 = vld [vmem:[%s10160_s0 + $0x98] sm:$0xff] }
  0x12   :  { %7672 = vmatprep.subr.bf16.mxu0 %v7671_v27  ;;  %v68_v3 = vld [vmem:[%s10160_s0 + $0x90] sm:$0xff]  ;;  %v71_v4 = vld [vmem:[%s10160_s0 + $0xa8] sm:$0xff]  ;;  %v70_v5 = vld [vmem:[%s10160_s0 + $0xa0] sm:$0xff] }
  0x13   :  { %v73_v6 = vld [vmem:[%s10160_s0 + $0xb8] sm:$0xff]  ;;  %v72_v7 = vld [vmem:[%s10160_s0 + $0xb0] sm:$0xff]  ;;  %v75_v8 = vld [vmem:[%s10160_s0 + $0xc8] sm:$0xff] }
  0x14   :  { %v74_v9 = vld [vmem:[%s10160_s0 + $0xc0] sm:$0xff]  ;;  %v77_v10 = vld [vmem:[%s10160_s0 + $0xd8] sm:$0xff]  ;;  %v76_v11 = vld [vmem:[%s10160_s0 + $0xd0] sm:$0xff] }
  0x15   :  { %7674 = vmatpush3.bf16.msra.mxu0 %v7673_v32  ;;  %v79_v12 = vld [vmem:[%s10160_s0 + $0xe8] sm:$0xff]  ;;  %v78_v13 = vld [vmem:[%s10160_s0 + $0xe0] sm:$0xff]  ;;  %v81_v14 = vld [vmem:[%s10160_s0 + $0xf8] sm:$0xff] }
  0x16   :  { %7676 = vmatprep.subr.bf16.mxu0 %v7675_v33  ;;  %v80_v15 = vld [vmem:[%s10160_s0 + $0xf0] sm:$0xff]  ;;  %v8669_v21 = vld [vmem:[%s10161_s14] ss:$0 sm:$0xff] }
  0x19   :  { %7678 = vmatpush3.bf16.msra.mxu0 %v7677_v38 }
  0x1a   :  { %7680 = vmatprep.subr.bf16.mxu0 %v7679_v39 }
  0x1d   :  { %7682 = vmatpush3.bf16.msra.mxu0 %v7681_v44 }
  0x1e   :  { %7684 = vmatprep.subr.bf16.mxu0 %v7683_v45 }
  0x21   :  { %7686 = vmatpush3.bf16.msra.mxu0 %v7685_v48 }
  0x22   :  { %7747 = vmatprep.subr.bf16.mxu0 %v8385_v16 }
  0x24   :  { %184 = vmatmul.mubr.f32.vlgmr.msra.gmra.mrb[0].mxu0 %v50_v49 }
  0x25   :  { %188 = vmatprep.mubr.f32.mxu0 %v53_v50 }
  0x28   :  { %189 = vmatmul.mubr.f32.gmra.mrb[2].mxu0 %v52_v51 }
  0x29   :  { %193 = vmatprep.mubr.f32.mxu0 %v55_v52 }
  0x2c   :  { %194 = vmatmul.mubr.f32.gmra.mrb[4].mxu0 %v54_v53 }
  0x2d   :  { %198 = vmatprep.mubr.f32.mxu0 %v57_v54 }
  0x30   :  { %199 = vmatmul.mubr.f32.gmra.mrb[6].mxu0 %v56_v55 }
  0x31   :  { %203 = vmatprep.mubr.f32.mxu0 %v59_v56 }
  0x34   :  { %204 = vmatmul.mubr.f32.gmra.mrb[8].mxu0 %v58_v57 }
  0x35   :  { %208 = vmatprep.mubr.f32.mxu0 %v61_v58 }
  0x38   :  { %209 = vmatmul.mubr.f32.gmra.mrb[10].mxu0 %v60_v59 }
  0x39   :  { %213 = vmatprep.mubr.f32.mxu0 %v63_v60 }
  0x3c   :  { %214 = vmatmul.mubr.f32.gmra.mrb[12].mxu0 %v62_v61 }
  0x3d   :  { %218 = vmatprep.mubr.f32.mxu0 %v65_v62 }
  0x40   :  { %219 = vmatmul.mubr.f32.gmra.mrb[14].mxu0 %v64_v63 }
  0x41   :  { %223 = vmatprep.mubr.f32.mxu0 %v67_v0 }
  0x44   :  { %224 = vmatmul.mubr.f32.gmra.mrb[16].mxu0 %v66_v1 }
  0x45   :  { %228 = vmatprep.mubr.f32.mxu0 %v69_v2 }
  0x48   :  { %229 = vmatmul.mubr.f32.gmra.mrb[18].mxu0 %v68_v3 }
  0x49   :  { %233 = vmatprep.mubr.f32.mxu0 %v71_v4 }
  0x4c   :  { %234 = vmatmul.mubr.f32.gmra.mrb[20].mxu0 %v70_v5 }
  0x4d   :  { %238 = vmatprep.mubr.f32.mxu0 %v73_v6 }
  0x50   :  { %239 = vmatmul.mubr.f32.gmra.mrb[22].mxu0 %v72_v7 }
  0x51   :  { %243 = vmatprep.mubr.f32.mxu0 %v75_v8 }
  0x54   :  { %244 = vmatmul.mubr.f32.gmra.mrb[24].mxu0 %v74_v9 }
  0x55   :  { %248 = vmatprep.mubr.f32.mxu0 %v77_v10 }
  0x58   :  { %249 = vmatmul.mubr.f32.gmra.mrb[26].mxu0 %v76_v11 }
  0x59   :  { %253 = vmatprep.mubr.f32.mxu0 %v79_v12 }
  0x5c   :  { %254 = vmatmul.mubr.f32.gmra.mrb[28].mxu0 %v78_v13 }
  0x5d   :  { %258 = vmatprep.mubr.f32.mxu0 %v81_v14 }
  0x60   :  { %259 = vmatmul.mubr.f32.gmra.mrb[30].mxu0 %v80_v15 }
  0x61   :  { %6506 = vmatprep.mubr.msk.f32.mxu0 %vm8386_vm0, %v8387_v17 }
  0xf7   :  { %v5722_v18 = vpop.f32.mrb[0].mxu0 }
  0xf8   :  { %v5723_v19 = vpop.f32.mrb[1].mxu0 }
  0xf9   :  { %v5724_v20 = vadd.f32 %v5723_v19, %v5722_v18 }
  0xfb   :  { %v5725_v22 = vpop.f32.mrb[2].mxu0  ;;  %v186_v24 = vadd.f32 %v5724_v20, %v8669_v21 }
  0xfc   :  { %v5726_v23 = vpop.f32.mrb[3].mxu0 }
  0xfd   :  { %v5727_v25 = vadd.f32 %v5726_v23, %v5725_v22  ;;  %v264_v29 = vmax.f32 %v186_v24, 0.0 }
  0xff   :  { %v191_v26 = vadd.f32 %v5727_v25, %v8669_v21  ;;  %v5728_v27 = vpop.f32.mrb[4].mxu0 }
 0x100   :  { %v5729_v28 = vpop.f32.mrb[5].mxu0 }
 0x101   :  { %v265_v30 = vmax.f32 %v191_v26, 0.0  ;;  %v5730_v31 = vadd.f32 %v5729_v28, %v5728_v27 }
 0x103   :  { %v8673_v32 = vpack.c.bf16 %v265_v30, %v264_v29  ;;  %v5731_v33 = vpop.f32.mrb[6].mxu0  ;;  %v196_v35 = vadd.f32 %v5730_v31, %v8669_v21 }
 0x104   :  { %v5732_v34 = vpop.f32.mrb[7].mxu0 }
 0x105   :  { %v5733_v36 = vadd.f32 %v5732_v34, %v5731_v33  ;;  %7689 = vmatpush3.bf16.msra.mxu1 %v8673_v32  ;;  %7749 = vmatpush3.bf16.msra.mxu0 %v8673_v32  ;;  %v266_v40 = vmax.f32 %v196_v35, 0.0 }
 0x106   :  { %7690 = vmatprep.subr.bf16.mxu1 %v8385_v16  ;;  %7750 = vmatprep.subr.bf16.mxu0 %v8385_v16 }
 0x107   :  { %v201_v37 = vadd.f32 %v5733_v36, %v8669_v21  ;;  %v5734_v38 = vpop.f32.mrb[8].mxu0 }
 0x108   :  { %v5735_v39 = vpop.f32.mrb[9].mxu0 }
 0x109   :  { %v267_v41 = vmax.f32 %v201_v37, 0.0  ;;  %v5736_v42 = vadd.f32 %v5735_v39, %v5734_v38 }
 0x10b   :  { %v8681_v43 = vpack.c.bf16 %v267_v41, %v266_v40  ;;  %v5737_v44 = vpop.f32.mrb[10].mxu0  ;;  %v206_v46 = vadd.f32 %v5736_v42, %v8669_v21 }
 0x10c   :  { %v5738_v45 = vpop.f32.mrb[11].mxu0 }
 0x10d   :  { %v5739_v47 = vadd.f32 %v5738_v45, %v5737_v44  ;;  %7692 = vmatpush3.bf16.msra.mxu1 %v8681_v43  ;;  %7752 = vmatpush3.bf16.msra.mxu0 %v8681_v43  ;;  %v268_v51 = vmax.f32 %v206_v46, 0.0 }
 0x10e   :  { %7693 = vmatprep.subr.bf16.mxu1 %v8385_v16  ;;  %7753 = vmatprep.subr.bf16.mxu0 %v8385_v16 }
 0x10f   :  { %v211_v48 = vadd.f32 %v5739_v47, %v8669_v21  ;;  %v5740_v49 = vpop.f32.mrb[12].mxu0  ;;  %v5652_v47 = vld [vmem:[%s10162_s1] sm:$0xff]  }
 0x110   :  { %v5741_v50 = vpop.f32.mrb[13].mxu0 }
 0x111   :  { %v269_v52 = vmax.f32 %v211_v48, 0.0  ;;  %v5742_v53 = vadd.f32 %v5741_v50, %v5740_v49  ;;  %v5683_v48 = vld [vmem:[%s10162_s1 + $0x18] sm:$0xff]   ;;  %v5653_v50 = vunpack.c.l.bf16 %v5652_v47 }
 0x113   :  { %v8689_v54 = vpack.c.bf16 %v269_v52, %v268_v51  ;;  %v5743_v55 = vpop.f32.mrb[14].mxu0  ;;  %v216_v57 = vadd.f32 %v5742_v53, %v8669_v21  ;;  %v5657_v51 = vunpack.c.l.bf16 %v5683_v48  ;;  %v5658_v52 = vunpack.c.h.bf16 %v5683_v48  ;;  %v283_v53 = vld [vmem:[%s10162_s1 + $0x8] sm:$0x1] }
 0x114   :  { %v5744_v56 = vpop.f32.mrb[15].mxu0 }
 0x115   :  { %v5745_v58 = vadd.f32 %v5744_v56, %v5743_v55  ;;  %7695 = vmatpush3.bf16.msra.mxu1 %v8689_v54  ;;  %7755 = vmatpush3.bf16.msra.mxu0 %v8689_v54  ;;  %v270_v62 = vmax.f32 %v216_v57, 0.0  ;;  %v5391_v55 = vld [vmem:[%s10162_s1 + $0x20] sm:$0x1]  ;;  %v286_v56 = vunpack.c.l.bf16 %v283_v53  ;;  %v5395_v53 = vld [vmem:[%s10163_s5 + $0x58] sm:$0xff] }
 0x116   :  { %7696 = vmatprep.subr.bf16.mxu1 %v8385_v16  ;;  %7756 = vmatprep.subr.bf16.mxu0 %v8385_v16  ;;  %v648_v57 = vunpack.c.l.bf16 %v5391_v55 }
 0x117   :  { %v221_v59 = vadd.f32 %v5745_v58, %v8669_v21  ;;  %v5746_v60 = vpop.f32.mrb[16].mxu0  ;;  %v5376_v58 = vld [vmem:[%s10162_s1 + $0xc] sm:$0xff]  }
 0x118   :  { %v5747_v61 = vpop.f32.mrb[17].mxu0 }
 0x119   :  { %v271_v63 = vmax.f32 %v221_v59, 0.0  ;;  %v5748_v0 = vadd.f32 %v5747_v61, %v5746_v60  ;;  %v5399_v59 = vld [vmem:[%s10162_s1 + $0x24] sm:$0xff]   ;;  %v375_v60 = vunpack.c.l.bf16 %v5376_v58 }
 0x11a   :  { %v830_v61 = vunpack.c.l.bf16 %v5399_v59 }
 0x11b   :  { %v8697_v1 = vpack.c.bf16 %v271_v63, %v270_v62  ;;  %v5749_v2 = vpop.f32.mrb[18].mxu0  ;;  %v226_v4 = vadd.f32 %v5748_v0, %v8669_v21  ;;  %v376_v62 = vunpack.c.h.bf16 %v5376_v58  ;;  %v831_v63 = vunpack.c.h.bf16 %v5399_v59  ;;  %v5378_v0 = vld [vmem:[%s10162_s1 + $0x14] sm:$0x1] }
 0x11c   :  { %v5750_v3 = vpop.f32.mrb[19].mxu0  ;;  %v5404_v59 = vld [vmem:[%s10163_s5 + $0x70] sm:$0xff] }
 0x11d   :  { %v5751_v5 = vadd.f32 %v5750_v3, %v5749_v2  ;;  %7698 = vmatpush3.bf16.msra.mxu1 %v8697_v1  ;;  %7758 = vmatpush3.bf16.msra.mxu0 %v8697_v1  ;;  %v272_v9 = vmax.f32 %v226_v4, 0.0  ;;  %v5401_v2 = vld [vmem:[%s10162_s1 + $0x2c] sm:$0x1]  ;;  %v377_v3 = vunpack.c.l.bf16 %v5378_v0 }
 0x11e   :  { %7699 = vmatprep.subr.bf16.mxu1 %v8385_v16  ;;  %7759 = vmatprep.subr.bf16.mxu0 %v8385_v16  ;;  %v832_v4 = vunpack.c.l.bf16 %v5401_v2  ;;  %v5411_v2 = vld [vmem:[%s10162_s1 + $0x38] sm:$0x1] }
 0x11f   :  { %v231_v6 = vadd.f32 %v5751_v5, %v8669_v21  ;;  %v5752_v7 = vpop.f32.mrb[20].mxu0  ;;  %v5379_v5 = vld [vmem:[%s10163_s5 + $0x20] sm:$0xff] }
 0x120   :  { %v5753_v8 = vpop.f32.mrb[21].mxu0 }
 0x121   :  { %v273_v10 = vmax.f32 %v231_v6, 0.0  ;;  %v5754_v11 = vadd.f32 %v5753_v8, %v5752_v7  ;;  %v5380_v6 = vld [vmem:[%s10163_s5 + $0x28] sm:$0xff]  ;;  %v5381_v8 = vld [vmem:[%s10163_s5 + $0x30] sm:$0xff] }
 0x122   :  { %v7736_v7 = vpack.c.bf16 %v5380_v6, %v5379_v5  ;;  %v5413_v5 = vld [vmem:[%s10163_s5 + $0x88] sm:$0xff]  ;;  %v5414_v6 = vld [vmem:[%s10163_s5 + $0x90] sm:$0xff] }
 0x123   :  { %v8705_v12 = vpack.c.bf16 %v273_v10, %v272_v9  ;;  %v5755_v13 = vpop.f32.mrb[22].mxu0  ;;  %v236_v15 = vadd.f32 %v5754_v11, %v8669_v21  ;;  %v5382_v9 = vld [vmem:[%s10163_s5 + $0x38] sm:$0xff] }
 0x124   :  { %v5756_v14 = vpop.f32.mrb[23].mxu0  ;;  %v7739_v10 = vpack.c.bf16 %v5382_v9, %v5381_v8  ;;  %v5415_v8 = vld [vmem:[%s10163_s5 + $0x98] sm:$0xff] }
 0x125   :  { %v5757_v18 = vadd.f32 %v5756_v14, %v5755_v13  ;;  %7701 = vmatpush3.bf16.msra.mxu1 %v8705_v12  ;;  %7761 = vmatpush3.bf16.msra.mxu0 %v8705_v12  ;;  %v274_v23 = vmax.f32 %v236_v15, 0.0  ;;  %v7835_v9 = vpack.c.bf16 %v5415_v8, %v5414_v6 }
 0x126   :  { %7702 = vmatprep.subr.bf16.mxu1 %v8385_v16  ;;  %7762 = vmatprep.subr.bf16.mxu0 %v8385_v16 }
 0x127   :  { %v241_v19 = vadd.f32 %v5757_v18, %v8669_v21  ;;  %v5758_v20 = vpop.f32.mrb[24].mxu0 }
 0x128   :  { %v5759_v22 = vpop.f32.mrb[25].mxu0 }
 0x129   :  { %v275_v24 = vmax.f32 %v241_v19, 0.0  ;;  %v5760_v25 = vadd.f32 %v5759_v22, %v5758_v20 }
 0x12b   :  { %v8713_v26 = vpack.c.bf16 %v275_v24, %v274_v23  ;;  %v5761_v27 = vpop.f32.mrb[26].mxu0  ;;  %v246_v29 = vadd.f32 %v5760_v25, %v8669_v21 }
 0x12c   :  { %v5762_v28 = vpop.f32.mrb[27].mxu0 }
 0x12d   :  { %v5763_v30 = vadd.f32 %v5762_v28, %v5761_v27  ;;  %7704 = vmatpush3.bf16.msra.mxu1 %v8713_v26  ;;  %7764 = vmatpush3.bf16.msra.mxu0 %v8713_v26  ;;  %v276_v35 = vmax.f32 %v246_v29, 0.0  ;;  %v367_v28 = vld [vmem:[%s10163_s5] sm:$0xff]  ;;  %v368_v29 = vld [vmem:[%s10163_s5 + $0x8] sm:$0xff] }
 0x12e   :  { %7705 = vmatprep.subr.bf16.mxu1 %v8385_v16  ;;  %7765 = vmatprep.subr.bf16.mxu0 %v8385_v16 }
 0x12f   :  { %v251_v31 = vadd.f32 %v5763_v30, %v8669_v21  ;;  %v5764_v33 = vpop.f32.mrb[28].mxu0  ;;  %v7742_v30 = vpack.c.bf16 %v368_v29, %v367_v28 }
 0x130   :  { %v5765_v34 = vpop.f32.mrb[29].mxu0 }
 0x131   :  { %v277_v36 = vmax.f32 %v251_v31, 0.0  ;;  %v5766_v37 = vadd.f32 %v5765_v34, %v5764_v33  ;;  %v369_v31 = vld [vmem:[%s10163_s5 + $0x10] sm:$0xff]  ;;  %v370_v33 = vld [vmem:[%s10163_s5 + $0x18] sm:$0xff] }
 0x133   :  { %v8721_v38 = vpack.c.bf16 %v277_v36, %v276_v35  ;;  %v5767_v39 = vpop.f32.mrb[30].mxu0  ;;  %v256_v41 = vadd.f32 %v5766_v37, %v8669_v21 }
 0x134   :  { %v5768_v40 = vpop.f32.mrb[31].mxu0 }
 0x135   :  { %v5769_v42 = vadd.f32 %v5768_v40, %v5767_v39  ;;  %7707 = vmatpush3.bf16.msra.mxu1 %v8721_v38  ;;  %7767 = vmatpush3.bf16.msra.mxu0 %v8721_v38  ;;  %v278_v45 = vmax.f32 %v256_v41, 0.0  ;;  %v7745_v39 = vpack.c.bf16 %v370_v33, %v369_v31 }
 0x136   :  { %7708 = vmatprep.subr.bf16.mxu1 %v8385_v16  ;;  %7768 = vmatprep.subr.bf16.mxu0 %v8385_v16 }
 0x137   :  { %v261_v44 = vadd.f32 %v5769_v42, %v8669_v21  ;;  %v5654_v21 = vunpack.c.h.bf16 %v5652_v47 }
 0x139   :  { %v279_v46 = vmax.f32 %v261_v44, 0.0 }
 0x13b   :  { %v8735_v49 = vpack.c.bf16 %v279_v46, %v278_v45  ;;  %v5392_v45 = vld [vmem:[%s10163_s5 + $0x40] sm:$0xff]  ;;  %v5393_v46 = vld [vmem:[%s10163_s5 + $0x48] sm:$0xff] }
 0x13d   :  { %7710 = vmatpush3.bf16.msra.mxu1 %v8735_v49  ;;  %7770 = vmatpush3.bf16.msra.mxu0 %v8735_v49 }
 0x13e   :  { %7711 = vmatprep.subr.bf16.mxu1 %v8385_v16  ;;  %7777 = vmatprep.subr.bf16.mxu0 %v8385_v16 }
 0x140   :  { %6391 = vmatmul.mubr.f32.vlgmr.msra.gmra.mrb[0].mxu1 %v5653_v50  ;;  %6507 = vmatmul.mubr.f32.vlgmr.msra.gmra.mrb[32].mxu0 %v5657_v51 }
 0x141   :  { %7713 = vmatpush3.bf16.msra.mxu1 %v8673_v32  ;;  %7779 = vmatpush3.bf16.msra.mxu0 %v8673_v32 }
 0x142   :  { %7714 = vmatprep.subr.bf16.mxu1 %v8385_v16  ;;  %7780 = vmatprep.subr.bf16.mxu0 %v8385_v16 }
 0x143   :  { %6393 = vmatprep.mubr.msk.f32.mxu1 %vm8386_vm0, %v8387_v17  ;;  %6509 = vmatprep.mubr.msk.f32.mxu0 %vm8386_vm0, %v8387_v17 }
 0x144   :  { %6394 = vmatmul.mubr.f32.gmra.mrb[2].mxu1 %v5654_v21  ;;  %6510 = vmatmul.mubr.f32.gmra.mrb[34].mxu0 %v5658_v52  ;;  %v7772_v21 = vpack.c.bf16 %v5393_v46, %v5392_v45  ;;  %v5394_v52 = vld [vmem:[%s10163_s5 + $0x50] sm:$0xff] }
 0x145   :  { %7716 = vmatpush3.bf16.msra.mxu1 %v8681_v43  ;;  %7782 = vmatpush3.bf16.msra.mxu0 %v8681_v43  ;;  %v7775_v55 = vpack.c.bf16 %v5395_v53, %v5394_v52 }
 0x146   :  { %7717 = vmatprep.subr.bf16.mxu1 %v8385_v16  ;;  %7783 = vmatprep.subr.bf16.mxu0 %v8385_v16 }
 0x147   :  { %6396 = vmatprep.mubr.msk.f32.mxu1 %vm8386_vm0, %v8387_v17  ;;  %6512 = vmatprep.mubr.msk.f32.mxu0 %vm8386_vm0, %v8387_v17 }
 0x148   :  { %6397 = vmatmul.mubr.f32.gmra.mrb[4].mxu1 %v286_v56  ;;  %6513 = vmatmul.mubr.f32.gmra.mrb[36].mxu0 %v648_v57  ;;  %v5402_v56 = vld [vmem:[%s10163_s5 + $0x60] sm:$0xff]  ;;  %v5403_v57 = vld [vmem:[%s10163_s5 + $0x68] sm:$0xff] }
 0x149   :  { %7719 = vmatpush3.bf16.msra.mxu1 %v8689_v54  ;;  %7785 = vmatpush3.bf16.msra.mxu0 %v8689_v54  ;;  %v7802_v58 = vpack.c.bf16 %v5403_v57, %v5402_v56 }
 0x14a   :  { %7720 = vmatprep.subr.bf16.mxu1 %v8385_v16  ;;  %7786 = vmatprep.subr.bf16.mxu0 %v8385_v16 }
 0x14b   :  { %6431 = vmatprep.mubr.msk.f32.mxu1 %vm8386_vm0, %v8387_v17  ;;  %6564 = vmatprep.mubr.msk.f32.mxu0 %vm8386_vm0, %v8387_v17 }
 0x14d   :  { %7722 = vmatpush3.bf16.msra.mxu1 %v8697_v1  ;;  %7788 = vmatpush3.bf16.msra.mxu0 %v8697_v1 }
 0x14e   :  { %7723 = vmatprep.subr.bf16.mxu1 %v8385_v16  ;;  %7789 = vmatprep.subr.bf16.mxu0 %v8385_v16 }
 0x151   :  { %7725 = vmatpush3.bf16.msra.mxu1 %v8705_v12  ;;  %7791 = vmatpush3.bf16.msra.mxu0 %v8705_v12 }
 0x152   :  { %7726 = vmatprep.subr.bf16.mxu1 %v8385_v16  ;;  %7792 = vmatprep.subr.bf16.mxu0 %v8385_v16 }
 0x155   :  { %7728 = vmatpush3.bf16.msra.mxu1 %v8713_v26  ;;  %7794 = vmatpush3.bf16.msra.mxu0 %v8713_v26 }
 0x156   :  { %7729 = vmatprep.subr.bf16.mxu1 %v8385_v16  ;;  %7795 = vmatprep.subr.bf16.mxu0 %v8385_v16 }
 0x159   :  { %7731 = vmatpush3.bf16.msra.mxu1 %v8721_v38  ;;  %7797 = vmatpush3.bf16.msra.mxu0 %v8721_v38 }
 0x15a   :  { %7732 = vmatprep.subr.bf16.mxu1 %v8385_v16  ;;  %7798 = vmatprep.subr.bf16.mxu0 %v8385_v16 }
 0x15d   :  { %7734 = vmatpush3.bf16.msra.mxu1 %v8735_v49  ;;  %7800 = vmatpush3.bf16.msra.mxu0 %v8735_v49 }
 0x15e   :  { %7735 = vmatprep.subr.bf16.mxu1 %v8385_v16  ;;  %7831 = vmatprep.subr.bf16.mxu0 %v8385_v16 }
 0x160   :  { %6432 = vmatmul.mubr.f32.vlgmr.msra.gmra.mrb[6].mxu1 %v375_v60  ;;  %6565 = vmatmul.mubr.f32.vlgmr.msra.gmra.mrb[38].mxu0 %v830_v61  ;;  %v5405_v60 = vld [vmem:[%s10163_s5 + $0x78] sm:$0xff] }
 0x161   :  { %6434 = vmatprep.mubr.msk.f32.mxu1 %vm8386_vm0, %v8387_v17  ;;  %6567 = vmatprep.mubr.msk.f32.mxu0 %vm8386_vm0, %v8387_v17  ;;  %v7805_v61 = vpack.c.bf16 %v5405_v60, %v5404_v59 }
 0x162   :  { %7737 = vmatpush3.bf16.msra.mxu1 %v7736_v7 }
 0x163   :  { %7738 = vmatprep.subr.bf16.mxu1 %v8385_v16 }
 0x164   :  { %6435 = vmatmul.mubr.f32.gmra.mrb[8].mxu1 %v376_v62  ;;  %6568 = vmatmul.mubr.f32.gmra.mrb[40].mxu0 %v831_v63  ;;  %v5684_v62 = vld [vmem:[%s10162_s1 + $0x30] sm:$0xff]  }
 0x165   :  { %6437 = vmatprep.mubr.msk.f32.mxu1 %vm8386_vm0, %v8387_v17  ;;  %6570 = vmatprep.mubr.msk.f32.mxu0 %vm8386_vm0, %v8387_v17  ;;  %v5661_v63 = vunpack.c.l.bf16 %v5684_v62  ;;  %v5662_v0 = vunpack.c.h.bf16 %v5684_v62 }
 0x166   :  { %7740 = vmatpush3.bf16.msra.mxu1 %v7739_v10 }
 0x167   :  { %7741 = vmatprep.subr.bf16.mxu1 %v8385_v16 }
 0x168   :  { %6438 = vmatmul.mubr.f32.gmra.mrb[10].mxu1 %v377_v3  ;;  %6571 = vmatmul.mubr.f32.gmra.mrb[42].mxu0 %v832_v4  ;;  %v1016_v3 = vunpack.c.l.bf16 %v5411_v2  ;;  %v5412_v4 = vld [vmem:[%s10163_s5 + $0x80] sm:$0xff]  ;;  %v5424_v2 = vld [vmem:[%s10163_s5 + $0xb0] sm:$0xff] }
 0x169   :  { %6448 = vmatprep.mubr.msk.f32.mxu1 %vm8386_vm0, %v8387_v17  ;;  %6639 = vmatprep.mubr.msk.f32.mxu0 %vm8386_vm0, %v8387_v17  ;;  %v7832_v7 = vpack.c.bf16 %v5413_v5, %v5412_v4  ;;  %v5425_v4 = vld [vmem:[%s10163_s5 + $0xb8] sm:$0xff] }
 0x16a   :  { %v7865_v5 = vpack.c.bf16 %v5425_v4, %v5424_v2  ;;  %v5445_v2 = vld [vmem:[%s10163_s5 + $0xf8] sm:$0xff] }
 0x16b   :  { %7833 = vmatpush3.bf16.msra.mxu0 %v7832_v7 }
 0x16c   :  { %7834 = vmatprep.subr.bf16.mxu0 %v8385_v16 }
 0x16f   :  { %7836 = vmatpush3.bf16.msra.mxu0 %v7835_v9 }
 0x170   :  { %7837 = vmatprep.subr.bf16.mxu0 %v8385_v16 }
 0x213   :  { %v353_v11 = vpop.f32.mrb[0].mxu1  ;;  %v715_v13 = vpop.f32.mrb[32].mxu0 }
 0x214   :  { %v6392_v14 = vpop.f32.mrb[1].mxu1  ;;  %v6508_v15 = vpop.f32.mrb[33].mxu0 }
 0x217   :  { %v358_v18 = vpop.f32.mrb[2].mxu1  ;;  %v720_v19 = vpop.f32.mrb[34].mxu0 }
 0x218   :  { %v6395_v20 = vpop.f32.mrb[3].mxu1  ;;  %v6511_v22 = vpop.f32.mrb[35].mxu0 }
 0x21b   :  { %v363_v23 = vpop.f32.mrb[4].mxu1  ;;  %v725_v24 = vpop.f32.mrb[36].mxu0 }
 0x21c   :  { %v6398_v25 = vpop.f32.mrb[5].mxu1  ;;  %v6514_v27 = vpop.f32.mrb[37].mxu0 }
 0x233   :  { %v444_v34 = vpop.f32.mrb[6].mxu1  ;;  %v899_v35 = vpop.f32.mrb[38].mxu0 }
 0x234   :  { %v6433_v36 = vpop.f32.mrb[7].mxu1  ;;  %6449 = vmatmul.mubr.msk.f32.vlgmr.msra.gmra.mrb[12].mxu1 %vm463_vm1, %v444_v34  ;;  %v6566_v37 = vpop.f32.mrb[39].mxu0 }
 0x235   :  { %6451 = vmatprep.mubr.msk.f32.mxu1 %vm8386_vm0, %v8387_v17  ;;  %7743 = vmatpush3.bf16.msra.mxu1 %v7742_v30 }
 0x236   :  { %7744 = vmatprep.subr.bf16.mxu1 %v8385_v16 }
 0x237   :  { %v449_v40 = vpop.f32.mrb[8].mxu1  ;;  %v904_v41 = vpop.f32.mrb[40].mxu0 }
 0x238   :  { %v6436_v42 = vpop.f32.mrb[9].mxu1  ;;  %6452 = vmatmul.mubr.msk.f32.gmra.mrb[14].mxu1 %vm463_vm1, %v449_v40  ;;  %v6569_v44 = vpop.f32.mrb[41].mxu0 }
 0x239   :  { %6454 = vmatprep.mubr.msk.f32.mxu1 %vm8386_vm0, %v8387_v17  ;;  %7746 = vmatpush3.bf16.msra.mxu1 %v7745_v39 }
 0x23a   :  { %7771 = vmatprep.subr.bf16.mxu1 %v8385_v16 }
 0x23b   :  { %v454_v47 = vpop.f32.mrb[10].mxu1  ;;  %v909_v48 = vpop.f32.mrb[42].mxu0 }
 0x23c   :  { %v6439_v50 = vpop.f32.mrb[11].mxu1  ;;  %6455 = vmatmul.mubr.msk.f32.gmra.mrb[16].mxu1 %vm463_vm1, %v454_v47  ;;  %v6572_v51 = vpop.f32.mrb[43].mxu0 }
 0x23d   :  { %6465 = vmatprep.mubr.msk.f32.mxu1 %vm8386_vm0, %v8387_v17 }
 0x240   :  { %6466 = vmatmul.mubr.msk.f32.vlgmr.msra.gmra.mrb[18].mxu1 %vm463_vm1, %v353_v11 }
 0x241   :  { %6468 = vmatprep.mubr.msk.f32.mxu1 %vm8386_vm0, %v8387_v17  ;;  %7773 = vmatpush3.bf16.msra.mxu1 %v7772_v21 }
 0x242   :  { %7774 = vmatprep.subr.bf16.mxu1 %v8385_v16 }
 0x244   :  { %6469 = vmatmul.mubr.msk.f32.gmra.mrb[20].mxu1 %vm463_vm1, %v358_v18 }
 0x245   :  { %6471 = vmatprep.mubr.msk.f32.mxu1 %vm8386_vm0, %v8387_v17  ;;  %7776 = vmatpush3.bf16.msra.mxu1 %v7775_v55 }
 0x246   :  { %7801 = vmatprep.subr.bf16.mxu1 %v8385_v16 }
 0x248   :  { %6472 = vmatmul.mubr.msk.f32.gmra.mrb[22].mxu1 %vm463_vm1, %v363_v23 }
 0x249   :  { %6523 = vmatprep.mubr.msk.f32.mxu1 %vm8386_vm0, %v8387_v17 }
 0x24c   :  { %6524 = vmatmul.mubr.msk.f32.vlgmr.msra.gmra.mrb[24].mxu1 %vm463_vm1, %v715_v13 }
 0x24d   :  { %6526 = vmatprep.mubr.msk.f32.mxu1 %vm8386_vm0, %v8387_v17  ;;  %7803 = vmatpush3.bf16.msra.mxu1 %v7802_v58  ;;  %v5419_v58 = vld [vmem:[%s10162_s1 + $0x3c] sm:$0xff]  }
 0x24e   :  { %7804 = vmatprep.subr.bf16.mxu1 %v8385_v16  ;;  %v1198_v59 = vunpack.c.l.bf16 %v5419_v58  ;;  %v1199_v60 = vunpack.c.h.bf16 %v5419_v58 }
 0x250   :  { %6527 = vmatmul.mubr.msk.f32.gmra.mrb[26].mxu1 %vm463_vm1, %v720_v19 }
 0x251   :  { %6529 = vmatprep.mubr.msk.f32.mxu1 %vm8386_vm0, %v8387_v17  ;;  %7806 = vmatpush3.bf16.msra.mxu1 %v7805_v61  ;;  %v5421_v61 = vld [vmem:[%s10162_s1 + $0x44] sm:$0x1] }
 0x252   :  { %7807 = vmatprep.subr.bf16.mxu1 %v8385_v16  ;;  %v1200_v62 = vunpack.c.l.bf16 %v5421_v61  ;;  %v5442_v61 = vld [vmem:[%s10163_s5 + $0xe0] sm:$0xff] }
 0x254   :  { %6530 = vmatmul.mubr.msk.f32.gmra.mrb[28].mxu1 %vm463_vm1, %v725_v24 }
 0x255   :  { %6581 = vmatprep.mubr.msk.f32.mxu1 %vm8386_vm0, %v8387_v17 }
 0x258   :  { %6582 = vmatmul.mubr.msk.f32.vlgmr.msra.gmra.mrb[30].mxu1 %vm463_vm1, %v899_v35 }
 0x259   :  { %7809 = vmatpush3.bf16.msra.mxu1 %v8673_v32  ;;  %6584 = vmatprep.mubr.msk.f32.mxu1 %vm8386_vm0, %v8387_v17 }
 0x25a   :  { %7810 = vmatprep.subr.bf16.mxu1 %v8385_v16 }
 0x25c   :  { %6585 = vmatmul.mubr.msk.f32.gmra.mrb[32].mxu1 %vm463_vm1, %v904_v41 }
 0x25d   :  { %7812 = vmatpush3.bf16.msra.mxu1 %v8681_v43  ;;  %6587 = vmatprep.mubr.msk.f32.mxu1 %vm8386_vm0, %v8387_v17 }
 0x25e   :  { %7813 = vmatprep.subr.bf16.mxu1 %v8385_v16 }
 0x260   :  { %6588 = vmatmul.mubr.msk.f32.gmra.mrb[34].mxu1 %vm463_vm1, %v909_v48 }
 0x261   :  { %7815 = vmatpush3.bf16.msra.mxu1 %v8689_v54  ;;  %6622 = vmatprep.mubr.msk.f32.mxu1 %vm8386_vm0, %v8387_v17 }
 0x262   :  { %7816 = vmatprep.subr.bf16.mxu1 %v8385_v16 }
 0x265   :  { %7818 = vmatpush3.bf16.msra.mxu1 %v8697_v1 }
 0x266   :  { %7819 = vmatprep.subr.bf16.mxu1 %v8385_v16 }
 0x269   :  { %7821 = vmatpush3.bf16.msra.mxu1 %v8705_v12 }
 0x26a   :  { %7822 = vmatprep.subr.bf16.mxu1 %v8385_v16 }
 0x26d   :  { %7824 = vmatpush3.bf16.msra.mxu1 %v8713_v26 }
 0x26e   :  { %7825 = vmatprep.subr.bf16.mxu1 %v8385_v16 }
 0x271   :  { %7827 = vmatpush3.bf16.msra.mxu1 %v8721_v38 }
 0x272   :  { %7828 = vmatprep.subr.bf16.mxu1 %v8385_v16 }
 0x275   :  { %7830 = vmatpush3.bf16.msra.mxu1 %v8735_v49 }
 0x276   :  { %7861 = vmatprep.subr.bf16.mxu1 %v8385_v16 }
 0x278   :  { %6623 = vmatmul.mubr.f32.vlgmr.msra.gmra.mrb[36].mxu1 %v5661_v63  ;;  %v5422_v63 = vld [vmem:[%s10163_s5 + $0xa0] sm:$0xff] }
 0x279   :  { %6625 = vmatprep.mubr.msk.f32.mxu1 %vm8386_vm0, %v8387_v17 }
 0x27c   :  { %6626 = vmatmul.mubr.f32.gmra.mrb[38].mxu1 %v5662_v0  ;;  %v5423_v0 = vld [vmem:[%s10163_s5 + $0xa8] sm:$0xff] }
 0x27d   :  { %6628 = vmatprep.mubr.msk.f32.mxu1 %vm8386_vm0, %v8387_v17 }
 0x280   :  { %6629 = vmatmul.mubr.f32.gmra.mrb[40].mxu1 %v1016_v3  ;;  %v7862_v3 = vpack.c.bf16 %v5423_v0, %v5422_v63  ;;  %v5444_v63 = vld [vmem:[%s10163_s5 + $0xf0] sm:$0xff] }
 0x281   :  { %6697 = vmatprep.mubr.msk.f32.mxu1 %vm8386_vm0, %v8387_v17 }
 0x282   :  { %7863 = vmatpush3.bf16.msra.mxu1 %v7862_v3  ;;  %v7925_v3 = vpack.c.bf16 %v5445_v2, %v5444_v63  ;;  %v5465_v63 = vld [vmem:[%s10163_s5 + $0x138] sm:$0xff] }
 0x283   :  { %7864 = vmatprep.subr.bf16.mxu1 %v8385_v16 }
 0x286   :  { %7866 = vmatpush3.bf16.msra.mxu1 %v7865_v5 }
 0x287   :  { %7867 = vmatprep.subr.bf16.mxu1 %v8385_v16 }
 0x307   :  { %v539_v10 = vpop.f32.mrb[12].mxu1 }
 0x308   :  { %v6450_v11 = vpop.f32.mrb[13].mxu1 }
 0x30b   :  { %v544_v13 = vpop.f32.mrb[14].mxu1 }
 0x30c   :  { %v6453_v14 = vpop.f32.mrb[15].mxu1 }
 0x30f   :  { %v549_v15 = vpop.f32.mrb[16].mxu1 }
 0x310   :  { %v6456_v18 = vpop.f32.mrb[17].mxu1 }
 0x313   :  { %v628_v19 = vpop.f32.mrb[18].mxu1 }
 0x314   :  { %v629_v20 = vadd.f32 %v628_v19, %v539_v10  ;;  %v6467_v22 = vpop.f32.mrb[19].mxu1 }
 0x317   :  { %v633_v23 = vpop.f32.mrb[20].mxu1 }
 0x318   :  { %v634_v24 = vadd.f32 %v633_v23, %v544_v13  ;;  %v6470_v25 = vpop.f32.mrb[21].mxu1 }
 0x319   :  { %v5685_v25 = vld [vmem:[%s10162_s1 + $0x48] sm:$0xff]  }
 0x31b   :  { %v638_v27 = vpop.f32.mrb[22].mxu1 }
 0x31c   :  { %v639_v28 = vadd.f32 %v638_v27, %v549_v15  ;;  %v6473_v29 = vpop.f32.mrb[23].mxu1  ;;  %v5665_v27 = vunpack.c.l.bf16 %v5685_v25 }
 0x31d   :  { %v5431_v29 = vld [vmem:[%s10162_s1 + $0x50] sm:$0x1] }
 0x31f   :  { %v809_v30 = vpop.f32.mrb[24].mxu1 }
 0x320   :  { %v823_v31 = vadd.f32 %v809_v30, %v629_v20  ;;  %v6525_v33 = vpop.f32.mrb[25].mxu1  ;;  %v1384_v30 = vunpack.c.l.bf16 %v5431_v29  ;;  %v5452_v29 = vld [vmem:[%s10163_s5 + $0x100] sm:$0xff] }
 0x321   :  { %v5433_v33 = vld [vmem:[%s10163_s5 + $0xc8] sm:$0xff] }
 0x323   :  { %v814_v34 = vpop.f32.mrb[26].mxu1 }
 0x324   :  { %v824_v35 = vadd.f32 %v814_v34, %v634_v24  ;;  %v6528_v36 = vpop.f32.mrb[27].mxu1  ;;  %v5434_v34 = vld [vmem:[%s10163_s5 + $0xd0] sm:$0xff] }
 0x325   :  { %v5435_v36 = vld [vmem:[%s10163_s5 + $0xd8] sm:$0xff] }
 0x327   :  { %v819_v37 = vpop.f32.mrb[28].mxu1 }
 0x328   :  { %v825_v39 = vadd.f32 %v819_v37, %v639_v28  ;;  %v6531_v40 = vpop.f32.mrb[29].mxu1  ;;  %v5666_v28 = vunpack.c.h.bf16 %v5685_v25  ;;  %v7895_v37 = vpack.c.bf16 %v5435_v36, %v5434_v34  ;;  %v5455_v34 = vld [vmem:[%s10163_s5 + $0x118] sm:$0xff] }
 0x32b   :  { %v993_v41 = vpop.f32.mrb[30].mxu1 }
 0x32c   :  { %v1007_v42 = vadd.f32 %v993_v41, %v823_v31  ;;  %v6583_v44 = vpop.f32.mrb[31].mxu1  ;;  %v5432_v31 = vld [vmem:[%s10163_s5 + $0xc0] sm:$0xff] }
 0x32f   :  { %v998_v45 = vpop.f32.mrb[32].mxu1 }
 0x330   :  { %v1008_v46 = vadd.f32 %v998_v45, %v824_v35  ;;  %v6586_v47 = vpop.f32.mrb[33].mxu1  ;;  %v7892_v35 = vpack.c.bf16 %v5433_v33, %v5432_v31  ;;  %v5454_v31 = vld [vmem:[%s10163_s5 + $0x110] sm:$0xff] }
 0x333   :  { %v1003_v48 = vpop.f32.mrb[34].mxu1 }
 0x334   :  { %v1009_v50 = vadd.f32 %v1003_v48, %v825_v39  ;;  %v6589_v51 = vpop.f32.mrb[35].mxu1 }
 0x34b   :  { %v1083_v21 = vpop.f32.mrb[36].mxu1 }
 0x34c   :  { %v6624_v52 = vpop.f32.mrb[37].mxu1  ;;  %6640 = vmatmul.mubr.msk.f32.vlgmr.msra.gmra.mrb[44].mxu0 %vm463_vm1, %v1083_v21 }
 0x34d   :  { %7839 = vmatpush3.bf16.msra.mxu0 %v8673_v32  ;;  %6642 = vmatprep.mubr.msk.f32.mxu0 %vm8386_vm0, %v8387_v17 }
 0x34e   :  { %7840 = vmatprep.subr.bf16.mxu0 %v8385_v16 }
 0x34f   :  { %v1088_v53 = vpop.f32.mrb[38].mxu1 }
 0x350   :  { %6643 = vmatmul.mubr.msk.f32.gmra.mrb[46].mxu0 %vm463_vm1, %v1088_v53  ;;  %v6627_v55 = vpop.f32.mrb[39].mxu1 }
 0x351   :  { %7842 = vmatpush3.bf16.msra.mxu0 %v8681_v43  ;;  %6645 = vmatprep.mubr.msk.f32.mxu0 %vm8386_vm0, %v8387_v17 }
 0x352   :  { %7843 = vmatprep.subr.bf16.mxu0 %v8385_v16 }
 0x353   :  { %v1093_v56 = vpop.f32.mrb[40].mxu1 }
 0x354   :  { %6646 = vmatmul.mubr.msk.f32.gmra.mrb[48].mxu0 %vm463_vm1, %v1093_v56  ;;  %v6630_v57 = vpop.f32.mrb[41].mxu1  ;;  %v5439_v56 = vld [vmem:[%s10162_s1 + $0x54] sm:$0xff]  }
 0x355   :  { %7845 = vmatpush3.bf16.msra.mxu0 %v8689_v54  ;;  %6680 = vmatprep.mubr.msk.f32.mxu0 %vm8386_vm0, %v8387_v17  ;;  %v1566_v57 = vunpack.c.l.bf16 %v5439_v56  ;;  %v1567_v58 = vunpack.c.h.bf16 %v5439_v56 }
 0x356   :  { %7846 = vmatprep.subr.bf16.mxu0 %v8385_v16 }
 0x359   :  { %7848 = vmatpush3.bf16.msra.mxu0 %v8697_v1 }
 0x35a   :  { %7849 = vmatprep.subr.bf16.mxu0 %v8385_v16 }
 0x35d   :  { %7851 = vmatpush3.bf16.msra.mxu0 %v8705_v12 }
 0x35e   :  { %7852 = vmatprep.subr.bf16.mxu0 %v8385_v16 }
 0x361   :  { %7854 = vmatpush3.bf16.msra.mxu0 %v8713_v26 }
 0x362   :  { %7855 = vmatprep.subr.bf16.mxu0 %v8385_v16 }
 0x365   :  { %7857 = vmatpush3.bf16.msra.mxu0 %v8721_v38 }
 0x366   :  { %7858 = vmatprep.subr.bf16.mxu0 %v8385_v16 }
 0x369   :  { %7860 = vmatpush3.bf16.msra.mxu0 %v8735_v49 }
 0x36a   :  { %7891 = vmatprep.subr.bf16.mxu0 %v8385_v16 }
 0x36c   :  { %6681 = vmatmul.mubr.f32.vlgmr.msra.gmra.mrb[50].mxu0 %v1198_v59  ;;  %v5441_v59 = vld [vmem:[%s10162_s1 + $0x5c] sm:$0x1] }
 0x36d   :  { %6683 = vmatprep.mubr.msk.f32.mxu0 %vm8386_vm0, %v8387_v17  ;;  %7893 = vmatpush3.bf16.msra.mxu0 %v7892_v35  ;;  %v7955_v35 = vpack.c.bf16 %v5455_v34, %v5454_v31  ;;  %v5475_v31 = vld [vmem:[%s10163_s5 + $0x158] sm:$0xff] }
 0x36e   :  { %7894 = vmatprep.subr.bf16.mxu0 %v8385_v16 }
 0x370   :  { %6684 = vmatmul.mubr.f32.gmra.mrb[52].mxu0 %v1199_v60  ;;  %v1568_v60 = vunpack.c.l.bf16 %v5441_v59  ;;  %v5462_v59 = vld [vmem:[%s10163_s5 + $0x120] sm:$0xff] }
 0x371   :  { %6686 = vmatprep.mubr.msk.f32.mxu0 %vm8386_vm0, %v8387_v17  ;;  %7896 = vmatpush3.bf16.msra.mxu0 %v7895_v37 }
 0x372   :  { %7897 = vmatprep.subr.bf16.mxu0 %v8385_v16 }
 0x374   :  { %6687 = vmatmul.mubr.f32.gmra.mrb[54].mxu0 %v1200_v62  ;;  %v5443_v62 = vld [vmem:[%s10163_s5 + $0xe8] sm:$0xff] }
 0x375   :  { %6755 = vmatprep.mubr.msk.f32.mxu0 %vm8386_vm0, %v8387_v17  ;;  %v7922_v0 = vpack.c.bf16 %v5443_v62, %v5442_v61  ;;  %v5464_v61 = vld [vmem:[%s10163_s5 + $0x130] sm:$0xff] }
 0x41f   :  { %v1177_v6 = vpop.f32.mrb[44].mxu0 }
 0x420   :  { %v1191_v7 = vadd.f32 %v1177_v6, %v1007_v42  ;;  %v6641_v8 = vpop.f32.mrb[45].mxu0 }
 0x423   :  { %v1182_v9 = vpop.f32.mrb[46].mxu0 }
 0x424   :  { %v1192_v10 = vadd.f32 %v1182_v9, %v1008_v46  ;;  %v6644_v11 = vpop.f32.mrb[47].mxu0 }
 0x427   :  { %v1187_v13 = vpop.f32.mrb[48].mxu0 }
 0x428   :  { %v1193_v14 = vadd.f32 %v1187_v13, %v1009_v50  ;;  %v6647_v15 = vpop.f32.mrb[49].mxu0 }
 0x43f   :  { %v1267_v18 = vpop.f32.mrb[50].mxu0 }
 0x440   :  { %v6682_v19 = vpop.f32.mrb[51].mxu0  ;;  %6698 = vmatmul.mubr.msk.f32.vlgmr.msra.gmra.mrb[42].mxu1 %vm463_vm1, %v1267_v18 }
 0x441   :  { %7869 = vmatpush3.bf16.msra.mxu1 %v8673_v32  ;;  %6700 = vmatprep.mubr.msk.f32.mxu1 %vm8386_vm0, %v8387_v17 }
 0x442   :  { %7870 = vmatprep.subr.bf16.mxu1 %v8385_v16 }
 0x443   :  { %v1272_v20 = vpop.f32.mrb[52].mxu0 }
 0x444   :  { %6701 = vmatmul.mubr.msk.f32.gmra.mrb[44].mxu1 %vm463_vm1, %v1272_v20  ;;  %v6685_v22 = vpop.f32.mrb[53].mxu0 }
 0x445   :  { %7872 = vmatpush3.bf16.msra.mxu1 %v8681_v43  ;;  %6703 = vmatprep.mubr.msk.f32.mxu1 %vm8386_vm0, %v8387_v17 }
 0x446   :  { %7873 = vmatprep.subr.bf16.mxu1 %v8385_v16 }
 0x447   :  { %v1277_v23 = vpop.f32.mrb[54].mxu0 }
 0x448   :  { %6704 = vmatmul.mubr.msk.f32.gmra.mrb[46].mxu1 %vm463_vm1, %v1277_v23  ;;  %v6688_v24 = vpop.f32.mrb[55].mxu0  ;;  %v5686_v23 = vld [vmem:[%s10162_s1 + $0x60] sm:$0xff]  }
 0x449   :  { %7875 = vmatpush3.bf16.msra.mxu1 %v8689_v54  ;;  %6738 = vmatprep.mubr.msk.f32.mxu1 %vm8386_vm0, %v8387_v17  ;;  %v5669_v24 = vunpack.c.l.bf16 %v5686_v23  ;;  %v5670_v25 = vunpack.c.h.bf16 %v5686_v23 }
 0x44a   :  { %7876 = vmatprep.subr.bf16.mxu1 %v8385_v16 }
 0x44d   :  { %7878 = vmatpush3.bf16.msra.mxu1 %v8697_v1 }
 0x44e   :  { %7879 = vmatprep.subr.bf16.mxu1 %v8385_v16 }
 0x451   :  { %7881 = vmatpush3.bf16.msra.mxu1 %v8705_v12 }
 0x452   :  { %7882 = vmatprep.subr.bf16.mxu1 %v8385_v16 }
 0x455   :  { %7884 = vmatpush3.bf16.msra.mxu1 %v8713_v26 }
 0x456   :  { %7885 = vmatprep.subr.bf16.mxu1 %v8385_v16 }
 0x459   :  { %7887 = vmatpush3.bf16.msra.mxu1 %v8721_v38 }
 0x45a   :  { %7888 = vmatprep.subr.bf16.mxu1 %v8385_v16 }
 0x45d   :  { %7890 = vmatpush3.bf16.msra.mxu1 %v8735_v49 }
 0x45e   :  { %7921 = vmatprep.subr.bf16.mxu1 %v8385_v16 }
 0x460   :  { %6739 = vmatmul.mubr.f32.vlgmr.msra.gmra.mrb[48].mxu1 %v5665_v27  ;;  %v5451_v27 = vld [vmem:[%s10162_s1 + $0x68] sm:$0x1] }
 0x461   :  { %6741 = vmatprep.mubr.msk.f32.mxu1 %vm8386_vm0, %v8387_v17  ;;  %7923 = vmatpush3.bf16.msra.mxu1 %v7922_v0  ;;  %v7985_v0 = vpack.c.bf16 %v5465_v63, %v5464_v61  ;;  %v5485_v61 = vld [vmem:[%s10163_s5 + $0x178] sm:$0xff] }
 0x462   :  { %7924 = vmatprep.subr.bf16.mxu1 %v8385_v16 }
 0x464   :  { %6742 = vmatmul.mubr.f32.gmra.mrb[50].mxu1 %v5666_v28  ;;  %v1752_v28 = vunpack.c.l.bf16 %v5451_v27  ;;  %v5472_v27 = vld [vmem:[%s10163_s5 + $0x140] sm:$0xff] }
 0x465   :  { %6744 = vmatprep.mubr.msk.f32.mxu1 %vm8386_vm0, %v8387_v17  ;;  %7926 = vmatpush3.bf16.msra.mxu1 %v7925_v3 }
 0x466   :  { %7927 = vmatprep.subr.bf16.mxu1 %v8385_v16 }
 0x468   :  { %6745 = vmatmul.mubr.f32.gmra.mrb[52].mxu1 %v1384_v30  ;;  %v5453_v30 = vld [vmem:[%s10163_s5 + $0x108] sm:$0xff] }
 0x469   :  { %6813 = vmatprep.mubr.msk.f32.mxu1 %vm8386_vm0, %v8387_v17  ;;  %v7952_v33 = vpack.c.bf16 %v5453_v30, %v5452_v29  ;;  %v5474_v29 = vld [vmem:[%s10163_s5 + $0x150] sm:$0xff] }
 0x513   :  { %v1361_v39 = vpop.f32.mrb[42].mxu1 }
 0x514   :  { %v1375_v40 = vadd.f32 %v1361_v39, %v1191_v7  ;;  %v6699_v41 = vpop.f32.mrb[43].mxu1 }
 0x517   :  { %v1366_v42 = vpop.f32.mrb[44].mxu1 }
 0x518   :  { %v1376_v44 = vadd.f32 %v1366_v42, %v1192_v10  ;;  %v6702_v45 = vpop.f32.mrb[45].mxu1 }
 0x51b   :  { %v1371_v46 = vpop.f32.mrb[46].mxu1 }
 0x51c   :  { %v1377_v47 = vadd.f32 %v1371_v46, %v1193_v14  ;;  %v6705_v48 = vpop.f32.mrb[47].mxu1 }
 0x533   :  { %v1451_v50 = vpop.f32.mrb[48].mxu1 }
 0x534   :  { %v6740_v51 = vpop.f32.mrb[49].mxu1  ;;  %6756 = vmatmul.mubr.msk.f32.vlgmr.msra.gmra.mrb[56].mxu0 %vm463_vm1, %v1451_v50 }
 0x535   :  { %7899 = vmatpush3.bf16.msra.mxu0 %v8673_v32  ;;  %6758 = vmatprep.mubr.msk.f32.mxu0 %vm8386_vm0, %v8387_v17 }
 0x536   :  { %7900 = vmatprep.subr.bf16.mxu0 %v8385_v16 }
 0x537   :  { %v1456_v21 = vpop.f32.mrb[50].mxu1 }
 0x538   :  { %6759 = vmatmul.mubr.msk.f32.gmra.mrb[58].mxu0 %vm463_vm1, %v1456_v21  ;;  %v6743_v52 = vpop.f32.mrb[51].mxu1 }
 0x539   :  { %7902 = vmatpush3.bf16.msra.mxu0 %v8681_v43  ;;  %6761 = vmatprep.mubr.msk.f32.mxu0 %vm8386_vm0, %v8387_v17 }
 0x53a   :  { %7903 = vmatprep.subr.bf16.mxu0 %v8385_v16 }
 0x53b   :  { %v1461_v53 = vpop.f32.mrb[52].mxu1 }
 0x53c   :  { %6762 = vmatmul.mubr.msk.f32.gmra.mrb[60].mxu0 %vm463_vm1, %v1461_v53  ;;  %v6746_v55 = vpop.f32.mrb[53].mxu1  ;;  %v5459_v53 = vld [vmem:[%s10162_s1 + $0x6c] sm:$0xff]  }
 0x53d   :  { %7905 = vmatpush3.bf16.msra.mxu0 %v8689_v54  ;;  %6796 = vmatprep.mubr.msk.f32.mxu0 %vm8386_vm0, %v8387_v17  ;;  %v1934_v55 = vunpack.c.l.bf16 %v5459_v53  ;;  %v1935_v56 = vunpack.c.h.bf16 %v5459_v53 }
 0x53e   :  { %7906 = vmatprep.subr.bf16.mxu0 %v8385_v16 }
 0x541   :  { %7908 = vmatpush3.bf16.msra.mxu0 %v8697_v1 }
 0x542   :  { %7909 = vmatprep.subr.bf16.mxu0 %v8385_v16 }
 0x545   :  { %7911 = vmatpush3.bf16.msra.mxu0 %v8705_v12 }
 0x546   :  { %7912 = vmatprep.subr.bf16.mxu0 %v8385_v16 }
 0x549   :  { %7914 = vmatpush3.bf16.msra.mxu0 %v8713_v26 }
 0x54a   :  { %7915 = vmatprep.subr.bf16.mxu0 %v8385_v16 }
 0x54d   :  { %7917 = vmatpush3.bf16.msra.mxu0 %v8721_v38 }
 0x54e   :  { %7918 = vmatprep.subr.bf16.mxu0 %v8385_v16 }
 0x551   :  { %7920 = vmatpush3.bf16.msra.mxu0 %v8735_v49 }
 0x552   :  { %7951 = vmatprep.subr.bf16.mxu0 %v8385_v16 }
 0x554   :  { %6797 = vmatmul.mubr.f32.vlgmr.msra.gmra.mrb[62].mxu0 %v1566_v57  ;;  %v5461_v57 = vld [vmem:[%s10162_s1 + $0x74] sm:$0x1] }
 0x555   :  { %6799 = vmatprep.mubr.msk.f32.mxu0 %vm8386_vm0, %v8387_v17  ;;  %7953 = vmatpush3.bf16.msra.mxu0 %v7952_v33  ;;  %v8015_v33 = vpack.c.bf16 %v5475_v31, %v5474_v29  ;;  %v5495_v29 = vld [vmem:[%s10163_s5 + $0x198] sm:$0xff] }
 0x556   :  { %7954 = vmatprep.subr.bf16.mxu0 %v8385_v16 }
 0x558   :  { %6800 = vmatmul.mubr.f32.gmra.mrb[64].mxu0 %v1567_v58  ;;  %v1936_v58 = vunpack.c.l.bf16 %v5461_v57  ;;  %v5482_v57 = vld [vmem:[%s10163_s5 + $0x160] sm:$0xff] }
 0x559   :  { %6802 = vmatprep.mubr.msk.f32.mxu0 %vm8386_vm0, %v8387_v17  ;;  %7956 = vmatpush3.bf16.msra.mxu0 %v7955_v35 }
 0x55a   :  { %7957 = vmatprep.subr.bf16.mxu0 %v8385_v16 }
 0x55c   :  { %6803 = vmatmul.mubr.f32.gmra.mrb[66].mxu0 %v1568_v60  ;;  %v5463_v60 = vld [vmem:[%s10163_s5 + $0x128] sm:$0xff] }
 0x55d   :  { %6871 = vmatprep.mubr.msk.f32.mxu0 %vm8386_vm0, %v8387_v17  ;;  %v7982_v62 = vpack.c.bf16 %v5463_v60, %v5462_v59  ;;  %v5484_v59 = vld [vmem:[%s10163_s5 + $0x170] sm:$0xff] }
 0x607   :  { %v1545_v4 = vpop.f32.mrb[56].mxu0 }
 0x608   :  { %v1559_v5 = vadd.f32 %v1545_v4, %v1375_v40  ;;  %v6757_v6 = vpop.f32.mrb[57].mxu0 }
 0x60b   :  { %v1550_v7 = vpop.f32.mrb[58].mxu0 }
 0x60c   :  { %v1560_v8 = vadd.f32 %v1550_v7, %v1376_v44  ;;  %v6760_v9 = vpop.f32.mrb[59].mxu0 }
 0x60f   :  { %v1555_v10 = vpop.f32.mrb[60].mxu0 }
 0x610   :  { %v1561_v11 = vadd.f32 %v1555_v10, %v1377_v47  ;;  %v6763_v13 = vpop.f32.mrb[61].mxu0 }
 0x627   :  { %v1635_v14 = vpop.f32.mrb[62].mxu0 }
 0x628   :  { %v6798_v15 = vpop.f32.mrb[63].mxu0  ;;  %6814 = vmatmul.mubr.msk.f32.vlgmr.msra.gmra.mrb[54].mxu1 %vm463_vm1, %v1635_v14 }
 0x629   :  { %7929 = vmatpush3.bf16.msra.mxu1 %v8673_v32  ;;  %6816 = vmatprep.mubr.msk.f32.mxu1 %vm8386_vm0, %v8387_v17 }
 0x62a   :  { %7930 = vmatprep.subr.bf16.mxu1 %v8385_v16 }
 0x62b   :  { %v1640_v18 = vpop.f32.mrb[64].mxu0 }
 0x62c   :  { %6817 = vmatmul.mubr.msk.f32.gmra.mrb[56].mxu1 %vm463_vm1, %v1640_v18  ;;  %v6801_v19 = vpop.f32.mrb[65].mxu0 }
 0x62d   :  { %7932 = vmatpush3.bf16.msra.mxu1 %v8681_v43  ;;  %6819 = vmatprep.mubr.msk.f32.mxu1 %vm8386_vm0, %v8387_v17 }
 0x62e   :  { %7933 = vmatprep.subr.bf16.mxu1 %v8385_v16 }
 0x62f   :  { %v1645_v20 = vpop.f32.mrb[66].mxu0 }
 0x630   :  { %6820 = vmatmul.mubr.msk.f32.gmra.mrb[58].mxu1 %vm463_vm1, %v1645_v20  ;;  %v6804_v22 = vpop.f32.mrb[67].mxu0  ;;  %v5687_v20 = vld [vmem:[%s10162_s1 + $0x78] sm:$0xff]  }
 0x631   :  { %7935 = vmatpush3.bf16.msra.mxu1 %v8689_v54  ;;  %6854 = vmatprep.mubr.msk.f32.mxu1 %vm8386_vm0, %v8387_v17  ;;  %v5673_v22 = vunpack.c.l.bf16 %v5687_v20  ;;  %v5674_v23 = vunpack.c.h.bf16 %v5687_v20 }
 0x632   :  { %7936 = vmatprep.subr.bf16.mxu1 %v8385_v16 }
 0x635   :  { %7938 = vmatpush3.bf16.msra.mxu1 %v8697_v1 }
 0x636   :  { %7939 = vmatprep.subr.bf16.mxu1 %v8385_v16 }
 0x639   :  { %7941 = vmatpush3.bf16.msra.mxu1 %v8705_v12 }
 0x63a   :  { %7942 = vmatprep.subr.bf16.mxu1 %v8385_v16 }
 0x63d   :  { %7944 = vmatpush3.bf16.msra.mxu1 %v8713_v26 }
 0x63e   :  { %7945 = vmatprep.subr.bf16.mxu1 %v8385_v16 }
 0x641   :  { %7947 = vmatpush3.bf16.msra.mxu1 %v8721_v38 }
 0x642   :  { %7948 = vmatprep.subr.bf16.mxu1 %v8385_v16 }
 0x645   :  { %7950 = vmatpush3.bf16.msra.mxu1 %v8735_v49 }
 0x646   :  { %7981 = vmatprep.subr.bf16.mxu1 %v8385_v16 }
 0x648   :  { %6855 = vmatmul.mubr.f32.vlgmr.msra.gmra.mrb[60].mxu1 %v5669_v24  ;;  %v5471_v24 = vld [vmem:[%s10162_s1 + $0x80] sm:$0x1] }
 0x649   :  { %6857 = vmatprep.mubr.msk.f32.mxu1 %vm8386_vm0, %v8387_v17  ;;  %7983 = vmatpush3.bf16.msra.mxu1 %v7982_v62  ;;  %v8045_v62 = vpack.c.bf16 %v5485_v61, %v5484_v59  ;;  %v5505_v59 = vld [vmem:[%s10163_s5 + $0x1b8] sm:$0xff] }
 0x64a   :  { %7984 = vmatprep.subr.bf16.mxu1 %v8385_v16 }
 0x64c   :  { %6858 = vmatmul.mubr.f32.gmra.mrb[62].mxu1 %v5670_v25  ;;  %v2120_v25 = vunpack.c.l.bf16 %v5471_v24  ;;  %v5492_v24 = vld [vmem:[%s10163_s5 + $0x180] sm:$0xff] }
 0x64d   :  { %6860 = vmatprep.mubr.msk.f32.mxu1 %vm8386_vm0, %v8387_v17  ;;  %7986 = vmatpush3.bf16.msra.mxu1 %v7985_v0 }
 0x64e   :  { %7987 = vmatprep.subr.bf16.mxu1 %v8385_v16 }
 0x650   :  { %6861 = vmatmul.mubr.f32.gmra.mrb[64].mxu1 %v1752_v28  ;;  %v5473_v28 = vld [vmem:[%s10163_s5 + $0x148] sm:$0xff] }
 0x651   :  { %6929 = vmatprep.mubr.msk.f32.mxu1 %vm8386_vm0, %v8387_v17  ;;  %v8012_v30 = vpack.c.bf16 %v5473_v28, %v5472_v27  ;;  %v5494_v27 = vld [vmem:[%s10163_s5 + $0x190] sm:$0xff] }
 0x6fb   :  { %v1729_v36 = vpop.f32.mrb[54].mxu1 }
 0x6fc   :  { %v1743_v37 = vadd.f32 %v1729_v36, %v1559_v5  ;;  %v6815_v39 = vpop.f32.mrb[55].mxu1 }
 0x6ff   :  { %v1734_v40 = vpop.f32.mrb[56].mxu1 }
 0x700   :  { %v1744_v41 = vadd.f32 %v1734_v40, %v1560_v8  ;;  %v6818_v42 = vpop.f32.mrb[57].mxu1 }
 0x703   :  { %v1739_v44 = vpop.f32.mrb[58].mxu1 }
 0x704   :  { %v1745_v45 = vadd.f32 %v1739_v44, %v1561_v11  ;;  %v6821_v46 = vpop.f32.mrb[59].mxu1 }
 0x71b   :  { %v1819_v47 = vpop.f32.mrb[60].mxu1 }
 0x71c   :  { %v6856_v48 = vpop.f32.mrb[61].mxu1  ;;  %6872 = vmatmul.mubr.msk.f32.vlgmr.msra.gmra.mrb[68].mxu0 %vm463_vm1, %v1819_v47 }
 0x71d   :  { %7959 = vmatpush3.bf16.msra.mxu0 %v8673_v32  ;;  %6874 = vmatprep.mubr.msk.f32.mxu0 %vm8386_vm0, %v8387_v17 }
 0x71e   :  { %7960 = vmatprep.subr.bf16.mxu0 %v8385_v16 }
 0x71f   :  { %v1824_v50 = vpop.f32.mrb[62].mxu1 }
 0x720   :  { %6875 = vmatmul.mubr.msk.f32.gmra.mrb[70].mxu0 %vm463_vm1, %v1824_v50  ;;  %v6859_v51 = vpop.f32.mrb[63].mxu1 }
 0x721   :  { %7962 = vmatpush3.bf16.msra.mxu0 %v8681_v43  ;;  %6877 = vmatprep.mubr.msk.f32.mxu0 %vm8386_vm0, %v8387_v17 }
 0x722   :  { %7963 = vmatprep.subr.bf16.mxu0 %v8385_v16 }
 0x723   :  { %v1829_v21 = vpop.f32.mrb[64].mxu1 }
 0x724   :  { %6878 = vmatmul.mubr.msk.f32.gmra.mrb[72].mxu0 %vm463_vm1, %v1829_v21  ;;  %v6862_v52 = vpop.f32.mrb[65].mxu1  ;;  %v5479_v21 = vld [vmem:[%s10162_s1 + $0x84] sm:$0xff]  }
 0x725   :  { %7965 = vmatpush3.bf16.msra.mxu0 %v8689_v54  ;;  %6912 = vmatprep.mubr.msk.f32.mxu0 %vm8386_vm0, %v8387_v17  ;;  %v2302_v52 = vunpack.c.l.bf16 %v5479_v21  ;;  %v2303_v53 = vunpack.c.h.bf16 %v5479_v21 }
 0x726   :  { %7966 = vmatprep.subr.bf16.mxu0 %v8385_v16 }
 0x729   :  { %7968 = vmatpush3.bf16.msra.mxu0 %v8697_v1 }
 0x72a   :  { %7969 = vmatprep.subr.bf16.mxu0 %v8385_v16 }
 0x72d   :  { %7971 = vmatpush3.bf16.msra.mxu0 %v8705_v12 }
 0x72e   :  { %7972 = vmatprep.subr.bf16.mxu0 %v8385_v16 }
 0x731   :  { %7974 = vmatpush3.bf16.msra.mxu0 %v8713_v26 }
 0x732   :  { %7975 = vmatprep.subr.bf16.mxu0 %v8385_v16 }
 0x735   :  { %7977 = vmatpush3.bf16.msra.mxu0 %v8721_v38 }
 0x736   :  { %7978 = vmatprep.subr.bf16.mxu0 %v8385_v16 }
 0x739   :  { %7980 = vmatpush3.bf16.msra.mxu0 %v8735_v49 }
 0x73a   :  { %8011 = vmatprep.subr.bf16.mxu0 %v8385_v16 }
 0x73c   :  { %6913 = vmatmul.mubr.f32.vlgmr.msra.gmra.mrb[74].mxu0 %v1934_v55  ;;  %v5481_v55 = vld [vmem:[%s10162_s1 + $0x8c] sm:$0x1] }
 0x73d   :  { %6915 = vmatprep.mubr.msk.f32.mxu0 %vm8386_vm0, %v8387_v17  ;;  %8013 = vmatpush3.bf16.msra.mxu0 %v8012_v30  ;;  %v8075_v30 = vpack.c.bf16 %v5495_v29, %v5494_v27  ;;  %v5515_v27 = vld [vmem:[%s10163_s5 + $0x1d8] sm:$0xff] }
 0x73e   :  { %8014 = vmatprep.subr.bf16.mxu0 %v8385_v16 }
 0x740   :  { %6916 = vmatmul.mubr.f32.gmra.mrb[76].mxu0 %v1935_v56  ;;  %v2304_v56 = vunpack.c.l.bf16 %v5481_v55  ;;  %v5502_v55 = vld [vmem:[%s10163_s5 + $0x1a0] sm:$0xff] }
 0x741   :  { %6918 = vmatprep.mubr.msk.f32.mxu0 %vm8386_vm0, %v8387_v17  ;;  %8016 = vmatpush3.bf16.msra.mxu0 %v8015_v33 }
 0x742   :  { %8017 = vmatprep.subr.bf16.mxu0 %v8385_v16 }
 0x744   :  { %6919 = vmatmul.mubr.f32.gmra.mrb[78].mxu0 %v1936_v58  ;;  %v5483_v58 = vld [vmem:[%s10163_s5 + $0x168] sm:$0xff] }
 0x745   :  { %6987 = vmatprep.mubr.msk.f32.mxu0 %vm8386_vm0, %v8387_v17  ;;  %v8042_v60 = vpack.c.bf16 %v5483_v58, %v5482_v57  ;;  %v5504_v57 = vld [vmem:[%s10163_s5 + $0x1b0] sm:$0xff] }
 0x7ef   :  { %v1913_v2 = vpop.f32.mrb[68].mxu0 }
 0x7f0   :  { %v1927_v3 = vadd.f32 %v1913_v2, %v1743_v37  ;;  %v6873_v4 = vpop.f32.mrb[69].mxu0 }
 0x7f3   :  { %v1918_v5 = vpop.f32.mrb[70].mxu0 }
 0x7f4   :  { %v1928_v6 = vadd.f32 %v1918_v5, %v1744_v41  ;;  %v6876_v7 = vpop.f32.mrb[71].mxu0 }
 0x7f7   :  { %v1923_v8 = vpop.f32.mrb[72].mxu0 }
 0x7f8   :  { %v1929_v9 = vadd.f32 %v1923_v8, %v1745_v45  ;;  %v6879_v10 = vpop.f32.mrb[73].mxu0 }
 0x80f   :  { %v2003_v11 = vpop.f32.mrb[74].mxu0 }
 0x810   :  { %v6914_v13 = vpop.f32.mrb[75].mxu0  ;;  %6930 = vmatmul.mubr.msk.f32.vlgmr.msra.gmra.mrb[66].mxu1 %vm463_vm1, %v2003_v11 }
 0x811   :  { %7989 = vmatpush3.bf16.msra.mxu1 %v8673_v32  ;;  %6932 = vmatprep.mubr.msk.f32.mxu1 %vm8386_vm0, %v8387_v17 }
 0x812   :  { %7990 = vmatprep.subr.bf16.mxu1 %v8385_v16 }
 0x813   :  { %v2008_v14 = vpop.f32.mrb[76].mxu0 }
 0x814   :  { %6933 = vmatmul.mubr.msk.f32.gmra.mrb[68].mxu1 %vm463_vm1, %v2008_v14  ;;  %v6917_v15 = vpop.f32.mrb[77].mxu0 }
 0x815   :  { %7992 = vmatpush3.bf16.msra.mxu1 %v8681_v43  ;;  %6935 = vmatprep.mubr.msk.f32.mxu1 %vm8386_vm0, %v8387_v17 }
 0x816   :  { %7993 = vmatprep.subr.bf16.mxu1 %v8385_v16 }
 0x817   :  { %v2013_v18 = vpop.f32.mrb[78].mxu0 }
 0x818   :  { %6936 = vmatmul.mubr.msk.f32.gmra.mrb[70].mxu1 %vm463_vm1, %v2013_v18  ;;  %v6920_v19 = vpop.f32.mrb[79].mxu0  ;;  %v5688_v18 = vld [vmem:[%s10162_s1 + $0x90] sm:$0xff]  }
 0x819   :  { %7995 = vmatpush3.bf16.msra.mxu1 %v8689_v54  ;;  %6970 = vmatprep.mubr.msk.f32.mxu1 %vm8386_vm0, %v8387_v17  ;;  %v5677_v19 = vunpack.c.l.bf16 %v5688_v18  ;;  %v5678_v20 = vunpack.c.h.bf16 %v5688_v18 }
 0x81a   :  { %7996 = vmatprep.subr.bf16.mxu1 %v8385_v16 }
 0x81d   :  { %7998 = vmatpush3.bf16.msra.mxu1 %v8697_v1 }
 0x81e   :  { %7999 = vmatprep.subr.bf16.mxu1 %v8385_v16 }
 0x821   :  { %8001 = vmatpush3.bf16.msra.mxu1 %v8705_v12 }
 0x822   :  { %8002 = vmatprep.subr.bf16.mxu1 %v8385_v16 }
 0x825   :  { %8004 = vmatpush3.bf16.msra.mxu1 %v8713_v26 }
 0x826   :  { %8005 = vmatprep.subr.bf16.mxu1 %v8385_v16 }
 0x829   :  { %8007 = vmatpush3.bf16.msra.mxu1 %v8721_v38 }
 0x82a   :  { %8008 = vmatprep.subr.bf16.mxu1 %v8385_v16 }
 0x82d   :  { %8010 = vmatpush3.bf16.msra.mxu1 %v8735_v49 }
 0x82e   :  { %8041 = vmatprep.subr.bf16.mxu1 %v8385_v16 }
 0x830   :  { %6971 = vmatmul.mubr.f32.vlgmr.msra.gmra.mrb[72].mxu1 %v5673_v22  ;;  %v5491_v22 = vld [vmem:[%s10162_s1 + $0x98] sm:$0x1] }
 0x831   :  { %6973 = vmatprep.mubr.msk.f32.mxu1 %vm8386_vm0, %v8387_v17  ;;  %8043 = vmatpush3.bf16.msra.mxu1 %v8042_v60  ;;  %v8105_v60 = vpack.c.bf16 %v5505_v59, %v5504_v57 }
 0x832   :  { %8044 = vmatprep.subr.bf16.mxu1 %v8385_v16 }
 0x834   :  { %6974 = vmatmul.mubr.f32.gmra.mrb[74].mxu1 %v5674_v23  ;;  %v2488_v23 = vunpack.c.l.bf16 %v5491_v22  ;;  %v5512_v22 = vld [vmem:[%s10163_s5 + $0x1c0] sm:$0xff] }
 0x835   :  { %6976 = vmatprep.mubr.msk.f32.mxu1 %vm8386_vm0, %v8387_v17  ;;  %8046 = vmatpush3.bf16.msra.mxu1 %v8045_v62 }
 0x836   :  { %8047 = vmatprep.subr.bf16.mxu1 %v8385_v16 }
 0x838   :  { %6977 = vmatmul.mubr.f32.gmra.mrb[76].mxu1 %v2120_v25  ;;  %v5493_v25 = vld [vmem:[%s10163_s5 + $0x188] sm:$0xff] }
 0x839   :  { %7045 = vmatprep.mubr.msk.f32.mxu1 %vm8386_vm0, %v8387_v17  ;;  %v8072_v28 = vpack.c.bf16 %v5493_v25, %v5492_v24  ;;  %v5514_v24 = vld [vmem:[%s10163_s5 + $0x1d0] sm:$0xff] }
 0x8e3   :  { %v2097_v34 = vpop.f32.mrb[66].mxu1 }
 0x8e4   :  { %v2111_v35 = vadd.f32 %v2097_v34, %v1927_v3  ;;  %v6931_v36 = vpop.f32.mrb[67].mxu1 }
 0x8e7   :  { %v2102_v37 = vpop.f32.mrb[68].mxu1 }
 0x8e8   :  { %v2112_v39 = vadd.f32 %v2102_v37, %v1928_v6  ;;  %v6934_v40 = vpop.f32.mrb[69].mxu1 }
 0x8eb   :  { %v2107_v41 = vpop.f32.mrb[70].mxu1 }
 0x8ec   :  { %v2113_v42 = vadd.f32 %v2107_v41, %v1929_v9  ;;  %v6937_v44 = vpop.f32.mrb[71].mxu1 }
 0x903   :  { %v2187_v45 = vpop.f32.mrb[72].mxu1 }
 0x904   :  { %v6972_v46 = vpop.f32.mrb[73].mxu1  ;;  %6988 = vmatmul.mubr.msk.f32.vlgmr.msra.gmra.mrb[80].mxu0 %vm463_vm1, %v2187_v45 }
 0x905   :  { %8019 = vmatpush3.bf16.msra.mxu0 %v8673_v32  ;;  %6990 = vmatprep.mubr.msk.f32.mxu0 %vm8386_vm0, %v8387_v17 }
 0x906   :  { %8020 = vmatprep.subr.bf16.mxu0 %v8385_v16 }
 0x907   :  { %v2192_v47 = vpop.f32.mrb[74].mxu1 }
 0x908   :  { %6991 = vmatmul.mubr.msk.f32.gmra.mrb[82].mxu0 %vm463_vm1, %v2192_v47  ;;  %v6975_v48 = vpop.f32.mrb[75].mxu1 }
 0x909   :  { %8022 = vmatpush3.bf16.msra.mxu0 %v8681_v43  ;;  %6993 = vmatprep.mubr.msk.f32.mxu0 %vm8386_vm0, %v8387_v17 }
 0x90a   :  { %8023 = vmatprep.subr.bf16.mxu0 %v8385_v16 }
 0x90b   :  { %v2197_v50 = vpop.f32.mrb[76].mxu1 }
 0x90c   :  { %6994 = vmatmul.mubr.msk.f32.gmra.mrb[84].mxu0 %vm463_vm1, %v2197_v50  ;;  %v6978_v51 = vpop.f32.mrb[77].mxu1  ;;  %v5499_v50 = vld [vmem:[%s10162_s1 + $0x9c] sm:$0xff]  }
 0x90d   :  { %8025 = vmatpush3.bf16.msra.mxu0 %v8689_v54  ;;  %7028 = vmatprep.mubr.msk.f32.mxu0 %vm8386_vm0, %v8387_v17  ;;  %v2670_v51 = vunpack.c.l.bf16 %v5499_v50  ;;  %v2671_v21 = vunpack.c.h.bf16 %v5499_v50 }
 0x90e   :  { %8026 = vmatprep.subr.bf16.mxu0 %v8385_v16 }
 0x911   :  { %8028 = vmatpush3.bf16.msra.mxu0 %v8697_v1 }
 0x912   :  { %8029 = vmatprep.subr.bf16.mxu0 %v8385_v16 }
 0x915   :  { %8031 = vmatpush3.bf16.msra.mxu0 %v8705_v12 }
 0x916   :  { %8032 = vmatprep.subr.bf16.mxu0 %v8385_v16 }
 0x919   :  { %8034 = vmatpush3.bf16.msra.mxu0 %v8713_v26 }
 0x91a   :  { %8035 = vmatprep.subr.bf16.mxu0 %v8385_v16 }
 0x91d   :  { %8037 = vmatpush3.bf16.msra.mxu0 %v8721_v38 }
 0x91e   :  { %8038 = vmatprep.subr.bf16.mxu0 %v8385_v16 }
 0x921   :  { %8040 = vmatpush3.bf16.msra.mxu0 %v8735_v49 }
 0x922   :  { %8071 = vmatprep.subr.bf16.mxu0 %v8385_v16 }
 0x924   :  { %7029 = vmatmul.mubr.f32.vlgmr.msra.gmra.mrb[86].mxu0 %v2302_v52  ;;  %v5501_v52 = vld [vmem:[%s10162_s1 + $0xa4] sm:$0x1] }
 0x925   :  { %7031 = vmatprep.mubr.msk.f32.mxu0 %vm8386_vm0, %v8387_v17  ;;  %8073 = vmatpush3.bf16.msra.mxu0 %v8072_v28  ;;  %v8135_v28 = vpack.c.bf16 %v5515_v27, %v5514_v24 }
 0x926   :  { %8074 = vmatprep.subr.bf16.mxu0 %v8385_v16 }
 0x928   :  { %7032 = vmatmul.mubr.f32.gmra.mrb[88].mxu0 %v2303_v53  ;;  %v2672_v53 = vunpack.c.l.bf16 %v5501_v52 }
 0x929   :  { %7034 = vmatprep.mubr.msk.f32.mxu0 %vm8386_vm0, %v8387_v17  ;;  %8076 = vmatpush3.bf16.msra.mxu0 %v8075_v30 }
 0x92a   :  { %8077 = vmatprep.subr.bf16.mxu0 %v8385_v16 }
 0x92c   :  { %7035 = vmatmul.mubr.f32.gmra.mrb[90].mxu0 %v2304_v56  ;;  %v5503_v56 = vld [vmem:[%s10163_s5 + $0x1a8] sm:$0xff] }
 0x92d   :  { %7103 = vmatprep.mubr.msk.f32.mxu0 %vm8386_vm0, %v8387_v17  ;;  %v8102_v58 = vpack.c.bf16 %v5503_v56, %v5502_v55 }
 0x9d7   :  { %v2281_v63 = vpop.f32.mrb[80].mxu0 }
 0x9d8   :  { %v2295_v0 = vadd.f32 %v2281_v63, %v2111_v35  ;;  %v6989_v2 = vpop.f32.mrb[81].mxu0 }
 0x9db   :  { %v2286_v3 = vpop.f32.mrb[82].mxu0 }
 0x9dc   :  { %v2296_v4 = vadd.f32 %v2286_v3, %v2112_v39  ;;  %v6992_v5 = vpop.f32.mrb[83].mxu0 }
 0x9df   :  { %v2291_v6 = vpop.f32.mrb[84].mxu0 }
 0x9e0   :  { %v2297_v7 = vadd.f32 %v2291_v6, %v2113_v42  ;;  %v6995_v8 = vpop.f32.mrb[85].mxu0 }
 0x9f7   :  { %v2371_v9 = vpop.f32.mrb[86].mxu0 }
 0x9f8   :  { %v7030_v10 = vpop.f32.mrb[87].mxu0  ;;  %7046 = vmatmul.mubr.msk.f32.vlgmr.msra.gmra.mrb[78].mxu1 %vm463_vm1, %v2371_v9 }
 0x9f9   :  { %8049 = vmatpush3.bf16.msra.mxu1 %v8673_v32  ;;  %7048 = vmatprep.mubr.msk.f32.mxu1 %vm8386_vm0, %v8387_v17 }
 0x9fa   :  { %8050 = vmatprep.subr.bf16.mxu1 %v8385_v16 }
 0x9fb   :  { %v2376_v11 = vpop.f32.mrb[88].mxu0 }
 0x9fc   :  { %7049 = vmatmul.mubr.msk.f32.gmra.mrb[80].mxu1 %vm463_vm1, %v2376_v11  ;;  %v7033_v13 = vpop.f32.mrb[89].mxu0 }
 0x9fd   :  { %8052 = vmatpush3.bf16.msra.mxu1 %v8681_v43  ;;  %7051 = vmatprep.mubr.msk.f32.mxu1 %vm8386_vm0, %v8387_v17 }
 0x9fe   :  { %8053 = vmatprep.subr.bf16.mxu1 %v8385_v16 }
 0x9ff   :  { %v2381_v14 = vpop.f32.mrb[90].mxu0 }
 0xa00   :  { %7052 = vmatmul.mubr.msk.f32.gmra.mrb[82].mxu1 %vm463_vm1, %v2381_v14  ;;  %v7036_v15 = vpop.f32.mrb[91].mxu0  ;;  %v5689_v14 = vld [vmem:[%s10162_s1 + $0xa8] sm:$0xff]  }
 0xa01   :  { %8055 = vmatpush3.bf16.msra.mxu1 %v8689_v54  ;;  %7086 = vmatprep.mubr.msk.f32.mxu1 %vm8386_vm0, %v8387_v17  ;;  %v5681_v15 = vunpack.c.l.bf16 %v5689_v14  ;;  %v5682_v18 = vunpack.c.h.bf16 %v5689_v14  ;;  %v5542_v14 = vld [vmem:[%s10164_s6 + $0x78] sm:$0xff] }
 0xa02   :  { %8056 = vmatprep.subr.bf16.mxu1 %v8385_v16 }
 0xa05   :  { %8058 = vmatpush3.bf16.msra.mxu1 %v8697_v1 }
 0xa06   :  { %8059 = vmatprep.subr.bf16.mxu1 %v8385_v16 }
 0xa09   :  { %8061 = vmatpush3.bf16.msra.mxu1 %v8705_v12 }
 0xa0a   :  { %8062 = vmatprep.subr.bf16.mxu1 %v8385_v16 }
 0xa0d   :  { %8064 = vmatpush3.bf16.msra.mxu1 %v8713_v26 }
 0xa0e   :  { %8065 = vmatprep.subr.bf16.mxu1 %v8385_v16 }
 0xa11   :  { %8067 = vmatpush3.bf16.msra.mxu1 %v8721_v38 }
 0xa12   :  { %8068 = vmatprep.subr.bf16.mxu1 %v8385_v16 }
 0xa15   :  { %8070 = vmatpush3.bf16.msra.mxu1 %v8735_v49 }
 0xa16   :  { %8101 = vmatprep.subr.bf16.mxu1 %v8385_v16 }
 0xa18   :  { %7087 = vmatmul.mubr.f32.vlgmr.msra.gmra.mrb[84].mxu1 %v5677_v19  ;;  %v5511_v19 = vld [vmem:[%s10162_s1 + $0xb0] sm:$0x1] }
 0xa19   :  { %7089 = vmatprep.mubr.msk.f32.mxu1 %vm8386_vm0, %v8387_v17  ;;  %8103 = vmatpush3.bf16.msra.mxu1 %v8102_v58 }
 0xa1a   :  { %8104 = vmatprep.subr.bf16.mxu1 %v8385_v16 }
 0xa1c   :  { %7090 = vmatmul.mubr.f32.gmra.mrb[86].mxu1 %v5678_v20  ;;  %v2856_v20 = vunpack.c.l.bf16 %v5511_v19 }
 0xa1d   :  { %7092 = vmatprep.mubr.msk.f32.mxu1 %vm8386_vm0, %v8387_v17  ;;  %8106 = vmatpush3.bf16.msra.mxu1 %v8105_v60 }
 0xa1e   :  { %8107 = vmatprep.subr.bf16.mxu1 %v8385_v16 }
 0xa20   :  { %7093 = vmatmul.mubr.f32.gmra.mrb[88].mxu1 %v2488_v23  ;;  %v5513_v23 = vld [vmem:[%s10163_s5 + $0x1c8] sm:$0xff] }
 0xa21   :  { %7161 = vmatprep.mubr.msk.f32.mxu1 %vm8386_vm0, %v8387_v17  ;;  %v8132_v25 = vpack.c.bf16 %v5513_v23, %v5512_v22  ;;  %v5529_v22 = vld [vmem:[%s10161_s14 + $0x1] ss:$0 sm:$0xff] }
 0xacb   :  { %v2465_v31 = vpop.f32.mrb[78].mxu1 }
 0xacc   :  { %v2479_v33 = vadd.f32 %v2465_v31, %v2295_v0  ;;  %v7047_v34 = vpop.f32.mrb[79].mxu1 }
 0xacf   :  { %v2470_v35 = vpop.f32.mrb[80].mxu1 }
 0xad0   :  { %v2480_v36 = vadd.f32 %v2470_v35, %v2296_v4  ;;  %v7050_v37 = vpop.f32.mrb[81].mxu1 }
 0xad3   :  { %v2475_v39 = vpop.f32.mrb[82].mxu1 }
 0xad4   :  { %v2481_v40 = vadd.f32 %v2475_v39, %v2297_v7  ;;  %v7053_v41 = vpop.f32.mrb[83].mxu1 }
 0xaeb   :  { %v2555_v42 = vpop.f32.mrb[84].mxu1 }
 0xaec   :  { %v7088_v44 = vpop.f32.mrb[85].mxu1  ;;  %7104 = vmatmul.mubr.msk.f32.vlgmr.msra.gmra.mrb[92].mxu0 %vm463_vm1, %v2555_v42 }
 0xaed   :  { %8079 = vmatpush3.bf16.msra.mxu0 %v8673_v32  ;;  %7106 = vmatprep.mubr.msk.f32.mxu0 %vm8386_vm0, %v8387_v17 }
 0xaee   :  { %8080 = vmatprep.subr.bf16.mxu0 %v8385_v16 }
 0xaef   :  { %v2560_v45 = vpop.f32.mrb[86].mxu1 }
 0xaf0   :  { %7107 = vmatmul.mubr.msk.f32.gmra.mrb[94].mxu0 %vm463_vm1, %v2560_v45  ;;  %v7091_v46 = vpop.f32.mrb[87].mxu1 }
 0xaf1   :  { %8082 = vmatpush3.bf16.msra.mxu0 %v8681_v43  ;;  %7109 = vmatprep.mubr.msk.f32.mxu0 %vm8386_vm0, %v8387_v17  ;;  %v5524_v46 = vld [vmem:[%s10163_s5 + $0x1f0] sm:$0xff] }
 0xaf2   :  { %8083 = vmatprep.subr.bf16.mxu0 %v8385_v16 }
 0xaf3   :  { %v2565_v47 = vpop.f32.mrb[88].mxu1 }
 0xaf4   :  { %7110 = vmatmul.mubr.msk.f32.gmra.mrb[96].mxu0 %vm463_vm1, %v2565_v47  ;;  %v7094_v48 = vpop.f32.mrb[89].mxu1 }
 0xaf5   :  { %8085 = vmatpush3.bf16.msra.mxu0 %v8689_v54  ;;  %7144 = vmatprep.mubr.msk.f32.mxu0 %vm8386_vm0, %v8387_v17  ;;  %v5525_v48 = vld [vmem:[%s10163_s5 + $0x1f8] sm:$0xff] }
 0xaf6   :  { %8086 = vmatprep.subr.bf16.mxu0 %v8385_v16  ;;  %v8165_v50 = vpack.c.bf16 %v5525_v48, %v5524_v46  ;;  %v3316_v46 = vld [vmem:[%s10164_s6 + $0x38] sm:$0xff]  ;;  %v5548_v48 = vld [vmem:[%s10164_s6 + $0x80] sm:$0xff] }
 0xaf9   :  { %8088 = vmatpush3.bf16.msra.mxu0 %v8697_v1 }
 0xafa   :  { %8089 = vmatprep.subr.bf16.mxu0 %v8385_v16 }
 0xafd   :  { %8091 = vmatpush3.bf16.msra.mxu0 %v8705_v12 }
 0xafe   :  { %8092 = vmatprep.subr.bf16.mxu0 %v8385_v16 }
 0xb01   :  { %8094 = vmatpush3.bf16.msra.mxu0 %v8713_v26 }
 0xb02   :  { %8095 = vmatprep.subr.bf16.mxu0 %v8385_v16 }
 0xb05   :  { %8097 = vmatpush3.bf16.msra.mxu0 %v8721_v38 }
 0xb06   :  { %8098 = vmatprep.subr.bf16.mxu0 %v8385_v16 }
 0xb09   :  { %8100 = vmatpush3.bf16.msra.mxu0 %v8735_v49 }
 0xb0a   :  { %8131 = vmatprep.subr.bf16.mxu0 %v8385_v16 }
 0xb0c   :  { %7145 = vmatmul.mubr.f32.vlgmr.msra.gmra.mrb[98].mxu0 %v2670_v51 }
 0xb0d   :  { %7147 = vmatprep.mubr.msk.f32.mxu0 %vm8386_vm0, %v8387_v17  ;;  %8133 = vmatpush3.bf16.msra.mxu0 %v8132_v25 }
 0xb0e   :  { %8134 = vmatprep.subr.bf16.mxu0 %v8385_v16 }
 0xb10   :  { %7148 = vmatmul.mubr.f32.gmra.mrb[100].mxu0 %v2671_v21 }
 0xb11   :  { %7150 = vmatprep.mubr.msk.f32.mxu0 %vm8386_vm0, %v8387_v17  ;;  %8136 = vmatpush3.bf16.msra.mxu0 %v8135_v28 }
 0xb12   :  { %8137 = vmatprep.subr.bf16.mxu0 %v8385_v16 }
 0xb14   :  { %7151 = vmatmul.mubr.f32.gmra.mrb[102].mxu0 %v2672_v53 }
 0xb15   :  { %7219 = vmatprep.mubr.msk.f32.mxu0 %vm8386_vm0, %v8387_v17 }
 0xbbf   :  { %v2649_v61 = vpop.f32.mrb[92].mxu0 }
 0xbc0   :  { %v2663_v62 = vadd.f32 %v2649_v61, %v2479_v33  ;;  %v7105_v63 = vpop.f32.mrb[93].mxu0 }
 0xbc3   :  { %v2654_v0 = vpop.f32.mrb[94].mxu0 }
 0xbc4   :  { %v2664_v2 = vadd.f32 %v2654_v0, %v2480_v36  ;;  %v7108_v3 = vpop.f32.mrb[95].mxu0 }
 0xbc5   :  { %v5535_v3 = vld [vmem:[%s10164_s6 + $0x40] sm:$0xff] }
 0xbc7   :  { %v2659_v4 = vpop.f32.mrb[96].mxu0 }
 0xbc8   :  { %v2665_v5 = vadd.f32 %v2659_v4, %v2481_v40  ;;  %v7111_v6 = vpop.f32.mrb[97].mxu0  ;;  %v5536_v4 = vld [vmem:[%s10164_s6 + $0x48] sm:$0xff] }
 0xbc9   :  { %v5537_v6 = vld [vmem:[%s10164_s6 + $0x50] sm:$0xff] }
 0xbdf   :  { %v2739_v7 = vpop.f32.mrb[98].mxu0 }
 0xbe0   :  { %v7146_v8 = vpop.f32.mrb[99].mxu0  ;;  %7162 = vmatmul.mubr.msk.f32.vlgmr.msra.gmra.mrb[90].mxu1 %vm463_vm1, %v2739_v7  ;;  %v5538_v7 = vld [vmem:[%s10164_s6 + $0x58] sm:$0xff] }
 0xbe1   :  { %8109 = vmatpush3.bf16.msra.mxu1 %v8673_v32  ;;  %7164 = vmatprep.mubr.msk.f32.mxu1 %vm8386_vm0, %v8387_v17  ;;  %v8177_v8 = vpack.c.bf16 %v5538_v7, %v5537_v6  ;;  %v5562_v6 = vld [vmem:[%s10164_s6 + $0xd0] sm:$0xff]  ;;  %v5563_v7 = vld [vmem:[%s10164_s6 + $0xd8] sm:$0xff] }
 0xbe2   :  { %8110 = vmatprep.subr.bf16.mxu1 %v8385_v16 }
 0xbe3   :  { %v2744_v9 = vpop.f32.mrb[100].mxu0 }
 0xbe4   :  { %7165 = vmatmul.mubr.msk.f32.gmra.mrb[92].mxu1 %vm463_vm1, %v2744_v9  ;;  %v7149_v10 = vpop.f32.mrb[101].mxu0  ;;  %v5539_v9 = vld [vmem:[%s10164_s6 + $0x60] sm:$0xff] }
 0xbe5   :  { %8112 = vmatpush3.bf16.msra.mxu1 %v8681_v43  ;;  %7167 = vmatprep.mubr.msk.f32.mxu1 %vm8386_vm0, %v8387_v17  ;;  %v5540_v10 = vld [vmem:[%s10164_s6 + $0x68] sm:$0xff] }
 0xbe6   :  { %8113 = vmatprep.subr.bf16.mxu1 %v8385_v16 }
 0xbe7   :  { %v2749_v11 = vpop.f32.mrb[102].mxu0 }
 0xbe8   :  { %7168 = vmatmul.mubr.msk.f32.gmra.mrb[94].mxu1 %vm463_vm1, %v2749_v11  ;;  %v7152_v13 = vpop.f32.mrb[103].mxu0  ;;  %v8180_v11 = vpack.c.bf16 %v5540_v10, %v5539_v9  ;;  %v5554_v9 = vld [vmem:[%s10164_s6 + $0xb0] sm:$0xff]  ;;  %v5555_v10 = vld [vmem:[%s10164_s6 + $0xb8] sm:$0xff] }
 0xbe9   :  { %8115 = vmatpush3.bf16.msra.mxu1 %v8689_v54  ;;  %7202 = vmatprep.mubr.msk.f32.mxu1 %vm8386_vm0, %v8387_v17  ;;  %v5541_v13 = vld [vmem:[%s10164_s6 + $0x70] sm:$0xff] }
 0xbea   :  { %8116 = vmatprep.subr.bf16.mxu1 %v8385_v16 }
 0xbed   :  { %8118 = vmatpush3.bf16.msra.mxu1 %v8697_v1 }
 0xbee   :  { %8119 = vmatprep.subr.bf16.mxu1 %v8385_v16 }
 0xbf1   :  { %8121 = vmatpush3.bf16.msra.mxu1 %v8705_v12 }
 0xbf2   :  { %8122 = vmatprep.subr.bf16.mxu1 %v8385_v16 }
 0xbf5   :  { %8124 = vmatpush3.bf16.msra.mxu1 %v8713_v26 }
 0xbf6   :  { %8125 = vmatprep.subr.bf16.mxu1 %v8385_v16 }
 0xbf9   :  { %8127 = vmatpush3.bf16.msra.mxu1 %v8721_v38 }
 0xbfa   :  { %8128 = vmatprep.subr.bf16.mxu1 %v8385_v16 }
 0xbfd   :  { %8130 = vmatpush3.bf16.msra.mxu1 %v8735_v49 }
 0xbfe   :  { %8161 = vmatprep.subr.bf16.mxu1 %v8385_v16 }
 0xc00   :  { %7203 = vmatmul.mubr.f32.vlgmr.msra.gmra.mrb[96].mxu1 %v5681_v15  ;;  %v8183_v15 = vpack.c.bf16 %v5542_v14, %v5541_v13  ;;  %v5564_v13 = vld [vmem:[%s10164_s6 + $0xe0] sm:$0xff]  ;;  %v5565_v14 = vld [vmem:[%s10164_s6 + $0xe8] sm:$0xff] }
 0xc01   :  { %7205 = vmatprep.mubr.msk.f32.mxu1 %vm8386_vm0, %v8387_v17 }
 0xc04   :  { %7206 = vmatmul.mubr.f32.gmra.mrb[98].mxu1 %v5682_v18 }
 0xc05   :  { %7208 = vmatprep.mubr.msk.f32.mxu1 %vm8386_vm0, %v8387_v17 }
 0xc08   :  { %7209 = vmatmul.mubr.f32.gmra.mrb[100].mxu1 %v2856_v20 }
 0xc09   :  { %7277 = vmatprep.mubr.msk.f32.mxu1 %vm8386_vm0, %v8387_v17 }
 0xcb3   :  { %v2833_v29 = vpop.f32.mrb[90].mxu1 }
 0xcb4   :  { %v2847_v30 = vadd.f32 %v2833_v29, %v2663_v62  ;;  %v7163_v31 = vpop.f32.mrb[91].mxu1 }
 0xcb7   :  { %v2838_v33 = vpop.f32.mrb[92].mxu1 }
 0xcb8   :  { %v2848_v34 = vadd.f32 %v2838_v33, %v2664_v2  ;;  %v7166_v35 = vpop.f32.mrb[93].mxu1 }
 0xcbb   :  { %v2843_v36 = vpop.f32.mrb[94].mxu1 }
 0xcbc   :  { %v2849_v37 = vadd.f32 %v2843_v36, %v2665_v5  ;;  %v7169_v39 = vpop.f32.mrb[95].mxu1  ;;  %v8174_v5 = vpack.c.bf16 %v5536_v4, %v5535_v3  ;;  %v5561_v3 = vld [vmem:[%s10164_s6 + $0xc8] sm:$0xff] }
 0xcd3   :  { %v2923_v40 = vpop.f32.mrb[96].mxu1 }
 0xcd4   :  { %v7204_v41 = vpop.f32.mrb[97].mxu1  ;;  %7220 = vmatmul.mubr.msk.f32.vlgmr.msra.gmra.mrb[104].mxu0 %vm463_vm1, %v2923_v40 }
 0xcd5   :  { %8139 = vmatpush3.bf16.msra.mxu0 %v8673_v32  ;;  %7222 = vmatprep.mubr.msk.f32.mxu0 %vm8386_vm0, %v8387_v17  ;;  %v5532_v41 = vld [vmem:[%s10165_s2 + $0x1] sm:$0x1] }
 0xcd6   :  { %8140 = vmatprep.subr.bf16.mxu0 %v8385_v16 }
 0xcd7   :  { %v2928_v42 = vpop.f32.mrb[98].mxu1 }
 0xcd8   :  { %7223 = vmatmul.mubr.msk.f32.gmra.mrb[106].mxu0 %vm463_vm1, %v2928_v42  ;;  %v7207_v44 = vpop.f32.mrb[99].mxu1  ;;  %v3309_v42 = vld [vmem:[%s10164_s6] sm:$0xff] }
 0xcd9   :  { %8142 = vmatpush3.bf16.msra.mxu0 %v8681_v43  ;;  %7225 = vmatprep.mubr.msk.f32.mxu0 %vm8386_vm0, %v8387_v17  ;;  %v5519_v43 = vld [vmem:[%s10162_s1 + $0xb4] sm:$0xff]   ;;  %v3310_v44 = vld [vmem:[%s10164_s6 + $0x8] sm:$0xff] }
 0xcda   :  { %8143 = vmatprep.subr.bf16.mxu0 %v8385_v16 }
 0xcdb   :  { %v2933_v45 = vpop.f32.mrb[100].mxu1 }
 0xcdc   :  { %7226 = vmatmul.mubr.msk.f32.gmra.mrb[108].mxu0 %vm463_vm1, %v2933_v45  ;;  %v7210_v32 = vpop.f32.mrb[101].mxu1  ;;  %v3319_v45 = vunpack.c.l.bf16 %v5532_v41  ;;  %v5574_v41 = vld [vmem:[%s10164_s6 + $0x110] sm:$0xff] }
 0xcdd   :  { %8145 = vmatpush3.bf16.msra.mxu0 %v8689_v54  ;;  %7260 = vmatprep.mubr.msk.f32.mxu0 %vm8386_vm0, %v8387_v17  ;;  %v3038_v54 = vunpack.c.l.bf16 %v5519_v43  ;;  %v8186_v32 = vpack.c.bf16 %v3310_v44, %v3309_v42  ;;  %v5575_v42 = vld [vmem:[%s10164_s6 + $0x118] sm:$0xff]  ;;  %v5584_v44 = vld [vmem:[%s10164_s6 + $0x140] sm:$0xff] }
 0xcde   :  { %8146 = vmatprep.subr.bf16.mxu0 %v8385_v16 }
 0xce1   :  { %8148 = vmatpush3.bf16.msra.mxu0 %v8697_v1  ;;  %v3039_v1 = vunpack.c.h.bf16 %v5519_v43  ;;  %v3311_v43 = vld [vmem:[%s10164_s6 + $0x10] sm:$0xff] }
 0xce2   :  { %8149 = vmatprep.subr.bf16.mxu0 %v8385_v16 }
 0xce5   :  { %8151 = vmatpush3.bf16.msra.mxu0 %v8705_v12  ;;  %v5521_v12 = vld [vmem:[%s10162_s1 + $0xbc] sm:$0x1] }
 0xce6   :  { %8152 = vmatprep.subr.bf16.mxu0 %v8385_v16 }
 0xce9   :  { %8154 = vmatpush3.bf16.msra.mxu0 %v8713_v26  ;;  %v3040_v26 = vunpack.c.l.bf16 %v5521_v12  ;;  %v3313_v12 = vld [vmem:[%s10164_s6 + $0x20] sm:$0xff] }
 0xcea   :  { %8155 = vmatprep.subr.bf16.mxu0 %v8385_v16 }
 0xced   :  { %8157 = vmatpush3.bf16.msra.mxu0 %v8721_v38  ;;  %v5522_v38 = vld [vmem:[%s10163_s5 + $0x1e0] sm:$0xff] }
 0xcee   :  { %8158 = vmatprep.subr.bf16.mxu0 %v8385_v16 }
 0xcf1   :  { %8160 = vmatpush3.bf16.msra.mxu0 %v8735_v49  ;;  %v5523_v49 = vld [vmem:[%s10163_s5 + $0x1e8] sm:$0xff] }
 0xcf2   :  { %8173 = vmatprep.subr.bf16.mxu0 %v8385_v16  ;;  %v8162_v47 = vpack.c.bf16 %v5523_v49, %v5522_v38  ;;  %v3315_v49 = vld [vmem:[%s10164_s6 + $0x30] sm:$0xff] }
 0xcf4   :  { %7261 = vmatmul.mubr.f32.vlgmr.msra.gmra.mrb[110].mxu0 %v3038_v54  ;;  %8163 = vmatpush3.bf16.msra.mxu1 %v8162_v47  ;;  %v3312_v54 = vld [vmem:[%s10164_s6 + $0x18] sm:$0xff]  ;;  %v8195_v47 = vpack.c.bf16 %v3316_v46, %v3315_v49  ;;  %v5586_v49 = vld [vmem:[%s10164_s6 + $0x150] sm:$0xff] }
 0xcf5   :  { %7263 = vmatprep.mubr.msk.f32.mxu0 %vm8386_vm0, %v8387_v17  ;;  %8164 = vmatprep.subr.bf16.mxu1 %v8385_v16  ;;  %v5587_v46 = vld [vmem:[%s10164_s6 + $0x158] sm:$0xff] }
 0xcf6   :  { %8175 = vmatpush3.bf16.msra.mxu0 %v8174_v5 }
 0xcf7   :  { %8176 = vmatprep.subr.bf16.mxu0 %v8385_v16 }
 0xcf8   :  { %7264 = vmatmul.mubr.f32.gmra.mrb[112].mxu0 %v3039_v1  ;;  %8166 = vmatpush3.bf16.msra.mxu1 %v8165_v50  ;;  %v8189_v1 = vpack.c.bf16 %v3312_v54, %v3311_v43  ;;  %v5549_v50 = vld [vmem:[%s10164_s6 + $0x88] sm:$0xff]  ;;  %v8234_v54 = vpack.c.bf16 %v5575_v42, %v5574_v41 }
 0xcf9   :  { %7266 = vmatprep.mubr.msk.f32.mxu0 %vm8386_vm0, %v8387_v17  ;;  %8167 = vmatprep.subr.bf16.mxu1 %v8385_v16 }
 0xcfa   :  { %8178 = vmatpush3.bf16.msra.mxu0 %v8177_v8  ;;  %v8219_v8 = vpack.c.bf16 %v5563_v7, %v5562_v6  ;;  %v5597_v6 = vld [vmem:[%s10164_s6 + $0x188] sm:$0xff] }
 0xcfb   :  { %8179 = vmatprep.subr.bf16.mxu0 %v8385_v16 }
 0xcfc   :  { %7267 = vmatmul.mubr.f32.gmra.mrb[114].mxu0 %v3040_v26  ;;  %v3314_v26 = vld [vmem:[%s10164_s6 + $0x28] sm:$0xff] }
 0xcfd   :  { %7320 = vmatprep.mubr.msk.f32.mxu0 %vm8386_vm0, %v8387_v17  ;;  %v8192_v38 = vpack.c.bf16 %v3314_v26, %v3313_v12  ;;  %v5576_v12 = vld [vmem:[%s10164_s6 + $0x120] sm:$0xff]  ;;  %v5577_v26 = vld [vmem:[%s10164_s6 + $0x128] sm:$0xff] }
 0xcfe   :  { %8181 = vmatpush3.bf16.msra.mxu0 %v8180_v11  ;;  %v8210_v11 = vpack.c.bf16 %v5555_v10, %v5554_v9  ;;  %v5598_v10 = vld [vmem:[%s10164_s6 + $0x190] sm:$0xff] }
 0xcff   :  { %8182 = vmatprep.subr.bf16.mxu0 %v8385_v16 }
 0xd02   :  { %8184 = vmatpush3.bf16.msra.mxu0 %v8183_v15  ;;  %v8222_v15 = vpack.c.bf16 %v5565_v14, %v5564_v13  ;;  %v5608_v13 = vld [vmem:[%s10164_s6 + $0x1c0] sm:$0xff]  ;;  %v5609_v14 = vld [vmem:[%s10164_s6 + $0x1c8] sm:$0xff] }
 0xd03   :  { %8197 = vmatprep.subr.bf16.mxu0 %v8385_v16 }
 0xda7   :  { %v3017_v51 = vpop.f32.mrb[104].mxu0 }
 0xda8   :  { %v3031_v21 = vadd.f32 %v3017_v51, %v2847_v30  ;;  %v7221_v52 = vpop.f32.mrb[105].mxu0  ;;  %v8201_v51 = vpack.c.bf16 %v5549_v50, %v5548_v48  ;;  %v5578_v48 = vld [vmem:[%s10164_s6 + $0x130] sm:$0xff]  ;;  %v5579_v50 = vld [vmem:[%s10164_s6 + $0x138] sm:$0xff] }
 0xda9   :  { %v5551_v52 = vld [vmem:[%s10164_s6 + $0x98] sm:$0xff] }
 0xdab   :  { %v3022_v53 = vpop.f32.mrb[106].mxu0 }
 0xdac   :  { %v3032_v55 = vadd.f32 %v3022_v53, %v2848_v34  ;;  %v7224_v56 = vpop.f32.mrb[107].mxu0 }
 0xdaf   :  { %v3027_v57 = vpop.f32.mrb[108].mxu0 }
 0xdb0   :  { %v3033_v58 = vadd.f32 %v3027_v57, %v2849_v37  ;;  %v7227_v59 = vpop.f32.mrb[109].mxu0  ;;  %v3229_v37 = vld [vmem:[%s10165_s2] sm:$0x1] }
 0xdb1   :  { %v3230_v39 = vunpack.c.l.bf16 %v3229_v37  ;;  %v5552_v57 = vld [vmem:[%s10164_s6 + $0xa0] sm:$0xff] }
 0xdb2   :  { %v5581_v37 = vld [vmem:[%s10165_s2 + $0x5] sm:$0x1] }
 0xdb3   :  { %v4028_v43 = vunpack.c.l.bf16 %v5581_v37  ;;  %v5614_v37 = vld [vmem:[%s10164_s6 + $0x1f0] sm:$0xff] }
 0xdc7   :  { %v3107_v60 = vpop.f32.mrb[110].mxu0 }
 0xdc8   :  { %v7262_v61 = vpop.f32.mrb[111].mxu0  ;;  %7278 = vmatmul.mubr.msk.f32.vlgmr.msra.gmra.mrb[102].mxu1 %vm463_vm1, %v3107_v60  ;;  %v5545_v60 = vld [vmem:[%s10165_s2 + $0x2] sm:$0x1] }
 0xdc9   :  { %7280 = vmatprep.mubr.msk.f32.mxu1 %vm8386_vm0, %v8387_v17 }
 0xdcb   :  { %v3112_v62 = vpop.f32.mrb[112].mxu0 }
 0xdcc   :  { %v7265_v63 = vpop.f32.mrb[113].mxu0  ;;  %7281 = vmatmul.mubr.msk.f32.gmra.mrb[104].mxu1 %vm463_vm1, %v3112_v62 }
 0xdcd   :  { %7283 = vmatprep.mubr.msk.f32.mxu1 %vm8386_vm0, %v8387_v17  ;;  %v3551_v63 = vunpack.c.l.bf16 %v5545_v60 }
 0xdcf   :  { %v3117_v0 = vpop.f32.mrb[114].mxu0 }
 0xdd0   :  { %7284 = vmatmul.mubr.msk.f32.gmra.mrb[106].mxu1 %vm463_vm1, %v3117_v0  ;;  %v7268_v2 = vpop.f32.mrb[115].mxu0  ;;  %v5557_v0 = vld [vmem:[%s10165_s2 + $0x3] sm:$0x1] }
 0xdd1   :  { %7292 = vmatprep.mubr.msk.f32.mxu1 %vm8386_vm0, %v8387_v17  ;;  %v5560_v2 = vld [vmem:[%s10164_s6 + $0xc0] sm:$0xff]  ;;  %v3710_v4 = vunpack.c.l.bf16 %v5557_v0 }
 0xdd2   :  { %v8216_v5 = vpack.c.bf16 %v5561_v3, %v5560_v2 }
 0xe9b   :  { %v3201_v18 = vpop.f32.mrb[102].mxu1 }
 0xe9c   :  { %v3215_v19 = vadd.f32 %v3201_v18, %v3031_v21  ;;  %v7279_v20 = vpop.f32.mrb[103].mxu1  ;;  %v5550_v21 = vld [vmem:[%s10164_s6 + $0x90] sm:$0xff] }
 0xe9d   :  { %v8204_v56 = vpack.c.bf16 %v5551_v52, %v5550_v21  ;;  %v5566_v18 = vld [vmem:[%s10164_s6 + $0xf0] sm:$0xff]  ;;  %v5588_v21 = vld [vmem:[%s10164_s6 + $0x160] sm:$0xff]  ;;  %v5589_v52 = vld [vmem:[%s10164_s6 + $0x168] sm:$0xff] }
 0xe9e   :  { %v3222_v24 = vadd.f32 %v5529_v22, %v3215_v19  ;;  %v5567_v19 = vld [vmem:[%s10164_s6 + $0xf8] sm:$0xff] }
 0xe9f   :  { %v3206_v23 = vpop.f32.mrb[104].mxu1  ;;  %v8225_v20 = vpack.c.bf16 %v5567_v19, %v5566_v18 }
 0xea0   :  { %v3216_v25 = vadd.f32 %v3206_v23, %v3032_v55  ;;  %v7282_v27 = vpop.f32.mrb[105].mxu1  ;;  %v3225_v30 = vmax.f32 %v3222_v24, 0.0 }
 0xea2   :  { %v3223_v28 = vadd.f32 %v5529_v22, %v3216_v25 }
 0xea3   :  { %v3211_v29 = vpop.f32.mrb[106].mxu1 }
 0xea4   :  { %v3226_v31 = vmax.f32 %v3223_v28, 0.0  ;;  %v3217_v33 = vadd.f32 %v3211_v29, %v3033_v58  ;;  %v7285_v34 = vpop.f32.mrb[107].mxu1  ;;  %v5553_v58 = vld [vmem:[%s10164_s6 + $0xa8] sm:$0xff]  ;;  %v5569_v29 = vld [vmem:[%s10165_s2 + $0x4] sm:$0x1] }
 0xea5   :  { %v8207_v61 = vpack.c.bf16 %v5553_v58, %v5552_v57  ;;  %v5573_v34 = vld [vmem:[%s10164_s6 + $0x108] sm:$0xff] }
 0xea6   :  { %v9550_v35 = vpack.c.bf16 %v3226_v31, %v3225_v30  ;;  %v3224_v36 = vadd.f32 %v5529_v22, %v3217_v33  ;;  %v3869_v31 = vunpack.c.l.bf16 %v5569_v29  ;;  %v5572_v33 = vld [vmem:[%s10164_s6 + $0x100] sm:$0xff]  ;;  %v5602_v29 = vld [vmem:[%s10164_s6 + $0x1b0] sm:$0xff] }
 0xea8   :  { %8169 = vmatpush3.bf16.msra.mxu1 %v9550_v35  ;;  %v9557_v40 = vmax.f32 %v3224_v36, 0.0 }
 0xea9   :  { %7290 = vmatprep.subr.mxu1 %v8387_v17 }
 0xeac   :  { %7291 = vmatpush3.msk.msra.mxu1 %vm3235_vm2, %v9557_v40 }
 0xead   :  { %8170 = vmatprep.subr.bf16.mxu1 %v8385_v16  ;;  %7293 = vmatmul.mubr.msk.f32.vlgmr.msra.gmra.mrb[108].mxu1 %vm3231_vm3, %v3230_v39  ;;  %v8231_v39 = vpack.c.bf16 %v5573_v34, %v5572_v33  ;;  %v5612_v33 = vld [vmem:[%s10164_s6 + $0x1e0] sm:$0xff]  ;;  %v5613_v34 = vld [vmem:[%s10164_s6 + $0x1e8] sm:$0xff] }
 0xeae   :  { %8172 = vmatpush3.bf16.msra.mxu1 %v9550_v35  ;;  %7301 = vmatprep.mubr.msk.f32.mxu1 %vm8386_vm0, %v8387_v17 }
 0xeaf   :  { %7299 = vmatprep.subr.mxu1 %v8387_v17 }
 0xeb2   :  { %7300 = vmatpush3.msk.msra.mxu1 %vm3235_vm2, %v9557_v40 }
 0xeb3   :  { %7302 = vmatmul.mubr.msk.f32.vlgmr.msra.gmra.mrb[110].mxu1 %vm3231_vm3, %v3319_v45  ;;  %8185 = vmatprep.subr.bf16.mxu1 %v8385_v16  ;;  %v5585_v45 = vld [vmem:[%s10164_s6 + $0x148] sm:$0xff] }
 0xeb4   :  { %8187 = vmatpush3.bf16.msra.mxu1 %v8186_v32  ;;  %7339 = vmatprep.mubr.msk.f32.mxu1 %vm8386_vm0, %v8387_v17 }
 0xeb5   :  { %8188 = vmatprep.subr.bf16.mxu1 %v8385_v16 }
 0xeb8   :  { %8190 = vmatpush3.bf16.msra.mxu1 %v8189_v1  ;;  %v8246_v1 = vpack.c.bf16 %v5585_v45, %v5584_v44 }
 0xeb9   :  { %8191 = vmatprep.subr.bf16.mxu1 %v8385_v16 }
 0xebc   :  { %8193 = vmatpush3.bf16.msra.mxu1 %v8192_v38  ;;  %v8237_v38 = vpack.c.bf16 %v5577_v26, %v5576_v12 }
 0xebd   :  { %8194 = vmatprep.subr.bf16.mxu1 %v8385_v16 }
 0xec0   :  { %8196 = vmatpush3.bf16.msra.mxu1 %v8195_v47  ;;  %v8249_v47 = vpack.c.bf16 %v5587_v46, %v5586_v49  ;;  %v5621_v49 = vld [vmem:[%s10164_s6 + $0x208] sm:$0xff] }
 0xec1   :  { %8200 = vmatprep.subr.bf16.mxu1 %v8385_v16 }
 0xf80   :  { %v3305_v53 = vpop.f32.mrb[108].mxu1 }
 0xf81   :  { %v7294_v55 = vpop.f32.mrb[109].mxu1  ;;  %7340 = vmatmul.mubr.msk.f32.vlgmr.msra.gmra.mrb[112].mxu1 %vm3402_vm4, %v3305_v53  ;;  %v8252_v53 = vpack.c.bf16 %v5589_v52, %v5588_v21  ;;  %v5624_v21 = vld [vmem:[%s10164_s6 + $0x220] sm:$0xff]  ;;  %v5625_v52 = vld [vmem:[%s10164_s6 + $0x228] sm:$0xff] }
 0xf82   :  { %8202 = vmatpush3.bf16.msra.mxu1 %v8201_v51  ;;  %7367 = vmatprep.mubr.msk.f32.mxu1 %vm8386_vm0, %v8387_v17  ;;  %v8240_v51 = vpack.c.bf16 %v5579_v50, %v5578_v48  ;;  %v5590_v55 = vld [vmem:[%s10164_s6 + $0x170] sm:$0xff]  ;;  %v5623_v50 = vld [vmem:[%s10164_s6 + $0x218] sm:$0xff] }
 0xf83   :  { %8203 = vmatprep.subr.bf16.mxu1 %v8385_v16 }
 0xf86   :  { %v3389_v59 = vpop.f32.mrb[110].mxu1  ;;  %8205 = vmatpush3.bf16.msra.mxu1 %v8204_v56  ;;  %v5591_v56 = vld [vmem:[%s10164_s6 + $0x178] sm:$0xff] }
 0xf87   :  { %7321 = vmatmul.mubr.msk.f32.vlgmr.msra.gmra.mrb[116].mxu0 %vm3402_vm4, %v3389_v59  ;;  %v7303_v62 = vpop.f32.mrb[111].mxu1  ;;  %8206 = vmatprep.subr.bf16.mxu1 %v8385_v16  ;;  %v8255_v57 = vpack.c.bf16 %v5591_v56, %v5590_v55  ;;  %v5626_v55 = vld [vmem:[%s10164_s6 + $0x230] sm:$0xff]  ;;  %v5627_v56 = vld [vmem:[%s10164_s6 + $0x238] sm:$0xff] }
 0xf88   :  { %8199 = vmatpush3.bf16.msra.mxu0 %v9550_v35  ;;  %7348 = vmatprep.mubr.msk.f32.mxu0 %vm8386_vm0, %v8387_v17 }
 0xf89   :  { %7346 = vmatprep.subr.mxu0 %v8387_v17 }
 0xf8a   :  { %8208 = vmatpush3.bf16.msra.mxu1 %v8207_v61 }
 0xf8b   :  { %8209 = vmatprep.subr.bf16.mxu1 %v8385_v16 }
 0xf8c   :  { %7347 = vmatpush3.msk.msra.mxu0 %vm3235_vm2, %v9557_v40 }
 0xf8d   :  { %7349 = vmatmul.mubr.msk.f32.vlgmr.msra.gmra.mrb[118].mxu0 %vm3231_vm3, %v3551_v63  ;;  %8212 = vmatprep.subr.bf16.mxu0 %v8385_v16  ;;  %v5593_v63 = vld [vmem:[%s10165_s2 + $0x6] sm:$0x1] }
 0xf8e   :  { %8214 = vmatpush3.bf16.msra.mxu0 %v9550_v35  ;;  %7376 = vmatprep.mubr.msk.f32.mxu0 %vm8386_vm0, %v8387_v17 }
 0xf8f   :  { %7374 = vmatprep.subr.mxu0 %v8387_v17  ;;  %8211 = vmatpush3.bf16.msra.mxu1 %v8210_v11  ;;  %v5599_v11 = vld [vmem:[%s10164_s6 + $0x198] sm:$0xff] }
 0xf90   :  { %8227 = vmatprep.subr.bf16.mxu1 %v8385_v16  ;;  %v8264_v19 = vpack.c.bf16 %v5599_v11, %v5598_v10  ;;  %v4673_v10 = vld [vmem:[%s10166_s7 + $0x28] sm:$0xff] }
 0xf92   :  { %7375 = vmatpush3.msk.msra.mxu0 %vm3235_vm2, %v9557_v40 }
 0xf93   :  { %7377 = vmatmul.mubr.msk.f32.vlgmr.msra.gmra.mrb[120].mxu0 %vm3231_vm3, %v3710_v4  ;;  %8215 = vmatprep.subr.bf16.mxu0 %v8385_v16  ;;  %v4187_v4 = vunpack.c.l.bf16 %v5593_v63 }
 0xf94   :  { %8217 = vmatpush3.bf16.msra.mxu0 %v8216_v5  ;;  %7395 = vmatprep.mubr.msk.f32.mxu0 %vm8386_vm0, %v8387_v17  ;;  %v5596_v5 = vld [vmem:[%s10164_s6 + $0x180] sm:$0xff] }
 0xf95   :  { %8218 = vmatprep.subr.bf16.mxu0 %v8385_v16  ;;  %v8261_v9 = vpack.c.bf16 %v5597_v6, %v5596_v5 }
 0xf98   :  { %8220 = vmatpush3.bf16.msra.mxu0 %v8219_v8  ;;  %v5605_v8 = vld [vmem:[%s10165_s2 + $0x7] sm:$0x1] }
 0xf99   :  { %8221 = vmatprep.subr.bf16.mxu0 %v8385_v16  ;;  %v4346_v18 = vunpack.c.l.bf16 %v5605_v8 }
 0xf9c   :  { %8223 = vmatpush3.bf16.msra.mxu0 %v8222_v15 }
 0xf9d   :  { %8224 = vmatprep.subr.bf16.mxu0 %v8385_v16 }
 0xfa0   :  { %8226 = vmatpush3.bf16.msra.mxu0 %v8225_v20  ;;  %v8276_v20 = vpack.c.bf16 %v5609_v14, %v5608_v13  ;;  %v4674_v13 = vld [vmem:[%s10166_s7 + $0x30] sm:$0xff]  ;;  %v4675_v14 = vld [vmem:[%s10166_s7 + $0x38] sm:$0xff] }
 0xfa1   :  { %8242 = vmatprep.subr.bf16.mxu0 %v8385_v16 }
0x1054   :  { %v3545_v22 = vpop.f32.mrb[112].mxu1 }
0x1055   :  { %v7341_v23 = vpop.f32.mrb[113].mxu1 }
0x1056   :  { %v5601_v23 = vld [vmem:[%s10164_s6 + $0x1a8] sm:$0xff] }
0x105a   :  { %v3472_v24 = vpop.f32.mrb[116].mxu0 }
0x105b   :  { %v9688_v25 = vadd.f32 %v3545_v22, %v3472_v24  ;;  %v7322_v27 = vpop.f32.mrb[117].mxu0  ;;  %v5600_v22 = vld [vmem:[%s10164_s6 + $0x1a0] sm:$0xff] }
0x105c   :  { %v8267_v24 = vpack.c.bf16 %v5601_v23, %v5600_v22  ;;  %v5611_v27 = vld [vmem:[%s10164_s6 + $0x1d8] sm:$0xff] }
0x1060   :  { %v3621_v28 = vpop.f32.mrb[118].mxu0 }
0x1061   :  { %7368 = vmatmul.mubr.msk.f32.vlgmr.msra.gmra.mrb[114].mxu1 %vm3402_vm4, %v3621_v28  ;;  %v7350_v30 = vpop.f32.mrb[119].mxu0 }
0x1062   :  { %8229 = vmatpush3.bf16.msra.mxu1 %v9550_v35  ;;  %7404 = vmatprep.mubr.msk.f32.mxu1 %vm8386_vm0, %v8387_v17  ;;  %v5603_v30 = vld [vmem:[%s10164_s6 + $0x1b8] sm:$0xff] }
0x1063   :  { %7402 = vmatprep.subr.mxu1 %v8387_v17 }
0x1066   :  { %7403 = vmatpush3.msk.msra.mxu1 %vm3235_vm2, %v9557_v40  ;;  %v3780_v36 = vpop.f32.mrb[120].mxu0 }
0x1067   :  { %7405 = vmatmul.mubr.msk.f32.vlgmr.msra.gmra.mrb[116].mxu1 %vm3231_vm3, %v3869_v31  ;;  %7396 = vmatmul.mubr.msk.f32.vlgmr.msra.gmra.mrb[122].mxu0 %vm3402_vm4, %v3780_v36  ;;  %v7378_v32 = vpop.f32.mrb[121].mxu0  ;;  %v8270_v31 = vpack.c.bf16 %v5603_v30, %v5602_v29  ;;  %v8282_v36 = vpack.c.bf16 %v5613_v34, %v5612_v33 }
0x1068   :  { %8244 = vmatpush3.bf16.msra.mxu0 %v9550_v35  ;;  %7432 = vmatprep.mubr.msk.f32.mxu0 %vm8386_vm0, %v8387_v17 }
0x1069   :  { %7430 = vmatprep.subr.mxu0 %v8387_v17  ;;  %8230 = vmatprep.subr.bf16.mxu1 %v8385_v16 }
0x106a   :  { %8232 = vmatpush3.bf16.msra.mxu1 %v8231_v39  ;;  %7423 = vmatprep.mubr.msk.f32.mxu1 %vm8386_vm0, %v8387_v17  ;;  %v5615_v39 = vld [vmem:[%s10164_s6 + $0x1f8] sm:$0xff] }
0x106b   :  { %8233 = vmatprep.subr.bf16.mxu1 %v8385_v16  ;;  %v8285_v41 = vpack.c.bf16 %v5615_v39, %v5614_v37  ;;  %v4784_v39 = vld [vmem:[%s10167_s8] sm:$0xff] }
0x106c   :  { %7431 = vmatpush3.msk.msra.mxu0 %vm3235_vm2, %v9557_v40 }
0x106d   :  { %7433 = vmatmul.mubr.msk.f32.vlgmr.msra.gmra.mrb[124].mxu0 %vm3231_vm3, %v4028_v43  ;;  %8245 = vmatprep.subr.bf16.mxu0 %v8385_v16 }
0x106e   :  { %8235 = vmatpush3.bf16.msra.mxu1 %v8234_v54  ;;  %8247 = vmatpush3.bf16.msra.mxu0 %v8246_v1  ;;  %v5617_v54 = vld [vmem:[%s10165_s2 + $0x8] sm:$0x1] }
0x106f   :  { %8236 = vmatprep.subr.bf16.mxu1 %v8385_v16  ;;  %8248 = vmatprep.subr.bf16.mxu0 %v8385_v16  ;;  %v4505_v46 = vunpack.c.l.bf16 %v5617_v54 }
0x1070   :  { %7451 = vmatprep.mubr.msk.f32.mxu0 %vm8386_vm0, %v8387_v17 }
0x1072   :  { %8238 = vmatpush3.bf16.msra.mxu1 %v8237_v38  ;;  %8250 = vmatpush3.bf16.msra.mxu0 %v8249_v47  ;;  %v5620_v38 = vld [vmem:[%s10164_s6 + $0x200] sm:$0xff] }
0x1073   :  { %8239 = vmatprep.subr.bf16.mxu1 %v8385_v16  ;;  %8251 = vmatprep.subr.bf16.mxu0 %v8385_v16  ;;  %v8291_v47 = vpack.c.bf16 %v5621_v49, %v5620_v38  ;;  %v5633_v49 = vld [vmem:[%s10161_s14 + $0x5] ss:$0 sm:$0xff] }
0x1076   :  { %8241 = vmatpush3.bf16.msra.mxu1 %v8240_v51  ;;  %8253 = vmatpush3.bf16.msra.mxu0 %v8252_v53  ;;  %v8297_v53 = vpack.c.bf16 %v5625_v52, %v5624_v21 }
0x1077   :  { %8257 = vmatprep.subr.bf16.mxu1 %v8385_v16  ;;  %8254 = vmatprep.subr.bf16.mxu0 %v8385_v16 }
0x107a   :  { %8256 = vmatpush3.bf16.msra.mxu0 %v8255_v57  ;;  %v8300_v57 = vpack.c.bf16 %v5627_v56, %v5626_v55 }
0x107b   :  { %8272 = vmatprep.subr.bf16.mxu0 %v8385_v16 }
0x1134   :  { %v3703_v58 = vpop.f32.mrb[114].mxu1 }
0x1135   :  { %v3707_v59 = vadd.f32 %v3703_v58, %v9688_v25  ;;  %v7369_v60 = vpop.f32.mrb[115].mxu1  ;;  %v5610_v25 = vld [vmem:[%s10164_s6 + $0x1d0] sm:$0xff]  ;;  %v4668_v58 = vld [vmem:[%s10166_s7] sm:$0xff] }
0x1136   :  { %v8279_v28 = vpack.c.bf16 %v5611_v27, %v5610_v25  ;;  %v4670_v60 = vld [vmem:[%s10166_s7 + $0x10] sm:$0xff]  ;;  %v5630_v25 = vld [vmem:[%s10161_s14 + $0x3] ss:$0 sm:$0xff] }
0x113a   :  { %v3939_v61 = vpop.f32.mrb[116].mxu1  ;;  %v3862_v62 = vpop.f32.mrb[122].mxu0 }
0x113b   :  { %v9778_v0 = vadd.f32 %v3862_v62, %v3707_v59  ;;  %7424 = vmatmul.mubr.msk.f32.vlgmr.msra.gmra.mrb[118].mxu1 %vm3402_vm4, %v3939_v61  ;;  %v7397_v2 = vpop.f32.mrb[123].mxu0  ;;  %v7406_v3 = vpop.f32.mrb[117].mxu1  ;;  %v4669_v59 = vld [vmem:[%s10166_s7 + $0x8] sm:$0xff]  ;;  %v4671_v62 = vld [vmem:[%s10166_s7 + $0x18] sm:$0xff] }
0x113c   :  { %8259 = vmatpush3.bf16.msra.mxu1 %v9550_v35  ;;  %7460 = vmatprep.mubr.msk.f32.mxu1 %vm8386_vm0, %v8387_v17  ;;  %v8303_v61 = vpack.c.bf16 %v4669_v59, %v4668_v58  ;;  %v8306_v63 = vpack.c.bf16 %v4671_v62, %v4670_v60  ;;  %v4894_v59 = vld [vmem:[%s10168_s9] sm:$0xff]  ;;  %v4895_v60 = vld [vmem:[%s10168_s9 + $0x8] sm:$0xff]  ;;  %v4896_v62 = vld [vmem:[%s10168_s9 + $0x10] sm:$0xff] }
0x113d   :  { %7458 = vmatprep.subr.mxu1 %v8387_v17 }
0x1140   :  { %7459 = vmatpush3.msk.msra.mxu1 %vm3235_vm2, %v9557_v40  ;;  %v4098_v7 = vpop.f32.mrb[124].mxu0 }
0x1141   :  { %7461 = vmatmul.mubr.msk.f32.vlgmr.msra.gmra.mrb[120].mxu1 %vm3231_vm3, %v4187_v4  ;;  %7452 = vmatmul.mubr.msk.f32.vlgmr.msra.gmra.mrb[126].mxu0 %vm3402_vm4, %v4098_v7  ;;  %v7434_v15 = vpop.f32.mrb[125].mxu0 }
0x1142   :  { %8274 = vmatpush3.bf16.msra.mxu0 %v9550_v35  ;;  %7488 = vmatprep.mubr.msk.f32.mxu0 %vm8386_vm0, %v8387_v17  ;;  %v8312_v15 = vpack.c.bf16 %v4675_v14, %v4674_v13  ;;  %v4991_v13 = vld [vmem:[%s10169_s11 + $0x38] sm:$0xff] }
0x1143   :  { %7486 = vmatprep.subr.mxu0 %v8387_v17  ;;  %8260 = vmatprep.subr.bf16.mxu1 %v8385_v16 }
0x1144   :  { %8262 = vmatpush3.bf16.msra.mxu1 %v8261_v9  ;;  %7479 = vmatprep.mubr.msk.f32.mxu1 %vm8386_vm0, %v8387_v17  ;;  %v4672_v9 = vld [vmem:[%s10166_s7 + $0x20] sm:$0xff] }
0x1145   :  { %8263 = vmatprep.subr.bf16.mxu1 %v8385_v16  ;;  %v8309_v11 = vpack.c.bf16 %v4673_v10, %v4672_v9  ;;  %v4989_v9 = vld [vmem:[%s10169_s11 + $0x28] sm:$0xff] }
0x1146   :  { %7487 = vmatpush3.msk.msra.mxu0 %vm3235_vm2, %v9557_v40 }
0x1147   :  { %7489 = vmatmul.mubr.msk.f32.vlgmr.msra.gmra.mrb[128].mxu0 %vm3231_vm3, %v4346_v18  ;;  %8275 = vmatprep.subr.bf16.mxu0 %v8385_v16  ;;  %v5629_v18 = vld [vmem:[%s10161_s14 + $0x2] ss:$0 sm:$0xff] }
0x1148   :  { %8265 = vmatpush3.bf16.msra.mxu1 %v8264_v19  ;;  %8277 = vmatpush3.bf16.msra.mxu0 %v8276_v20 }
0x1149   :  { %8266 = vmatprep.subr.bf16.mxu1 %v8385_v16  ;;  %8278 = vmatprep.subr.bf16.mxu0 %v8385_v16 }
0x114a   :  { %7507 = vmatprep.mubr.msk.f32.mxu0 %vm8386_vm0, %v8387_v17 }
0x114c   :  { %8268 = vmatpush3.bf16.msra.mxu1 %v8267_v24  ;;  %8280 = vmatpush3.bf16.msra.mxu0 %v8279_v28 }
0x114d   :  { %8269 = vmatprep.subr.bf16.mxu1 %v8385_v16  ;;  %8281 = vmatprep.subr.bf16.mxu0 %v8385_v16 }
0x1150   :  { %8271 = vmatpush3.bf16.msra.mxu1 %v8270_v31  ;;  %8283 = vmatpush3.bf16.msra.mxu0 %v8282_v36 }
0x1151   :  { %8287 = vmatprep.subr.bf16.mxu1 %v8385_v16  ;;  %8284 = vmatprep.subr.bf16.mxu0 %v8385_v16 }
0x1154   :  { %8286 = vmatpush3.bf16.msra.mxu0 %v8285_v41  ;;  %v4785_v41 = vld [vmem:[%s10167_s8 + $0x8] sm:$0xff] }
0x1155   :  { %8302 = vmatprep.subr.bf16.mxu0 %v8385_v16 }
0x120e   :  { %v4021_v42 = vpop.f32.mrb[118].mxu1 }
0x120f   :  { %v4025_v44 = vadd.f32 %v4021_v42, %v9778_v0  ;;  %v7425_v45 = vpop.f32.mrb[119].mxu1  ;;  %v8315_v42 = vpack.c.bf16 %v4785_v41, %v4784_v39  ;;  %v5637_v39 = vld [vmem:[%s10161_s14 + $0x8] ss:$0 sm:$0xff] }
0x1210   :  { %v4787_v45 = vld [vmem:[%s10167_s8 + $0x18] sm:$0xff] }
0x1214   :  { %v4257_v32 = vpop.f32.mrb[120].mxu1  ;;  %v4180_v43 = vpop.f32.mrb[126].mxu0 }
0x1215   :  { %v4184_v1 = vadd.f32 %v4180_v43, %v4025_v44  ;;  %7480 = vmatmul.mubr.msk.f32.vlgmr.msra.gmra.mrb[122].mxu1 %vm3402_vm4, %v4257_v32  ;;  %v7453_v12 = vpop.f32.mrb[127].mxu0  ;;  %v7462_v26 = vpop.f32.mrb[121].mxu1  ;;  %v4786_v44 = vld [vmem:[%s10167_s8 + $0x10] sm:$0xff] }
0x1216   :  { %8289 = vmatpush3.bf16.msra.mxu1 %v9550_v35  ;;  %7516 = vmatprep.mubr.msk.f32.mxu1 %vm8386_vm0, %v8387_v17  ;;  %v5622_v35 = vld [vmem:[%s10164_s6 + $0x210] sm:$0xff]  ;;  %v8318_v32 = vpack.c.bf16 %v4787_v45, %v4786_v44  ;;  %v5632_v26 = vld [vmem:[%s10161_s14 + $0x4] ss:$0 sm:$0xff]  ;;  %v4977_v44 = vld [vmem:[%s10170_s10 + $0x8] sm:$0xff] }
0x1217   :  { %7514 = vmatprep.subr.mxu1 %v8387_v17 }
0x121a   :  { %7515 = vmatpush3.msk.msra.mxu1 %vm3235_vm2, %v9557_v40  ;;  %v4416_v48 = vpop.f32.mrb[128].mxu0  ;;  %v8294_v40 = vpack.c.bf16 %v5623_v50, %v5622_v35  ;;  %v5634_v50 = vld [vmem:[%s10161_s14 + $0x6] ss:$0 sm:$0xff] }
0x121b   :  { %7517 = vmatmul.mubr.msk.f32.vlgmr.msra.gmra.mrb[124].mxu1 %vm3231_vm3, %v4505_v46  ;;  %7508 = vmatmul.mubr.msk.f32.vlgmr.msra.gmra.mrb[130].mxu0 %vm3402_vm4, %v4416_v48  ;;  %v7490_v51 = vpop.f32.mrb[129].mxu0 }
0x121c   :  { %8290 = vmatprep.subr.bf16.mxu1 %v8385_v16  ;;  %7535 = vmatprep.mubr.msk.f32.mxu1 %vm8386_vm0, %v8387_v17 }
0x121d   :  { %8292 = vmatpush3.bf16.msra.mxu1 %v8291_v47  ;;  %7554 = vmatprep.mubr.msk.f32.mxu0 %vm8386_vm0, %v8387_v17 }
0x121e   :  { %8293 = vmatprep.subr.bf16.mxu1 %v8385_v16  ;;  %8304 = vmatpush3.bf16.msra.mxu0 %v8303_v61  ;;  %v8321_v61 = vpack.c.bf16 %v4895_v60, %v4894_v59 }
0x121f   :  { %8305 = vmatprep.subr.bf16.mxu0 %v8385_v16 }
0x1221   :  { %8295 = vmatpush3.bf16.msra.mxu1 %v8294_v40 }
0x1222   :  { %8296 = vmatprep.subr.bf16.mxu1 %v8385_v16  ;;  %8307 = vmatpush3.bf16.msra.mxu0 %v8306_v63  ;;  %v4897_v63 = vld [vmem:[%s10168_s9 + $0x18] sm:$0xff] }
0x1223   :  { %8308 = vmatprep.subr.bf16.mxu0 %v8385_v16 }
0x1225   :  { %8298 = vmatpush3.bf16.msra.mxu1 %v8297_v53 }
0x1226   :  { %8299 = vmatprep.subr.bf16.mxu1 %v8385_v16  ;;  %8310 = vmatpush3.bf16.msra.mxu0 %v8309_v11  ;;  %v4990_v11 = vld [vmem:[%s10169_s11 + $0x30] sm:$0xff] }
0x1227   :  { %8311 = vmatprep.subr.bf16.mxu0 %v8385_v16  ;;  %v8336_v14 = vpack.c.bf16 %v4991_v13, %v4990_v11 }
0x1229   :  { %8301 = vmatpush3.bf16.msra.mxu1 %v8300_v57 }
0x122a   :  { %8314 = vmatprep.subr.bf16.mxu1 %v8385_v16  ;;  %8313 = vmatpush3.bf16.msra.mxu0 %v8312_v15  ;;  %v4992_v15 = vld [vmem:[%s10169_s11 + $0x40] sm:$0xff] }
0x122b   :  { %8320 = vmatprep.subr.bf16.mxu0 %v8385_v16 }
0x12e8   :  { %v4339_v0 = vpop.f32.mrb[122].mxu1 }
0x12e9   :  { %v4343_v2 = vadd.f32 %v4339_v0, %v4184_v1  ;;  %v7481_v3 = vpop.f32.mrb[123].mxu1  ;;  %v8324_v0 = vpack.c.bf16 %v4897_v63, %v4896_v62 }
0x12ea   :  { %v4985_v3 = vld [vmem:[%s10169_s11 + $0x8] sm:$0xff] }
0x12ee   :  { %v4575_v4 = vpop.f32.mrb[124].mxu1  ;;  %v4498_v5 = vpop.f32.mrb[130].mxu0 }
0x12ef   :  { %v4502_v6 = vadd.f32 %v4498_v5, %v4343_v2  ;;  %7536 = vmatmul.mubr.msk.f32.vlgmr.msra.gmra.mrb[126].mxu1 %vm3402_vm4, %v4575_v4  ;;  %v7518_v7 = vpop.f32.mrb[125].mxu1  ;;  %v7509_v8 = vpop.f32.mrb[131].mxu0  ;;  %v4984_v2 = vld [vmem:[%s10169_s11] sm:$0xff]  ;;  %v4986_v4 = vld [vmem:[%s10169_s11 + $0x10] sm:$0xff] }
0x12f0   :  { %7565 = vmatprep.mubr.msk.f32.mxu1 %vm8386_vm0, %v8387_v17  ;;  %8316 = vmatpush3.bf16.msra.mxu1 %v8315_v42  ;;  %v8327_v5 = vpack.c.bf16 %v4985_v3, %v4984_v2  ;;  %v4988_v8 = vld [vmem:[%s10169_s11 + $0x20] sm:$0xff] }
0x12f1   :  { %8317 = vmatprep.subr.bf16.mxu1 %v8385_v16  ;;  %v8333_v10 = vpack.c.bf16 %v4989_v9, %v4988_v8  ;;  %v4976_v42 = vld [vmem:[%s10170_s10] sm:$0xff]  ;;  %v5177_v8 = vld [vmem:[%s10172_s12 + $0x18] sm:$0xff] }
0x12f4   :  { %8319 = vmatpush3.bf16.msra.mxu1 %v8318_v32 }
0x12f5   :  { %8326 = vmatprep.subr.bf16.mxu1 %v8385_v16 }
0x13c2   :  { %v4657_v19 = vpop.f32.mrb[126].mxu1 }
0x13c3   :  { %v4661_v20 = vadd.f32 %v4657_v19, %v4502_v6  ;;  %v7537_v22 = vpop.f32.mrb[127].mxu1  ;;  %v4987_v6 = vld [vmem:[%s10169_s11 + $0x18] sm:$0xff] }
0x13c4   :  { %v8330_v7 = vpack.c.bf16 %v4987_v6, %v4986_v4  ;;  %v4995_v22 = vld [vmem:[%s10169_s11 + $0x58] sm:$0xff]  ;;  %v5174_v4 = vld [vmem:[%s10172_s12] sm:$0xff]  ;;  %v5176_v6 = vld [vmem:[%s10172_s12 + $0x10] sm:$0xff] }
0x13c5   :  { %v9941_v23 = vadd.f32 %v5629_v18, %v4661_v20  ;;  %v4993_v18 = vld [vmem:[%s10169_s11 + $0x48] sm:$0xff]  ;;  %v4994_v20 = vld [vmem:[%s10169_s11 + $0x50] sm:$0xff]  ;;  %v8366_v9 = vpack.c.bf16 %v5177_v8, %v5176_v6 }
0x13c6   :  { %v8339_v19 = vpack.c.bf16 %v4993_v18, %v4992_v15  ;;  %v5642_v15 = vld [vmem:[%s10161_s14 + $0xb] ss:$0 sm:$0xff] }
0x13c7   :  { %v4667_v24 = vmax.f32 %v9941_v23, 0.0 }
0x13c9   :  { %7555 = vmatmul.mubr.msk.f32.vlgmr.msra.gmra.mrb[132].mxu0 %vm3402_vm4, %v4667_v24 }
0x13ca   :  { %7576 = vmatprep.mubr.msk.f32.mxu0 %vm8386_vm0, %v8387_v17  ;;  %8322 = vmatpush3.bf16.msra.mxu0 %v8321_v61 }
0x13cb   :  { %8323 = vmatprep.subr.bf16.mxu0 %v8385_v16 }
0x13ce   :  { %8325 = vmatpush3.bf16.msra.mxu0 %v8324_v0 }
0x13cf   :  { %8350 = vmatprep.subr.bf16.mxu0 %v8385_v16 }
0x149c   :  { %v4750_v27 = vpop.f32.mrb[132].mxu0 }
0x149d   :  { %v4751_v28 = vadd.f32 %v5630_v25, %v4750_v27  ;;  %v7556_v29 = vpop.f32.mrb[133].mxu0  ;;  %v8342_v25 = vpack.c.bf16 %v4995_v22, %v4994_v20  ;;  %v4996_v27 = vld [vmem:[%s10169_s11 + $0x60] sm:$0xff] }
0x149f   :  { %v4757_v30 = vsel %vm4756_vm5, %v4751_v28, 0.0 }
0x14a0   :  { %4758 = vadd.xlane.f32.xlu0 %v4757_v30 }
0x152d   :  { %v4759_v31 = vpop.xlane.xlu0 %4758 }
0x152e   :  { %v4761_v33 = vmul.f32 0.03125, %v4759_v31 }
0x1530   :  { %v4762_v34 = vsub.f32 %v4751_v28, %v4761_v33  ;;  %v4997_v28 = vld [vmem:[%s10169_s11 + $0x68] sm:$0xff] }
0x1531   :  { %v8345_v29 = vpack.c.bf16 %v4997_v28, %v4996_v27  ;;  %v5644_v28 = vld [vmem:[%s10161_s14 + $0xd] ss:$0 sm:$0xff] }
0x1532   :  { %v4763_v36 = vmul.f32 %v4762_v34, %v4762_v34 }
0x1534   :  { %v4764_v37 = vsel %vm4756_vm5, %v4763_v36, 0.0  ;;  %v5636_v36 = vld [vmem:[%s10161_s14 + $0x7] ss:$0 sm:$0xff] }
0x1535   :  { %4765 = vadd.xlane.f32.xlu0 %v4764_v37 }
0x15c2   :  { %v4766_v43 = vpop.xlane.xlu0 %4765 }
0x15c3   :  { %v4767_v54 = vmul.f32 0.03125, %v4766_v43  ;;  %v8351_v43 = vpack.c.bf16 %v4977_v44, %v4976_v42  ;;  %v5285_v42 = vld [vmem:[%s10173_s13 + $0x8] sm:$0xff]  ;;  %v5286_v44 = vld [vmem:[%s10173_s13 + $0x10] sm:$0xff] }
0x15c5   :  { %v4768_v1 = vadd.f32 1e-05, %v4767_v54  ;;  %v4978_v54 = vld [vmem:[%s10170_s10 + $0x10] sm:$0xff] }
0x15c7   :  { %8377 = vrsqrt.f32 %v4768_v1  ;;  %v4979_v1 = vld [vmem:[%s10170_s10 + $0x18] sm:$0xff] }
0x15d1   :  { %v8378_v12 = vpop.eup %8377 }
0x15d2   :  { %v4770_v38 = vmul.f32 %v8378_v12, %v4762_v34 }
0x15d4   :  { %v4775_v46 = vmul.f32 %v5632_v26, %v4770_v38  ;;  %v8354_v26 = vpack.c.bf16 %v4979_v1, %v4978_v54  ;;  %v4980_v38 = vld [vmem:[%s10170_s10 + $0x20] sm:$0xff] }
0x15d6   :  { %v4780_v47 = vadd.f32 %v5633_v49, %v4775_v46  ;;  %v4981_v49 = vld [vmem:[%s10170_s10 + $0x28] sm:$0xff] }
0x15d7   :  { %v8357_v46 = vpack.c.bf16 %v4981_v49, %v4980_v38  ;;  %v5646_v38 = vld [vmem:[%s10161_s14 + $0xe] ss:$0 sm:$0xff] }
0x15d8   :  { %vm4781_vm6 = vcmp.gt.f32.partialorder %v4780_v47, 0.0  ;;  %v4782_v48 = vmul.f32 0.01, %v4780_v47 }
0x15da   :  { %v4783_v35 = vsel %vm4781_vm6, %v4780_v47, %v4782_v48  ;;  %v4982_v47 = vld [vmem:[%s10170_s10 + $0x30] sm:$0xff]  ;;  %v4983_v48 = vld [vmem:[%s10170_s10 + $0x38] sm:$0xff] }
0x15db   :  { %7566 = vmatmul.mubr.msk.f32.vlgmr.msra.gmra.mrb[128].mxu1 %vm463_vm1, %v4783_v35  ;;  %v8360_v35 = vpack.c.bf16 %v4983_v48, %v4982_v47 }
0x15dc   :  { %7611 = vmatprep.mubr.msk.f32.mxu1 %vm8386_vm0, %v8387_v17  ;;  %8328 = vmatpush3.bf16.msra.mxu1 %v8327_v5  ;;  %v5175_v5 = vld [vmem:[%s10172_s12 + $0x8] sm:$0xff] }
0x15dd   :  { %8329 = vmatprep.subr.bf16.mxu1 %v8385_v16 }
0x15e0   :  { %8331 = vmatpush3.bf16.msra.mxu1 %v8330_v7  ;;  %v8363_v7 = vpack.c.bf16 %v5175_v5, %v5174_v4 }
0x15e1   :  { %8332 = vmatprep.subr.bf16.mxu1 %v8385_v16 }
0x15e4   :  { %8334 = vmatpush3.bf16.msra.mxu1 %v8333_v10 }
0x15e5   :  { %8335 = vmatprep.subr.bf16.mxu1 %v8385_v16 }
0x15e8   :  { %8337 = vmatpush3.bf16.msra.mxu1 %v8336_v14 }
0x15e9   :  { %8338 = vmatprep.subr.bf16.mxu1 %v8385_v16 }
0x15ec   :  { %8340 = vmatpush3.bf16.msra.mxu1 %v8339_v19  ;;  %v5643_v19 = vld [vmem:[%s10161_s14 + $0xc] ss:$0 sm:$0xff] }
0x15ed   :  { %8341 = vmatprep.subr.bf16.mxu1 %v8385_v16 }
0x15f0   :  { %8343 = vmatpush3.bf16.msra.mxu1 %v8342_v25 }
0x15f1   :  { %8344 = vmatprep.subr.bf16.mxu1 %v8385_v16 }
0x15f4   :  { %8346 = vmatpush3.bf16.msra.mxu1 %v8345_v29 }
0x15f5   :  { %8347 = vmatprep.subr.bf16.mxu1 %v8385_v16 }
0x16ae   :  { %v4862_v51 = vpop.f32.mrb[128].mxu1 }
0x16af   :  { %v4863_v40 = vadd.f32 %v5634_v50, %v4862_v51  ;;  %v7567_v21 = vpop.f32.mrb[129].mxu1  ;;  %v4998_v50 = vld [vmem:[%s10169_s11 + $0x70] sm:$0xff]  ;;  %v4999_v51 = vld [vmem:[%s10169_s11 + $0x78] sm:$0xff] }
0x16b0   :  { %v5638_v21 = vld [vmem:[%s10161_s14 + $0x9] ss:$0 sm:$0xff] }
0x16b1   :  { %v4868_v52 = vsel %vm4756_vm5, %v4863_v40, 0.0 }
0x16b2   :  { %4869 = vadd.xlane.f32.xlu1 %v4868_v52 }
0x173f   :  { %v4870_v53 = vpop.xlane.xlu1 %4869 }
0x1740   :  { %v4871_v55 = vmul.f32 0.03125, %v4870_v53 }
0x1742   :  { %v4872_v56 = vsub.f32 %v4863_v40, %v4871_v55  ;;  %v8348_v40 = vpack.c.bf16 %v4999_v51, %v4998_v50  ;;  %v5648_v50 = vld [vmem:[%s10161_s14 + $0x10] ss:$0 sm:$0xff] }
0x1744   :  { %v4873_v57 = vmul.f32 %v4872_v56, %v4872_v56  ;;  %8349 = vmatpush3.bf16.msra.mxu1 %v8348_v40 }
0x1746   :  { %v4874_v58 = vsel %vm4756_vm5, %v4873_v57, 0.0  ;;  %v5641_v57 = vld [vmem:[%s10161_s14 + $0xa] ss:$0 sm:$0xff] }
0x1747   :  { %4875 = vadd.xlane.f32.xlu1 %v4874_v58 }
0x17d4   :  { %v4876_v30 = vpop.xlane.xlu1 %4875 }
0x17d5   :  { %v4877_v31 = vmul.f32 0.03125, %v4876_v30 }
0x17d7   :  { %v4878_v33 = vadd.f32 1e-05, %v4877_v31 }
0x17d9   :  { %8379 = vrsqrt.f32 %v4878_v33 }
0x17e3   :  { %v8380_v34 = vpop.eup %8379 }
0x17e4   :  { %v4880_v37 = vmul.f32 %v8380_v34, %v4872_v56 }
0x17e6   :  { %v4885_v41 = vmul.f32 %v5636_v36, %v4880_v37 }
0x17e8   :  { %v4890_v45 = vadd.f32 %v5637_v39, %v4885_v41 }
0x17ea   :  { %vm4891_vm7 = vcmp.gt.f32.partialorder %v4890_v45, 0.0  ;;  %v4892_v32 = vmul.f32 0.01, %v4890_v45 }
0x17ec   :  { %v4893_v12 = vsel %vm4891_vm7, %v4890_v45, %v4892_v32  ;;  %v5287_v32 = vld [vmem:[%s10173_s13 + $0x18] sm:$0xff] }
0x17ed   :  { %7577 = vmatmul.mubr.msk.f32.vlgmr.msra.gmra.mrb[134].mxu0 %vm463_vm1, %v4893_v12 }
0x17ee   :  { %8352 = vmatpush3.bf16.msra.mxu0 %v8351_v43  ;;  %7630 = vmatprep.mubr.msk.f32.mxu0 %vm8386_vm0, %v8387_v17  ;;  %v8372_v43 = vpack.c.bf16 %v5287_v32, %v5286_v44 }
0x17ef   :  { %8353 = vmatprep.subr.bf16.mxu0 %v8385_v16 }
0x17f2   :  { %8355 = vmatpush3.bf16.msra.mxu0 %v8354_v26 }
0x17f3   :  { %8356 = vmatprep.subr.bf16.mxu0 %v8385_v16 }
0x17f6   :  { %8358 = vmatpush3.bf16.msra.mxu0 %v8357_v46  ;;  %v5647_v46 = vld [vmem:[%s10161_s14 + $0xf] ss:$0 sm:$0xff] }
0x17f7   :  { %8359 = vmatprep.subr.bf16.mxu0 %v8385_v16 }
0x17fa   :  { %8361 = vmatpush3.bf16.msra.mxu0 %v8360_v35 }
0x17fb   :  { %8362 = vmatprep.subr.bf16.mxu0 %v8385_v16 }
0x17fd   :  { %7631 = vmatmul.mubr.msk.f32.vlgmr.msra.gmra.mrb[136].mxu0 %vm3402_vm4, %v4667_v24 }
0x17fe   :  { %7641 = vmatprep.mubr.msk.f32.mxu0 %vm8386_vm0, %v8387_v17  ;;  %8364 = vmatpush3.bf16.msra.mxu0 %v8363_v7 }
0x17ff   :  { %8365 = vmatprep.subr.bf16.mxu0 %v8385_v16 }
0x1802   :  { %8367 = vmatpush3.bf16.msra.mxu0 %v8366_v9 }
0x1803   :  { %8368 = vmatprep.subr.bf16.mxu0 %v8385_v16 }
0x18c0   :  { %v4972_v23 = vpop.f32.mrb[134].mxu0 }
0x18c1   :  { %v4973_v52 = vadd.f32 %v5638_v21, %v4972_v23  ;;  %v7578_v24 = vpop.f32.mrb[135].mxu0 }
0x18c3   :  { %5368 = vst [vmem:[%s10171_s15] sm:$0x3] %v4973_v52  ;;  %7612 = vmatmul.mubr.f32.vlgmr.msra.gmra.mrb[130].mxu1 %v4973_v52 }
0x18d0   :  { %v5136_v53 = vpop.f32.mrb[136].mxu0 }
0x18d1   :  { %v7632_v55 = vpop.f32.mrb[137].mxu0 }
0x1996   :  { %v5066_v56 = vpop.f32.mrb[130].mxu1 }
0x1997   :  { %v5137_v58 = vadd.f32 %v5136_v53, %v5066_v56  ;;  %v7613_v59 = vpop.f32.mrb[131].mxu1 }
0x1999   :  { %v5145_v60 = vadd.f32 %v5641_v57, %v5137_v58 }
0x199b   :  { %v5148_v61 = vsel %vm4756_vm5, %v5145_v60, 0.0 }
0x199c   :  { %5149 = vadd.xlane.f32.xlu0 %v5148_v61 }
0x1a29   :  { %v5150_v62 = vpop.xlane.xlu0 %5149 }
0x1a2a   :  { %v5151_v63 = vmul.f32 0.03125, %v5150_v62 }
0x1a2c   :  { %v5152_v0 = vsub.f32 %v5145_v60, %v5151_v63 }
0x1a2e   :  { %v5153_v2 = vmul.f32 %v5152_v0, %v5152_v0 }
0x1a30   :  { %v5154_v3 = vsel %vm4756_vm5, %v5153_v2, 0.0 }
0x1a31   :  { %5155 = vadd.xlane.f32.xlu1 %v5154_v3 }
0x1abe   :  { %v5156_v10 = vpop.xlane.xlu1 %5155 }
0x1abf   :  { %v5157_v11 = vmul.f32 0.03125, %v5156_v10 }
0x1ac1   :  { %v5158_v13 = vadd.f32 1e-05, %v5157_v11 }
0x1ac3   :  { %8381 = vrsqrt.f32 %v5158_v13 }
0x1acd   :  { %v8382_v14 = vpop.eup %8381 }
0x1ace   :  { %v5160_v18 = vmul.f32 %v8382_v14, %v5152_v0 }
0x1ad0   :  { %v5165_v20 = vmul.f32 %v5642_v15, %v5160_v18 }
0x1ad2   :  { %v5170_v22 = vadd.f32 %v5643_v19, %v5165_v20 }
0x1ad4   :  { %vm5171_vm8 = vcmp.gt.f32.partialorder %v5170_v22, 0.0  ;;  %v5172_v25 = vmul.f32 0.01, %v5170_v22 }
0x1ad6   :  { %v5173_v27 = vsel %vm5171_vm8, %v5170_v22, %v5172_v25 }
0x1ad7   :  { %7642 = vmatmul.mubr.msk.f32.vlgmr.msra.gmra.mrb[138].mxu0 %vm463_vm1, %v5173_v27 }
0x1ad8   :  { %7652 = vmatprep.mubr.msk.f32.mxu0 %vm8386_vm0, %v8387_v17  ;;  %v5284_v17 = vld [vmem:[%s10173_s13] sm:$0xff] }
0x1ad9   :  { %v8369_v45 = vpack.c.bf16 %v5285_v42, %v5284_v17 }
0x1adb   :  { %8370 = vmatpush3.bf16.msra.mxu0 %v8369_v45 }
0x1adc   :  { %8371 = vmatprep.subr.bf16.mxu0 %v8385_v16 }
0x1adf   :  { %8373 = vmatpush3.bf16.msra.mxu0 %v8372_v43 }
0x1baa   :  { %v5252_v29 = vpop.f32.mrb[138].mxu0 }
0x1bab   :  { %v5253_v30 = vadd.f32 %v5644_v28, %v5252_v29  ;;  %v7643_v31 = vpop.f32.mrb[139].mxu0 }
0x1bad   :  { %v5258_v33 = vsel %vm4756_vm5, %v5253_v30, 0.0 }
0x1bae   :  { %5259 = vadd.xlane.f32.xlu0 %v5258_v33 }
0x1c3b   :  { %v5260_v34 = vpop.xlane.xlu0 %5259 }
0x1c3c   :  { %v5261_v36 = vmul.f32 0.03125, %v5260_v34 }
0x1c3e   :  { %v5262_v37 = vsub.f32 %v5253_v30, %v5261_v36 }
0x1c40   :  { %v5263_v39 = vmul.f32 %v5262_v37, %v5262_v37 }
0x1c42   :  { %v5264_v41 = vsel %vm4756_vm5, %v5263_v39, 0.0 }
0x1c43   :  { %5265 = vadd.xlane.f32.xlu1 %v5264_v41 }
0x1cd0   :  { %v5266_v54 = vpop.xlane.xlu1 %5265 }
0x1cd1   :  { %v5267_v1 = vmul.f32 0.03125, %v5266_v54 }
0x1cd3   :  { %v5268_v12 = vadd.f32 1e-05, %v5267_v1 }
0x1cd5   :  { %8383 = vrsqrt.f32 %v5268_v12 }
0x1cdf   :  { %v8384_v26 = vpop.eup %8383 }
0x1ce0   :  { %v5270_v49 = vmul.f32 %v8384_v26, %v5262_v37 }
0x1ce2   :  { %v5275_v47 = vmul.f32 %v5646_v38, %v5270_v49 }
0x1ce4   :  { %v5280_v48 = vadd.f32 %v5647_v46, %v5275_v47 }
0x1ce6   :  { %vm5281_vm9 = vcmp.gt.f32.partialorder %v5280_v48, 0.0  ;;  %v5282_v35 = vmul.f32 0.01, %v5280_v48 }
0x1ce8   :  { %v5283_v16 = vsel %vm5281_vm9, %v5280_v48, %v5282_v35 }
0x1ce9   :  { %7653 = vmatmul.mubr.msk.f32.vlgmr.msra.gmra.mrb[140].mxu0 %vm463_vm1, %v5283_v16 }
0x1dbc   :  { %v5362_v51 = vpop.f32.mrb[140].mxu0 }
0x1dbd   :  { %v5363_v40 = vadd.f32 %v5648_v50, %v5362_v51  ;;  %v7654_v21 = vpop.f32.mrb[141].mxu0 }
0x1dbf   :  { %v5366_v23 = vmax.f32 %v5363_v40, -20.0 }
0x1dc1   :  { %v5367_v52 = vmin.f32 %v5366_v23, 2.0 }
0x1dc3   :  { %5650 = vst [vmem:[%s10171_s15 + $0x2] sm:$0x3] %v5367_v52 }

</bundles_post_ra>
